<compile_context>
chip_gen: v6e
topology: v6e:2x2x1
jax: 0.10.0
libtpu: 0.0.40
codegen_flags: <defaults>
</compile_context>

<pallas_src>
import functools

import numpy as np
import jax
import jax.numpy as jnp
from jax.experimental import pallas as pl
from jax.experimental.pallas import tpu as pltpu


# --------------------------- Haar DWT / IWT constants ------------------------

# sign[band, row_parity, col_parity] for bands (LL, HL, LH, HH); the same
# table serves DWT analysis and IWT synthesis (orthogonal Haar).
_HAAR_SIGN = np.array(
    [[[1.0, 1.0], [1.0, 1.0]],      # LL
     [[-1.0, 1.0], [-1.0, 1.0]],    # HL
     [[-1.0, -1.0], [1.0, 1.0]],    # LH
     [[1.0, -1.0], [-1.0, 1.0]]],   # HH
    dtype=np.float32)


def _haar_matrices(H, W):
    """Constant matrices so DWT/IWT become band matmuls in flat-pixel layout.

    dmat[b]: (H*W, h*w)  x_dwt_band_b (Ch, h*w) = x_flat (Ch, H*W) @ dmat[b]
    pmat[b]: (h*w, H*W)  recon (Ch, H*W) += res_band_b (Ch, h*w) @ pmat[b]
    """
    h, w = H // 2, W // 2
    dmat = np.zeros((4, H * W, h * w), np.float32)
    for b in range(4):
        for y in range(h):
            for x in range(w):
                p = y * w + x
                for ry in range(2):
                    for rx in range(2):
                        q = (2 * y + ry) * W + (2 * x + rx)
                        dmat[b, q, p] = 0.5 * _HAAR_SIGN[b, ry, rx]
    pmat = np.transpose(dmat, (0, 2, 1)).copy()
    return jnp.asarray(dmat), jnp.asarray(pmat)


# ------------------------------ kernel helpers --------------------------------

def _shift_flat(xf, dy, dx, w, col):
    """Spatially shift a (rows, h*w) row-major flattened map with zero fill.

    result[:, y*w + x] = xf[:, (y+dy)*w + (x+dx)]  (0 when out of bounds).
    `col` is a precomputed (1, h*w) int32 array of column indices (q % w).
    """
    rows, _ = xf.shape
    off = dy * w + dx
    if off > 0:
        s = jnp.concatenate(
            [xf[:, off:], jnp.zeros((rows, off), xf.dtype)], axis=1)
    elif off < 0:
        s = jnp.concatenate(
            [jnp.zeros((rows, -off), xf.dtype), xf[:, :off]], axis=1)
    else:
        s = xf
    # Column-wrap masking (row-wrap is already handled by the zero end-fill).
    if dx > 0:
        s = jnp.where(col < (w - dx), s, jnp.zeros_like(s))
    elif dx < 0:
        s = jnp.where(col >= (-dx), s, jnp.zeros_like(s))
    return s


def _conv3x3_flat(x_f32, w_mat_bf16, h, w, col):
    """'Same' 3x3 conv, channels on sublanes / flat pixels on lanes.

    x_f32: (Cin, h*w) f32;  w_mat_bf16: (Cout, 9*Cin) bf16 with columns
    ordered (ky, kx, ci).  Builds the im2col patch matrix in VMEM and does a
    single MXU dot with K = 9*Cin, f32 accumulation.  Returns (Cout, h*w) f32.
    """
    taps = []
    for dy in (-1, 0, 1):
        for dx in (-1, 0, 1):
            taps.append(_shift_flat(x_f32, dy, dx, w, col))
    patches = jnp.concatenate(taps, axis=0).astype(jnp.bfloat16)  # (9*Cin, hw)
    return jnp.dot(w_mat_bf16, patches, preferred_element_type=jnp.float32)


# ------------------------------ fused kernel ----------------------------------

def _hwb1_kernel(x_ref, dmat_ref, pmat_ref, wb1_ref, wb2_ref, caw1_ref,
                 caw2_ref, w1sa_ref, w1ca_ref, w3_ref, wf_ref, saw_ref,
                 o_ref, *, H, W):
    """Whole HWB1 forward for one batch element, flat NCHW layout.

    x_ref:   (1, C, H*W) f32            o_ref: (1, OF, H*W) f32
    dmat_ref:(4, H*W, h*w) f32          pmat_ref: (4, h*w, H*W) f32
    wb1_ref: (C, 9*2C) bf16             wb2_ref: (2C, 9*C) bf16
    caw1_ref:(cr, 2C) f32               caw2_ref: (2C, cr) f32
    w1sa_ref/w1ca_ref: (2C, 2C) bf16    w3_ref: (OF, 9*C) bf16
    wf_ref:  (OF, C) bf16               saw_ref: (50,) f32 in SMEM
    """
    h, w = H // 2, W // 2
    HW, hw = H * W, h * w
    C = x_ref.shape[1]          # n_feat
    Ch = C // 2
    c2 = 2 * C

    col_lo = jax.lax.broadcasted_iota(jnp.int32, (1, hw), 1) % w
    col_hi = jax.lax.broadcasted_iota(jnp.int32, (1, HW), 1) % W

    x = x_ref[0]                                # (C, HW) f32
    xw = x[:Ch, :]                              # wavelet path input
    identity = x[Ch:, :]                        # identity path

    # ---- Haar DWT: 4 band matmuls, channel order [LL, HL, LH, HH] ----
    x_dwt = jnp.concatenate(
        [jnp.dot(xw, dmat_ref[b], preferred_element_type=jnp.float32)
         for b in range(4)], axis=0)            # (c2, hw) f32

    # ---- body: conv3x3 (c2 -> C) + ReLU + conv3x3 (C -> c2) ----
    res = _conv3x3_flat(x_dwt, wb1_ref[...], h, w, col_lo)
    res = jnp.maximum(res, 0.0)
    res = _conv3x3_flat(res, wb2_ref[...], h, w, col_lo)       # (c2, hw) f32

    # ---- CALayer: global avg pool -> 1x1 -> ReLU -> 1x1 -> sigmoid ----
    pooled = jnp.sum(res, axis=1, keepdims=True) * (1.0 / float(hw))   # (c2,1)
    tmp = jnp.maximum(
        jnp.dot(caw1_ref[...], pooled, preferred_element_type=jnp.float32), 0.0)
    ca = jax.nn.sigmoid(
        jnp.dot(caw2_ref[...], tmp, preferred_element_type=jnp.float32))  # (c2,1)

    # ---- SALayer: channel max/mean -> 5x5 conv (pad 2) -> sigmoid ----
    mx = jnp.max(res, axis=0, keepdims=True)                            # (1,hw)
    mn = jnp.sum(res, axis=0, keepdims=True) * (1.0 / float(c2))        # (1,hw)
    pool = jnp.concatenate([mx, mn], axis=0)                            # (2,hw)
    sa = jnp.zeros((1, hw), jnp.float32)
    for dy in range(-2, 3):
        for dx in range(-2, 3):
            t = (dy + 2) * 5 + (dx + 2)
            s = _shift_flat(pool, dy, dx, w, col_lo)                    # (2,hw)
            sa = sa + saw_ref[t] * s[0:1, :] + saw_ref[25 + t] * s[1:2, :]
    sa = jax.nn.sigmoid(sa)                                             # (1,hw)

    # ---- conv1x1(concat([res*sa, res*ca])) + x_dwt (two half matmuls) ----
    b_sa = (res * sa).astype(jnp.bfloat16)
    b_ca = (res * ca).astype(jnp.bfloat16)
    res2 = (jnp.dot(w1sa_ref[...], b_sa, preferred_element_type=jnp.float32)
            + jnp.dot(w1ca_ref[...], b_ca, preferred_element_type=jnp.float32)
            + x_dwt)                                                    # (c2,hw)

    # ---- Haar IWT: 4 band matmuls back to full resolution ----
    wave = jnp.dot(res2[0:Ch, :], pmat_ref[0],
                   preferred_element_type=jnp.float32)                  # (Ch,HW)
    for b in range(1, 4):
        wave = wave + jnp.dot(res2[b * Ch:(b + 1) * Ch, :], pmat_ref[b],
                              preferred_element_type=jnp.float32)

    # ---- conv3x3(cat([wavelet_path, identity])) -> ReLU, + conv1x1_final(x) ----
    full = jnp.concatenate([wave, identity], axis=0)                    # (C, HW)
    out = jnp.maximum(_conv3x3_flat(full, w3_ref[...], H, W, col_hi), 0.0)
    out = out + jnp.dot(wf_ref[...], x.astype(jnp.bfloat16),
                        preferred_element_type=jnp.float32)             # (OF,HW)
    o_ref[...] = out[None].astype(o_ref.dtype)


# ------------------------------ parameters ------------------------------------

def init_params(key, n_feat, o_feat, reduction):
    """Raw parameters in PyTorch (Cout, Cin, kh, kw) layout, bias-free."""
    def conv_w(k, cout, cin, ksz):
        fan_in = cin * ksz * ksz
        return (jax.random.normal(k, (cout, cin, ksz, ksz), jnp.float32)
                / jnp.sqrt(float(fan_in)))

    ks = jax.random.split(key, 8)
    return dict(
        body1=conv_w(ks[0], n_feat, n_feat * 2, 3),            # DeformConv2dPack #1
        body2=conv_w(ks[1], n_feat * 2, n_feat, 3),            # DeformConv2dPack #2
        sa=conv_w(ks[2], 1, 2, 5),                             # SALayer 5x5 conv
        ca_w1=conv_w(ks[3], (n_feat * 2) // reduction, n_feat * 2, 1),
        ca_w2=conv_w(ks[4], n_feat * 2, (n_feat * 2) // reduction, 1),
        conv1x1=conv_w(ks[5], n_feat * 2, n_feat * 4, 1),
        conv3x3=conv_w(ks[6], o_feat, n_feat, 3),
        conv1x1_final=conv_w(ks[7], o_feat, n_feat, 1),
    )


def pack_params(params):
    """One-time weight reformatting (transpose / reshape / bf16) for the kernel."""
    def conv_mat(wt):  # (Cout, Cin, k, k) -> (Cout, k*k*Cin) bf16, cols (ky,kx,ci)
        co, ci, kh, kw = wt.shape
        return (jnp.transpose(wt, (0, 2, 3, 1))
                .reshape(co, kh * kw * ci).astype(jnp.bfloat16))

    c2 = params["conv1x1"].shape[0]
    w1 = params["conv1x1"][:, :, 0, 0]                     # (c2, 2*c2)
    return dict(
        wb1=conv_mat(params["body1"]),
        wb2=conv_mat(params["body2"]),
        caw1=params["ca_w1"][:, :, 0, 0].astype(jnp.float32),   # (cr, c2)
        caw2=params["ca_w2"][:, :, 0, 0].astype(jnp.float32),   # (c2, cr)
        w1sa=w1[:, :c2].astype(jnp.bfloat16),               # SA half of conv1x1
        w1ca=w1[:, c2:].astype(jnp.bfloat16),                # CA half of conv1x1
        w3=conv_mat(params["conv3x3"]),
        wf=params["conv1x1_final"][:, :, 0, 0].astype(jnp.bfloat16),
        saw=params["sa"].reshape(-1).astype(jnp.float32),    # (50,): [max, mean]
    )


# ------------------------------ forward wrapper --------------------------------

def hwb1_forward(x_nchw, packed):
    """HWB1 forward.  x_nchw: (B, n_feat, H, W) f32.  Returns (B, o_feat, H, W)."""
    B, C, H, W = x_nchw.shape
    assert H % 2 == 0 and W % 2 == 0 and C % 2 == 0
    HW = H * W
    hw = (H // 2) * (W // 2)
    OF = packed["wf"].shape[0]

    dmat, pmat = _haar_matrices(H, W)            # trace-time constants

    def _whole(arr):
        nd = arr.ndim
        return pl.BlockSpec(arr.shape, lambda b, _nd=nd: (0,) * _nd)

    out = pl.pallas_call(
        functools.partial(_hwb1_kernel, H=H, W=W),
        out_shape=jax.ShapeDtypeStruct((B, OF, HW), jnp.float32),
        grid=(B,),
        in_specs=[
            pl.BlockSpec((1, C, HW), lambda b: (b, 0, 0)),
            _whole(dmat),
            _whole(pmat),
            _whole(packed["wb1"]),
            _whole(packed["wb2"]),
            _whole(packed["caw1"]),
            _whole(packed["caw2"]),
            _whole(packed["w1sa"]),
            _whole(packed["w1ca"]),
            _whole(packed["w3"]),
            _whole(packed["wf"]),
            pl.BlockSpec(memory_space=pltpu.MemorySpace.SMEM),
        ],
        out_specs=pl.BlockSpec((1, OF, HW), lambda b: (b, 0, 0)),
        compiler_params=pltpu.CompilerParams(
            dimension_semantics=("parallel",)),
    )(x_nchw.reshape(B, C, HW).astype(jnp.float32),
      dmat, pmat,
      packed["wb1"], packed["wb2"], packed["caw1"], packed["caw2"],
      packed["w1sa"], packed["w1ca"], packed["w3"], packed["wf"],
      packed["saw"])
    return out.reshape(B, OF, H, W)


if __name__ == "__main__":
    n_feat, o_feat, reduction = 8, 8, 4
    B, H, W = 2, 16, 16

    key = jax.random.PRNGKey(0)
    kx, kp = jax.random.split(key)
    x = jax.random.normal(kx, (B, n_feat, H, W), jnp.float32)      # NCHW input
    params = init_params(kp, n_feat, o_feat, reduction)
    packed = pack_params(params)                                    # once, outside jit

    fwd = jax.jit(hwb1_forward)
    out = jax.block_until_ready(fwd(x, packed))
    assert out.shape == (B, o_feat, H, W), out.shape
    assert bool(jnp.all(jnp.isfinite(out)))
    print("KERNEL_OK")
</pallas_src>

<mosaic_0001>
module attributes {stable_mosaic.version = 11 : i64} {
  func.func @_hwb1_kernel(%arg0: i32, %arg1: memref<1x8x256xf32, #tpu.memory_space<vmem>>, %arg2: memref<4x256x64xf32, #tpu.memory_space<vmem>>, %arg3: memref<4x64x256xf32, #tpu.memory_space<vmem>>, %arg4: memref<8x144xbf16, #tpu.memory_space<vmem>>, %arg5: memref<16x72xbf16, #tpu.memory_space<vmem>>, %arg6: memref<4x16xf32, #tpu.memory_space<vmem>>, %arg7: memref<16x4xf32, #tpu.memory_space<vmem>>, %arg8: memref<16x16xbf16, #tpu.memory_space<vmem>>, %arg9: memref<16x16xbf16, #tpu.memory_space<vmem>>, %arg10: memref<8x72xbf16, #tpu.memory_space<vmem>>, %arg11: memref<8x8xbf16, #tpu.memory_space<vmem>>, %arg12: memref<50xf32, #tpu.memory_space<smem>>, %arg13: memref<1x8x256xf32, #tpu.memory_space<vmem>>) attributes {dimension_semantics = [#tpu.dimension_semantics<parallel>], iteration_bounds = array<i64: 2>, scalar_prefetch = 0 : i64, scratch_operands = 0 : i64, tpu.core_type = #tpu.core_type<tc>, window_params = [{transform_indices = @transform_0, window_bounds = array<i64: 1, 8, 256>}, {pipeline_mode = #tpu.pipeline_mode<synchronous>, transform_indices = @transform_1, window_bounds = array<i64: 4, 256, 64>}, {pipeline_mode = #tpu.pipeline_mode<synchronous>, transform_indices = @transform_2, window_bounds = array<i64: 4, 64, 256>}, {pipeline_mode = #tpu.pipeline_mode<synchronous>, transform_indices = @transform_3, window_bounds = array<i64: 8, 144>}, {pipeline_mode = #tpu.pipeline_mode<synchronous>, transform_indices = @transform_4, window_bounds = array<i64: 16, 72>}, {pipeline_mode = #tpu.pipeline_mode<synchronous>, transform_indices = @transform_5, window_bounds = array<i64: 4, 16>}, {pipeline_mode = #tpu.pipeline_mode<synchronous>, transform_indices = @transform_6, window_bounds = array<i64: 16, 4>}, {pipeline_mode = #tpu.pipeline_mode<synchronous>, transform_indices = @transform_7, window_bounds = array<i64: 16, 16>}, {pipeline_mode = #tpu.pipeline_mode<synchronous>, transform_indices = @transform_8, window_bounds = array<i64: 16, 16>}, {pipeline_mode = #tpu.pipeline_mode<synchronous>, transform_indices = @transform_9, window_bounds = array<i64: 8, 72>}, {pipeline_mode = #tpu.pipeline_mode<synchronous>, transform_indices = @transform_10, window_bounds = array<i64: 8, 8>}, {transform_indices = @transform_11, window_bounds = array<i64: 50>}, {transform_indices = @transform_12, window_bounds = array<i64: 1, 8, 256>}]} {
    %0 = tpu.iota {dimensions = array<i32: 1>} : vector<1x64xi32>
    %c8_i32 = arith.constant 8 : i32
    %c0_i32 = arith.constant 0 : i32
    %1 = arith.cmpi eq, %c8_i32, %c0_i32 : i32
    %c1_i32 = arith.constant 1 : i32
    %2 = arith.select %1, %c1_i32, %c8_i32 : i32
    %3 = vector.broadcast %2 : i32 to vector<1x64xi32>
    %4 = arith.remsi %0, %3 : vector<1x64xi32>
    %c0_i32_0 = arith.constant 0 : i32
    %5 = vector.broadcast %c0_i32_0 : i32 to vector<1x64xi32>
    %6 = arith.cmpi ne, %4, %5 : vector<1x64xi32>
    %c0_i32_1 = arith.constant 0 : i32
    %7 = vector.broadcast %c0_i32_1 : i32 to vector<1x64xi32>
    %8 = arith.cmpi slt, %4, %7 : vector<1x64xi32>
    %c0_i32_2 = arith.constant 0 : i32
    %9 = arith.cmpi slt, %2, %c0_i32_2 : i32
    %10 = vector.broadcast %9 : i1 to vector<1x64xi1>
    %11 = vector.broadcast %10 : vector<1x64xi1> to vector<1x64xi1>
    %12 = arith.xori %8, %11 : vector<1x64xi1>
    %13 = arith.andi %12, %6 : vector<1x64xi1>
    %14 = vector.broadcast %2 : i32 to vector<1x64xi32>
    %15 = arith.addi %4, %14 : vector<1x64xi32>
    %16 = arith.select %13, %15, %4 : vector<1x64xi1>, vector<1x64xi32>
    %17 = tpu.iota {dimensions = array<i32: 1>} : vector<1x256xi32>
    %c16_i32 = arith.constant 16 : i32
    %c0_i32_3 = arith.constant 0 : i32
    %18 = arith.cmpi eq, %c16_i32, %c0_i32_3 : i32
    %c1_i32_4 = arith.constant 1 : i32
    %19 = arith.select %18, %c1_i32_4, %c16_i32 : i32
    %20 = vector.broadcast %19 : i32 to vector<1x256xi32>
    %21 = arith.remsi %17, %20 : vector<1x256xi32>
    %c0_i32_5 = arith.constant 0 : i32
    %22 = vector.broadcast %c0_i32_5 : i32 to vector<1x256xi32>
    %23 = arith.cmpi ne, %21, %22 : vector<1x256xi32>
    %c0_i32_6 = arith.constant 0 : i32
    %24 = vector.broadcast %c0_i32_6 : i32 to vector<1x256xi32>
    %25 = arith.cmpi slt, %21, %24 : vector<1x256xi32>
    %c0_i32_7 = arith.constant 0 : i32
    %26 = arith.cmpi slt, %19, %c0_i32_7 : i32
    %27 = vector.broadcast %26 : i1 to vector<1x256xi1>
    %28 = vector.broadcast %27 : vector<1x256xi1> to vector<1x256xi1>
    %29 = arith.xori %25, %28 : vector<1x256xi1>
    %30 = arith.andi %29, %23 : vector<1x256xi1>
    %31 = vector.broadcast %19 : i32 to vector<1x256xi32>
    %32 = arith.addi %21, %31 : vector<1x256xi32>
    %33 = arith.select %30, %32, %21 : vector<1x256xi1>, vector<1x256xi32>
    %c0 = arith.constant 0 : index
    %c0_8 = arith.constant 0 : index
    %c0_9 = arith.constant 0 : index
    %34 = vector.load %arg1[%c0, %c0_8, %c0_9] : memref<1x8x256xf32, #tpu.memory_space<vmem>>, vector<1x8x256xf32>
    %35 = vector.shape_cast %34 : vector<1x8x256xf32> to vector<8x256xf32>
    %36 = vector.extract_strided_slice %35 {offsets = [0, 0], sizes = [4, 256], strides = [1, 1]} : vector<8x256xf32> to vector<4x256xf32>
    %37 = vector.extract_strided_slice %35 {offsets = [4, 0], sizes = [4, 256], strides = [1, 1]} : vector<8x256xf32> to vector<4x256xf32>
    %c0_10 = arith.constant 0 : index
    %c0_11 = arith.constant 0 : index
    %c0_12 = arith.constant 0 : index
    %38 = vector.load %arg2[%c0_10, %c0_11, %c0_12] : memref<4x256x64xf32, #tpu.memory_space<vmem>>, vector<1x256x64xf32>
    %39 = vector.shape_cast %38 : vector<1x256x64xf32> to vector<256x64xf32>
    %cst = arith.constant dense<0.000000e+00> : vector<4x64xf32>
    %40 = tpu.matmul %36, %39, %cst {dimension_numbers = #tpu.dot_dimension_numbers<[1], [0], [0], [1], [0, 0, 1, 1], [], []>} : vector<4x256xf32>, vector<256x64xf32>, vector<4x64xf32> -> vector<4x64xf32>
    %c1 = arith.constant 1 : index
    %c0_13 = arith.constant 0 : index
    %c0_14 = arith.constant 0 : index
    %41 = vector.load %arg2[%c1, %c0_13, %c0_14] : memref<4x256x64xf32, #tpu.memory_space<vmem>>, vector<1x256x64xf32>
    %42 = vector.shape_cast %41 : vector<1x256x64xf32> to vector<256x64xf32>
    %cst_15 = arith.constant dense<0.000000e+00> : vector<4x64xf32>
    %43 = tpu.matmul %36, %42, %cst_15 {dimension_numbers = #tpu.dot_dimension_numbers<[1], [0], [0], [1], [0, 0, 1, 1], [], []>} : vector<4x256xf32>, vector<256x64xf32>, vector<4x64xf32> -> vector<4x64xf32>
    %c2 = arith.constant 2 : index
    %c0_16 = arith.constant 0 : index
    %c0_17 = arith.constant 0 : index
    %44 = vector.load %arg2[%c2, %c0_16, %c0_17] : memref<4x256x64xf32, #tpu.memory_space<vmem>>, vector<1x256x64xf32>
    %45 = vector.shape_cast %44 : vector<1x256x64xf32> to vector<256x64xf32>
    %cst_18 = arith.constant dense<0.000000e+00> : vector<4x64xf32>
    %46 = tpu.matmul %36, %45, %cst_18 {dimension_numbers = #tpu.dot_dimension_numbers<[1], [0], [0], [1], [0, 0, 1, 1], [], []>} : vector<4x256xf32>, vector<256x64xf32>, vector<4x64xf32> -> vector<4x64xf32>
    %c3 = arith.constant 3 : index
    %c0_19 = arith.constant 0 : index
    %c0_20 = arith.constant 0 : index
    %47 = vector.load %arg2[%c3, %c0_19, %c0_20] : memref<4x256x64xf32, #tpu.memory_space<vmem>>, vector<1x256x64xf32>
    %48 = vector.shape_cast %47 : vector<1x256x64xf32> to vector<256x64xf32>
    %cst_21 = arith.constant dense<0.000000e+00> : vector<4x64xf32>
    %49 = tpu.matmul %36, %48, %cst_21 {dimension_numbers = #tpu.dot_dimension_numbers<[1], [0], [0], [1], [0, 0, 1, 1], [], []>} : vector<4x256xf32>, vector<256x64xf32>, vector<4x64xf32> -> vector<4x64xf32>
    %50 = tpu.concatenate %40, %43, %46, %49 in 0 : vector<4x64xf32>, vector<4x64xf32>, vector<4x64xf32>, vector<4x64xf32> -> vector<16x64xf32>
    %c0_22 = arith.constant 0 : index
    %c0_23 = arith.constant 0 : index
    %51 = vector.load %arg4[%c0_22, %c0_23] : memref<8x144xbf16, #tpu.memory_space<vmem>>, vector<8x144xbf16>
    %cst_24 = arith.constant 0.000000e+00 : f32
    %52 = vector.broadcast %cst_24 : f32 to vector<16x9xf32>
    %53 = vector.extract_strided_slice %50 {offsets = [0, 0], sizes = [16, 55], strides = [1, 1]} : vector<16x64xf32> to vector<16x55xf32>
    %54 = tpu.concatenate %52, %53 in 1 : vector<16x9xf32>, vector<16x55xf32> -> vector<16x64xf32>
    %c1_i32_25 = arith.constant 1 : i32
    %55 = vector.broadcast %c1_i32_25 : i32 to vector<1x64xi32>
    %56 = arith.cmpi sge, %16, %55 : vector<1x64xi32>
    %cst_26 = arith.constant 0.000000e+00 : f32
    %57 = vector.broadcast %cst_26 : f32 to vector<16x64xf32>
    %58 = vector.shape_cast %56 : vector<1x64xi1> to vector<1x64xi1>
    %59 = vector.broadcast %58 : vector<1x64xi1> to vector<16x64xi1>
    %60 = arith.select %59, %54, %57 : vector<16x64xi1>, vector<16x64xf32>
    %cst_27 = arith.constant 0.000000e+00 : f32
    %61 = vector.broadcast %cst_27 : f32 to vector<16x8xf32>
    %62 = vector.extract_strided_slice %50 {offsets = [0, 0], sizes = [16, 56], strides = [1, 1]} : vector<16x64xf32> to vector<16x56xf32>
    %63 = tpu.concatenate %61, %62 in 1 : vector<16x8xf32>, vector<16x56xf32> -> vector<16x64xf32>
    %cst_28 = arith.constant 0.000000e+00 : f32
    %64 = vector.broadcast %cst_28 : f32 to vector<16x7xf32>
    %65 = vector.extract_strided_slice %50 {offsets = [0, 0], sizes = [16, 57], strides = [1, 1]} : vector<16x64xf32> to vector<16x57xf32>
    %66 = tpu.concatenate %64, %65 in 1 : vector<16x7xf32>, vector<16x57xf32> -> vector<16x64xf32>
    %c7_i32 = arith.constant 7 : i32
    %67 = vector.broadcast %c7_i32 : i32 to vector<1x64xi32>
    %68 = arith.cmpi slt, %16, %67 : vector<1x64xi32>
    %cst_29 = arith.constant 0.000000e+00 : f32
    %69 = vector.broadcast %cst_29 : f32 to vector<16x64xf32>
    %70 = vector.shape_cast %68 : vector<1x64xi1> to vector<1x64xi1>
    %71 = vector.broadcast %70 : vector<1x64xi1> to vector<16x64xi1>
    %72 = arith.select %71, %66, %69 : vector<16x64xi1>, vector<16x64xf32>
    %cst_30 = arith.constant 0.000000e+00 : f32
    %73 = vector.broadcast %cst_30 : f32 to vector<16x1xf32>
    %74 = vector.extract_strided_slice %50 {offsets = [0, 0], sizes = [16, 63], strides = [1, 1]} : vector<16x64xf32> to vector<16x63xf32>
    %75 = tpu.concatenate %73, %74 in 1 : vector<16x1xf32>, vector<16x63xf32> -> vector<16x64xf32>
    %c1_i32_31 = arith.constant 1 : i32
    %76 = vector.broadcast %c1_i32_31 : i32 to vector<1x64xi32>
    %77 = arith.cmpi sge, %16, %76 : vector<1x64xi32>
    %cst_32 = arith.constant 0.000000e+00 : f32
    %78 = vector.broadcast %cst_32 : f32 to vector<16x64xf32>
    %79 = vector.shape_cast %77 : vector<1x64xi1> to vector<1x64xi1>
    %80 = vector.broadcast %79 : vector<1x64xi1> to vector<16x64xi1>
    %81 = arith.select %80, %75, %78 : vector<16x64xi1>, vector<16x64xf32>
    %82 = vector.extract_strided_slice %50 {offsets = [0, 1], sizes = [16, 63], strides = [1, 1]} : vector<16x64xf32> to vector<16x63xf32>
    %cst_33 = arith.constant 0.000000e+00 : f32
    %83 = vector.broadcast %cst_33 : f32 to vector<16x1xf32>
    %84 = tpu.concatenate %82, %83 in 1 : vector<16x63xf32>, vector<16x1xf32> -> vector<16x64xf32>
    %c7_i32_34 = arith.constant 7 : i32
    %85 = vector.broadcast %c7_i32_34 : i32 to vector<1x64xi32>
    %86 = arith.cmpi slt, %16, %85 : vector<1x64xi32>
    %cst_35 = arith.constant 0.000000e+00 : f32
    %87 = vector.broadcast %cst_35 : f32 to vector<16x64xf32>
    %88 = vector.shape_cast %86 : vector<1x64xi1> to vector<1x64xi1>
    %89 = vector.broadcast %88 : vector<1x64xi1> to vector<16x64xi1>
    %90 = arith.select %89, %84, %87 : vector<16x64xi1>, vector<16x64xf32>
    %91 = vector.extract_strided_slice %50 {offsets = [0, 7], sizes = [16, 57], strides = [1, 1]} : vector<16x64xf32> to vector<16x57xf32>
    %cst_36 = arith.constant 0.000000e+00 : f32
    %92 = vector.broadcast %cst_36 : f32 to vector<16x7xf32>
    %93 = tpu.concatenate %91, %92 in 1 : vector<16x57xf32>, vector<16x7xf32> -> vector<16x64xf32>
    %c1_i32_37 = arith.constant 1 : i32
    %94 = vector.broadcast %c1_i32_37 : i32 to vector<1x64xi32>
    %95 = arith.cmpi sge, %16, %94 : vector<1x64xi32>
    %cst_38 = arith.constant 0.000000e+00 : f32
    %96 = vector.broadcast %cst_38 : f32 to vector<16x64xf32>
    %97 = vector.shape_cast %95 : vector<1x64xi1> to vector<1x64xi1>
    %98 = vector.broadcast %97 : vector<1x64xi1> to vector<16x64xi1>
    %99 = arith.select %98, %93, %96 : vector<16x64xi1>, vector<16x64xf32>
    %100 = vector.extract_strided_slice %50 {offsets = [0, 8], sizes = [16, 56], strides = [1, 1]} : vector<16x64xf32> to vector<16x56xf32>
    %cst_39 = arith.constant 0.000000e+00 : f32
    %101 = vector.broadcast %cst_39 : f32 to vector<16x8xf32>
    %102 = tpu.concatenate %100, %101 in 1 : vector<16x56xf32>, vector<16x8xf32> -> vector<16x64xf32>
    %103 = vector.extract_strided_slice %50 {offsets = [0, 9], sizes = [16, 55], strides = [1, 1]} : vector<16x64xf32> to vector<16x55xf32>
    %cst_40 = arith.constant 0.000000e+00 : f32
    %104 = vector.broadcast %cst_40 : f32 to vector<16x9xf32>
    %105 = tpu.concatenate %103, %104 in 1 : vector<16x55xf32>, vector<16x9xf32> -> vector<16x64xf32>
    %c7_i32_41 = arith.constant 7 : i32
    %106 = vector.broadcast %c7_i32_41 : i32 to vector<1x64xi32>
    %107 = arith.cmpi slt, %16, %106 : vector<1x64xi32>
    %cst_42 = arith.constant 0.000000e+00 : f32
    %108 = vector.broadcast %cst_42 : f32 to vector<16x64xf32>
    %109 = vector.shape_cast %107 : vector<1x64xi1> to vector<1x64xi1>
    %110 = vector.broadcast %109 : vector<1x64xi1> to vector<16x64xi1>
    %111 = arith.select %110, %105, %108 : vector<16x64xi1>, vector<16x64xf32>
    %112 = tpu.concatenate %60, %63, %72, %81, %50, %90, %99, %102, %111 in 0 : vector<16x64xf32>, vector<16x64xf32>, vector<16x64xf32>, vector<16x64xf32>, vector<16x64xf32>, vector<16x64xf32>, vector<16x64xf32>, vector<16x64xf32>, vector<16x64xf32> -> vector<144x64xf32>
    %113 = arith.truncf %112 : vector<144x64xf32> to vector<144x64xbf16>
    %cst_43 = arith.constant dense<0.000000e+00> : vector<8x64xf32>
    %114 = tpu.matmul %51, %113, %cst_43 {dimension_numbers = #tpu.dot_dimension_numbers<[1], [0], [0], [1], [0, 0, 1, 1], [], []>} : vector<8x144xbf16>, vector<144x64xbf16>, vector<8x64xf32> -> vector<8x64xf32>
    %cst_44 = arith.constant 0.000000e+00 : f32
    %115 = vector.broadcast %cst_44 : f32 to vector<8x64xf32>
    %116 = arith.maximumf %114, %115 : vector<8x64xf32>
    %c0_45 = arith.constant 0 : index
    %c0_46 = arith.constant 0 : index
    %117 = vector.load %arg5[%c0_45, %c0_46] : memref<16x72xbf16, #tpu.memory_space<vmem>>, vector<16x72xbf16>
    %cst_47 = arith.constant 0.000000e+00 : f32
    %118 = vector.broadcast %cst_47 : f32 to vector<8x9xf32>
    %119 = vector.extract_strided_slice %116 {offsets = [0, 0], sizes = [8, 55], strides = [1, 1]} : vector<8x64xf32> to vector<8x55xf32>
    %120 = tpu.concatenate %118, %119 in 1 : vector<8x9xf32>, vector<8x55xf32> -> vector<8x64xf32>
    %c1_i32_48 = arith.constant 1 : i32
    %121 = vector.broadcast %c1_i32_48 : i32 to vector<1x64xi32>
    %122 = arith.cmpi sge, %16, %121 : vector<1x64xi32>
    %cst_49 = arith.constant 0.000000e+00 : f32
    %123 = vector.broadcast %cst_49 : f32 to vector<8x64xf32>
    %124 = vector.shape_cast %122 : vector<1x64xi1> to vector<1x64xi1>
    %125 = vector.broadcast %124 : vector<1x64xi1> to vector<8x64xi1>
    %126 = arith.select %125, %120, %123 : vector<8x64xi1>, vector<8x64xf32>
    %cst_50 = arith.constant 0.000000e+00 : f32
    %127 = vector.broadcast %cst_50 : f32 to vector<8x8xf32>
    %128 = vector.extract_strided_slice %116 {offsets = [0, 0], sizes = [8, 56], strides = [1, 1]} : vector<8x64xf32> to vector<8x56xf32>
    %129 = tpu.concatenate %127, %128 in 1 : vector<8x8xf32>, vector<8x56xf32> -> vector<8x64xf32>
    %cst_51 = arith.constant 0.000000e+00 : f32
    %130 = vector.broadcast %cst_51 : f32 to vector<8x7xf32>
    %131 = vector.extract_strided_slice %116 {offsets = [0, 0], sizes = [8, 57], strides = [1, 1]} : vector<8x64xf32> to vector<8x57xf32>
    %132 = tpu.concatenate %130, %131 in 1 : vector<8x7xf32>, vector<8x57xf32> -> vector<8x64xf32>
    %c7_i32_52 = arith.constant 7 : i32
    %133 = vector.broadcast %c7_i32_52 : i32 to vector<1x64xi32>
    %134 = arith.cmpi slt, %16, %133 : vector<1x64xi32>
    %cst_53 = arith.constant 0.000000e+00 : f32
    %135 = vector.broadcast %cst_53 : f32 to vector<8x64xf32>
    %136 = vector.shape_cast %134 : vector<1x64xi1> to vector<1x64xi1>
    %137 = vector.broadcast %136 : vector<1x64xi1> to vector<8x64xi1>
    %138 = arith.select %137, %132, %135 : vector<8x64xi1>, vector<8x64xf32>
    %cst_54 = arith.constant 0.000000e+00 : f32
    %139 = vector.broadcast %cst_54 : f32 to vector<8x1xf32>
    %140 = vector.extract_strided_slice %116 {offsets = [0, 0], sizes = [8, 63], strides = [1, 1]} : vector<8x64xf32> to vector<8x63xf32>
    %141 = tpu.concatenate %139, %140 in 1 : vector<8x1xf32>, vector<8x63xf32> -> vector<8x64xf32>
    %c1_i32_55 = arith.constant 1 : i32
    %142 = vector.broadcast %c1_i32_55 : i32 to vector<1x64xi32>
    %143 = arith.cmpi sge, %16, %142 : vector<1x64xi32>
    %cst_56 = arith.constant 0.000000e+00 : f32
    %144 = vector.broadcast %cst_56 : f32 to vector<8x64xf32>
    %145 = vector.shape_cast %143 : vector<1x64xi1> to vector<1x64xi1>
    %146 = vector.broadcast %145 : vector<1x64xi1> to vector<8x64xi1>
    %147 = arith.select %146, %141, %144 : vector<8x64xi1>, vector<8x64xf32>
    %148 = vector.extract_strided_slice %116 {offsets = [0, 1], sizes = [8, 63], strides = [1, 1]} : vector<8x64xf32> to vector<8x63xf32>
    %cst_57 = arith.constant 0.000000e+00 : f32
    %149 = vector.broadcast %cst_57 : f32 to vector<8x1xf32>
    %150 = tpu.concatenate %148, %149 in 1 : vector<8x63xf32>, vector<8x1xf32> -> vector<8x64xf32>
    %c7_i32_58 = arith.constant 7 : i32
    %151 = vector.broadcast %c7_i32_58 : i32 to vector<1x64xi32>
    %152 = arith.cmpi slt, %16, %151 : vector<1x64xi32>
    %cst_59 = arith.constant 0.000000e+00 : f32
    %153 = vector.broadcast %cst_59 : f32 to vector<8x64xf32>
    %154 = vector.shape_cast %152 : vector<1x64xi1> to vector<1x64xi1>
    %155 = vector.broadcast %154 : vector<1x64xi1> to vector<8x64xi1>
    %156 = arith.select %155, %150, %153 : vector<8x64xi1>, vector<8x64xf32>
    %157 = vector.extract_strided_slice %116 {offsets = [0, 7], sizes = [8, 57], strides = [1, 1]} : vector<8x64xf32> to vector<8x57xf32>
    %cst_60 = arith.constant 0.000000e+00 : f32
    %158 = vector.broadcast %cst_60 : f32 to vector<8x7xf32>
    %159 = tpu.concatenate %157, %158 in 1 : vector<8x57xf32>, vector<8x7xf32> -> vector<8x64xf32>
    %c1_i32_61 = arith.constant 1 : i32
    %160 = vector.broadcast %c1_i32_61 : i32 to vector<1x64xi32>
    %161 = arith.cmpi sge, %16, %160 : vector<1x64xi32>
    %cst_62 = arith.constant 0.000000e+00 : f32
    %162 = vector.broadcast %cst_62 : f32 to vector<8x64xf32>
    %163 = vector.shape_cast %161 : vector<1x64xi1> to vector<1x64xi1>
    %164 = vector.broadcast %163 : vector<1x64xi1> to vector<8x64xi1>
    %165 = arith.select %164, %159, %162 : vector<8x64xi1>, vector<8x64xf32>
    %166 = vector.extract_strided_slice %116 {offsets = [0, 8], sizes = [8, 56], strides = [1, 1]} : vector<8x64xf32> to vector<8x56xf32>
    %cst_63 = arith.constant 0.000000e+00 : f32
    %167 = vector.broadcast %cst_63 : f32 to vector<8x8xf32>
    %168 = tpu.concatenate %166, %167 in 1 : vector<8x56xf32>, vector<8x8xf32> -> vector<8x64xf32>
    %169 = vector.extract_strided_slice %116 {offsets = [0, 9], sizes = [8, 55], strides = [1, 1]} : vector<8x64xf32> to vector<8x55xf32>
    %cst_64 = arith.constant 0.000000e+00 : f32
    %170 = vector.broadcast %cst_64 : f32 to vector<8x9xf32>
    %171 = tpu.concatenate %169, %170 in 1 : vector<8x55xf32>, vector<8x9xf32> -> vector<8x64xf32>
    %c7_i32_65 = arith.constant 7 : i32
    %172 = vector.broadcast %c7_i32_65 : i32 to vector<1x64xi32>
    %173 = arith.cmpi slt, %16, %172 : vector<1x64xi32>
    %cst_66 = arith.constant 0.000000e+00 : f32
    %174 = vector.broadcast %cst_66 : f32 to vector<8x64xf32>
    %175 = vector.shape_cast %173 : vector<1x64xi1> to vector<1x64xi1>
    %176 = vector.broadcast %175 : vector<1x64xi1> to vector<8x64xi1>
    %177 = arith.select %176, %171, %174 : vector<8x64xi1>, vector<8x64xf32>
    %178 = tpu.concatenate %126, %129, %138, %147, %116, %156, %165, %168, %177 in 0 : vector<8x64xf32>, vector<8x64xf32>, vector<8x64xf32>, vector<8x64xf32>, vector<8x64xf32>, vector<8x64xf32>, vector<8x64xf32>, vector<8x64xf32>, vector<8x64xf32> -> vector<72x64xf32>
    %179 = arith.truncf %178 : vector<72x64xf32> to vector<72x64xbf16>
    %cst_67 = arith.constant dense<0.000000e+00> : vector<16x64xf32>
    %180 = tpu.matmul %117, %179, %cst_67 {dimension_numbers = #tpu.dot_dimension_numbers<[1], [0], [0], [1], [0, 0, 1, 1], [], []>} : vector<16x72xbf16>, vector<72x64xbf16>, vector<16x64xf32> -> vector<16x64xf32>
    %cst_68 = arith.constant dense<0.000000e+00> : vector<16xf32>
    %181 = vector.multi_reduction <add>, %180, %cst_68 [1] : vector<16x64xf32> to vector<16xf32>
    %182 = vector.shape_cast %181 : vector<16xf32> to vector<16x1xf32>
    %cst_69 = arith.constant 1.562500e-02 : f32
    %183 = vector.broadcast %cst_69 : f32 to vector<16x1xf32>
    %184 = arith.mulf %182, %183 : vector<16x1xf32>
    %c0_70 = arith.constant 0 : index
    %c0_71 = arith.constant 0 : index
    %185 = vector.load %arg6[%c0_70, %c0_71] : memref<4x16xf32, #tpu.memory_space<vmem>>, vector<4x16xf32>
    %cst_72 = arith.constant dense<0.000000e+00> : vector<4x1xf32>
    %186 = tpu.matmul %185, %184, %cst_72 {dimension_numbers = #tpu.dot_dimension_numbers<[1], [0], [0], [1], [0, 0, 1, 1], [], []>} : vector<4x16xf32>, vector<16x1xf32>, vector<4x1xf32> -> vector<4x1xf32>
    %cst_73 = arith.constant 0.000000e+00 : f32
    %187 = vector.broadcast %cst_73 : f32 to vector<4x1xf32>
    %188 = arith.maximumf %186, %187 : vector<4x1xf32>
    %c0_74 = arith.constant 0 : index
    %c0_75 = arith.constant 0 : index
    %189 = vector.load %arg7[%c0_74, %c0_75] : memref<16x4xf32, #tpu.memory_space<vmem>>, vector<16x4xf32>
    %cst_76 = arith.constant dense<0.000000e+00> : vector<16x1xf32>
    %190 = tpu.matmul %189, %188, %cst_76 {dimension_numbers = #tpu.dot_dimension_numbers<[1], [0], [0], [1], [0, 0, 1, 1], [], []>} : vector<16x4xf32>, vector<4x1xf32>, vector<16x1xf32> -> vector<16x1xf32>
    %191 = arith.negf %190 : vector<16x1xf32>
    %192 = math.exp %191 : vector<16x1xf32>
    %cst_77 = arith.constant 1.000000e+00 : f32
    %193 = vector.broadcast %cst_77 : f32 to vector<16x1xf32>
    %194 = arith.addf %193, %192 : vector<16x1xf32>
    %195 = arith.divf %193, %194 : vector<16x1xf32>
    %cst_78 = arith.constant dense<0xFF800000> : vector<64xf32>
    %196 = vector.multi_reduction <maximumf>, %180, %cst_78 [0] : vector<16x64xf32> to vector<64xf32>
    %197 = vector.shape_cast %196 : vector<64xf32> to vector<1x64xf32>
    %cst_79 = arith.constant dense<0.000000e+00> : vector<64xf32>
    %198 = vector.multi_reduction <add>, %180, %cst_79 [0] : vector<16x64xf32> to vector<64xf32>
    %199 = vector.shape_cast %198 : vector<64xf32> to vector<1x64xf32>
    %cst_80 = arith.constant 6.250000e-02 : f32
    %200 = vector.broadcast %cst_80 : f32 to vector<1x64xf32>
    %201 = arith.mulf %199, %200 : vector<1x64xf32>
    %202 = tpu.concatenate %197, %201 in 0 : vector<1x64xf32>, vector<1x64xf32> -> vector<2x64xf32>
    %cst_81 = arith.constant 0.000000e+00 : f32
    %203 = vector.broadcast %cst_81 : f32 to vector<1x64xf32>
    %cst_82 = arith.constant 0.000000e+00 : f32
    %204 = vector.broadcast %cst_82 : f32 to vector<2x18xf32>
    %205 = vector.extract_strided_slice %202 {offsets = [0, 0], sizes = [2, 46], strides = [1, 1]} : vector<2x64xf32> to vector<2x46xf32>
    %206 = tpu.concatenate %204, %205 in 1 : vector<2x18xf32>, vector<2x46xf32> -> vector<2x64xf32>
    %c2_i32 = arith.constant 2 : i32
    %207 = vector.broadcast %c2_i32 : i32 to vector<1x64xi32>
    %208 = arith.cmpi sge, %16, %207 : vector<1x64xi32>
    %cst_83 = arith.constant 0.000000e+00 : f32
    %209 = vector.broadcast %cst_83 : f32 to vector<2x64xf32>
    %210 = vector.shape_cast %208 : vector<1x64xi1> to vector<1x64xi1>
    %211 = vector.broadcast %210 : vector<1x64xi1> to vector<2x64xi1>
    %212 = arith.select %211, %206, %209 : vector<2x64xi1>, vector<2x64xf32>
    %c0_84 = arith.constant 0 : index
    %213 = memref.load %arg12[%c0_84] : memref<50xf32, #tpu.memory_space<smem>>
    %214 = vector.extract_strided_slice %212 {offsets = [0, 0], sizes = [1, 64], strides = [1, 1]} : vector<2x64xf32> to vector<1x64xf32>
    %215 = vector.broadcast %213 : f32 to vector<1x64xf32>
    %216 = arith.mulf %215, %214 : vector<1x64xf32>
    %217 = arith.addf %203, %216 : vector<1x64xf32>
    %c25 = arith.constant 25 : index
    %218 = memref.load %arg12[%c25] : memref<50xf32, #tpu.memory_space<smem>>
    %219 = vector.extract_strided_slice %212 {offsets = [1, 0], sizes = [1, 64], strides = [1, 1]} : vector<2x64xf32> to vector<1x64xf32>
    %220 = vector.broadcast %218 : f32 to vector<1x64xf32>
    %221 = arith.mulf %220, %219 : vector<1x64xf32>
    %222 = arith.addf %217, %221 : vector<1x64xf32>
    %cst_85 = arith.constant 0.000000e+00 : f32
    %223 = vector.broadcast %cst_85 : f32 to vector<2x17xf32>
    %224 = vector.extract_strided_slice %202 {offsets = [0, 0], sizes = [2, 47], strides = [1, 1]} : vector<2x64xf32> to vector<2x47xf32>
    %225 = tpu.concatenate %223, %224 in 1 : vector<2x17xf32>, vector<2x47xf32> -> vector<2x64xf32>
    %c1_i32_86 = arith.constant 1 : i32
    %226 = vector.broadcast %c1_i32_86 : i32 to vector<1x64xi32>
    %227 = arith.cmpi sge, %16, %226 : vector<1x64xi32>
    %cst_87 = arith.constant 0.000000e+00 : f32
    %228 = vector.broadcast %cst_87 : f32 to vector<2x64xf32>
    %229 = vector.shape_cast %227 : vector<1x64xi1> to vector<1x64xi1>
    %230 = vector.broadcast %229 : vector<1x64xi1> to vector<2x64xi1>
    %231 = arith.select %230, %225, %228 : vector<2x64xi1>, vector<2x64xf32>
    %c1_88 = arith.constant 1 : index
    %232 = memref.load %arg12[%c1_88] : memref<50xf32, #tpu.memory_space<smem>>
    %233 = vector.extract_strided_slice %231 {offsets = [0, 0], sizes = [1, 64], strides = [1, 1]} : vector<2x64xf32> to vector<1x64xf32>
    %234 = vector.broadcast %232 : f32 to vector<1x64xf32>
    %235 = arith.mulf %234, %233 : vector<1x64xf32>
    %236 = arith.addf %222, %235 : vector<1x64xf32>
    %c26 = arith.constant 26 : index
    %237 = memref.load %arg12[%c26] : memref<50xf32, #tpu.memory_space<smem>>
    %238 = vector.extract_strided_slice %231 {offsets = [1, 0], sizes = [1, 64], strides = [1, 1]} : vector<2x64xf32> to vector<1x64xf32>
    %239 = vector.broadcast %237 : f32 to vector<1x64xf32>
    %240 = arith.mulf %239, %238 : vector<1x64xf32>
    %241 = arith.addf %236, %240 : vector<1x64xf32>
    %cst_89 = arith.constant 0.000000e+00 : f32
    %242 = vector.broadcast %cst_89 : f32 to vector<2x16xf32>
    %243 = vector.extract_strided_slice %202 {offsets = [0, 0], sizes = [2, 48], strides = [1, 1]} : vector<2x64xf32> to vector<2x48xf32>
    %244 = tpu.concatenate %242, %243 in 1 : vector<2x16xf32>, vector<2x48xf32> -> vector<2x64xf32>
    %c2_90 = arith.constant 2 : index
    %245 = memref.load %arg12[%c2_90] : memref<50xf32, #tpu.memory_space<smem>>
    %246 = vector.extract_strided_slice %244 {offsets = [0, 0], sizes = [1, 64], strides = [1, 1]} : vector<2x64xf32> to vector<1x64xf32>
    %247 = vector.broadcast %245 : f32 to vector<1x64xf32>
    %248 = arith.mulf %247, %246 : vector<1x64xf32>
    %249 = arith.addf %241, %248 : vector<1x64xf32>
    %c27 = arith.constant 27 : index
    %250 = memref.load %arg12[%c27] : memref<50xf32, #tpu.memory_space<smem>>
    %251 = vector.extract_strided_slice %244 {offsets = [1, 0], sizes = [1, 64], strides = [1, 1]} : vector<2x64xf32> to vector<1x64xf32>
    %252 = vector.broadcast %250 : f32 to vector<1x64xf32>
    %253 = arith.mulf %252, %251 : vector<1x64xf32>
    %254 = arith.addf %249, %253 : vector<1x64xf32>
    %cst_91 = arith.constant 0.000000e+00 : f32
    %255 = vector.broadcast %cst_91 : f32 to vector<2x15xf32>
    %256 = vector.extract_strided_slice %202 {offsets = [0, 0], sizes = [2, 49], strides = [1, 1]} : vector<2x64xf32> to vector<2x49xf32>
    %257 = tpu.concatenate %255, %256 in 1 : vector<2x15xf32>, vector<2x49xf32> -> vector<2x64xf32>
    %c7_i32_92 = arith.constant 7 : i32
    %258 = vector.broadcast %c7_i32_92 : i32 to vector<1x64xi32>
    %259 = arith.cmpi slt, %16, %258 : vector<1x64xi32>
    %cst_93 = arith.constant 0.000000e+00 : f32
    %260 = vector.broadcast %cst_93 : f32 to vector<2x64xf32>
    %261 = vector.shape_cast %259 : vector<1x64xi1> to vector<1x64xi1>
    %262 = vector.broadcast %261 : vector<1x64xi1> to vector<2x64xi1>
    %263 = arith.select %262, %257, %260 : vector<2x64xi1>, vector<2x64xf32>
    %c3_94 = arith.constant 3 : index
    %264 = memref.load %arg12[%c3_94] : memref<50xf32, #tpu.memory_space<smem>>
    %265 = vector.extract_strided_slice %263 {offsets = [0, 0], sizes = [1, 64], strides = [1, 1]} : vector<2x64xf32> to vector<1x64xf32>
    %266 = vector.broadcast %264 : f32 to vector<1x64xf32>
    %267 = arith.mulf %266, %265 : vector<1x64xf32>
    %268 = arith.addf %254, %267 : vector<1x64xf32>
    %c28 = arith.constant 28 : index
    %269 = memref.load %arg12[%c28] : memref<50xf32, #tpu.memory_space<smem>>
    %270 = vector.extract_strided_slice %263 {offsets = [1, 0], sizes = [1, 64], strides = [1, 1]} : vector<2x64xf32> to vector<1x64xf32>
    %271 = vector.broadcast %269 : f32 to vector<1x64xf32>
    %272 = arith.mulf %271, %270 : vector<1x64xf32>
    %273 = arith.addf %268, %272 : vector<1x64xf32>
    %cst_95 = arith.constant 0.000000e+00 : f32
    %274 = vector.broadcast %cst_95 : f32 to vector<2x14xf32>
    %275 = vector.extract_strided_slice %202 {offsets = [0, 0], sizes = [2, 50], strides = [1, 1]} : vector<2x64xf32> to vector<2x50xf32>
    %276 = tpu.concatenate %274, %275 in 1 : vector<2x14xf32>, vector<2x50xf32> -> vector<2x64xf32>
    %c6_i32 = arith.constant 6 : i32
    %277 = vector.broadcast %c6_i32 : i32 to vector<1x64xi32>
    %278 = arith.cmpi slt, %16, %277 : vector<1x64xi32>
    %cst_96 = arith.constant 0.000000e+00 : f32
    %279 = vector.broadcast %cst_96 : f32 to vector<2x64xf32>
    %280 = vector.shape_cast %278 : vector<1x64xi1> to vector<1x64xi1>
    %281 = vector.broadcast %280 : vector<1x64xi1> to vector<2x64xi1>
    %282 = arith.select %281, %276, %279 : vector<2x64xi1>, vector<2x64xf32>
    %c4 = arith.constant 4 : index
    %283 = memref.load %arg12[%c4] : memref<50xf32, #tpu.memory_space<smem>>
    %284 = vector.extract_strided_slice %282 {offsets = [0, 0], sizes = [1, 64], strides = [1, 1]} : vector<2x64xf32> to vector<1x64xf32>
    %285 = vector.broadcast %283 : f32 to vector<1x64xf32>
    %286 = arith.mulf %285, %284 : vector<1x64xf32>
    %287 = arith.addf %273, %286 : vector<1x64xf32>
    %c29 = arith.constant 29 : index
    %288 = memref.load %arg12[%c29] : memref<50xf32, #tpu.memory_space<smem>>
    %289 = vector.extract_strided_slice %282 {offsets = [1, 0], sizes = [1, 64], strides = [1, 1]} : vector<2x64xf32> to vector<1x64xf32>
    %290 = vector.broadcast %288 : f32 to vector<1x64xf32>
    %291 = arith.mulf %290, %289 : vector<1x64xf32>
    %292 = arith.addf %287, %291 : vector<1x64xf32>
    %cst_97 = arith.constant 0.000000e+00 : f32
    %293 = vector.broadcast %cst_97 : f32 to vector<2x10xf32>
    %294 = vector.extract_strided_slice %202 {offsets = [0, 0], sizes = [2, 54], strides = [1, 1]} : vector<2x64xf32> to vector<2x54xf32>
    %295 = tpu.concatenate %293, %294 in 1 : vector<2x10xf32>, vector<2x54xf32> -> vector<2x64xf32>
    %c2_i32_98 = arith.constant 2 : i32
    %296 = vector.broadcast %c2_i32_98 : i32 to vector<1x64xi32>
    %297 = arith.cmpi sge, %16, %296 : vector<1x64xi32>
    %cst_99 = arith.constant 0.000000e+00 : f32
    %298 = vector.broadcast %cst_99 : f32 to vector<2x64xf32>
    %299 = vector.shape_cast %297 : vector<1x64xi1> to vector<1x64xi1>
    %300 = vector.broadcast %299 : vector<1x64xi1> to vector<2x64xi1>
    %301 = arith.select %300, %295, %298 : vector<2x64xi1>, vector<2x64xf32>
    %c5 = arith.constant 5 : index
    %302 = memref.load %arg12[%c5] : memref<50xf32, #tpu.memory_space<smem>>
    %303 = vector.extract_strided_slice %301 {offsets = [0, 0], sizes = [1, 64], strides = [1, 1]} : vector<2x64xf32> to vector<1x64xf32>
    %304 = vector.broadcast %302 : f32 to vector<1x64xf32>
    %305 = arith.mulf %304, %303 : vector<1x64xf32>
    %306 = arith.addf %292, %305 : vector<1x64xf32>
    %c30 = arith.constant 30 : index
    %307 = memref.load %arg12[%c30] : memref<50xf32, #tpu.memory_space<smem>>
    %308 = vector.extract_strided_slice %301 {offsets = [1, 0], sizes = [1, 64], strides = [1, 1]} : vector<2x64xf32> to vector<1x64xf32>
    %309 = vector.broadcast %307 : f32 to vector<1x64xf32>
    %310 = arith.mulf %309, %308 : vector<1x64xf32>
    %311 = arith.addf %306, %310 : vector<1x64xf32>
    %cst_100 = arith.constant 0.000000e+00 : f32
    %312 = vector.broadcast %cst_100 : f32 to vector<2x9xf32>
    %313 = vector.extract_strided_slice %202 {offsets = [0, 0], sizes = [2, 55], strides = [1, 1]} : vector<2x64xf32> to vector<2x55xf32>
    %314 = tpu.concatenate %312, %313 in 1 : vector<2x9xf32>, vector<2x55xf32> -> vector<2x64xf32>
    %c1_i32_101 = arith.constant 1 : i32
    %315 = vector.broadcast %c1_i32_101 : i32 to vector<1x64xi32>
    %316 = arith.cmpi sge, %16, %315 : vector<1x64xi32>
    %cst_102 = arith.constant 0.000000e+00 : f32
    %317 = vector.broadcast %cst_102 : f32 to vector<2x64xf32>
    %318 = vector.shape_cast %316 : vector<1x64xi1> to vector<1x64xi1>
    %319 = vector.broadcast %318 : vector<1x64xi1> to vector<2x64xi1>
    %320 = arith.select %319, %314, %317 : vector<2x64xi1>, vector<2x64xf32>
    %c6 = arith.constant 6 : index
    %321 = memref.load %arg12[%c6] : memref<50xf32, #tpu.memory_space<smem>>
    %322 = vector.extract_strided_slice %320 {offsets = [0, 0], sizes = [1, 64], strides = [1, 1]} : vector<2x64xf32> to vector<1x64xf32>
    %323 = vector.broadcast %321 : f32 to vector<1x64xf32>
    %324 = arith.mulf %323, %322 : vector<1x64xf32>
    %325 = arith.addf %311, %324 : vector<1x64xf32>
    %c31 = arith.constant 31 : index
    %326 = memref.load %arg12[%c31] : memref<50xf32, #tpu.memory_space<smem>>
    %327 = vector.extract_strided_slice %320 {offsets = [1, 0], sizes = [1, 64], strides = [1, 1]} : vector<2x64xf32> to vector<1x64xf32>
    %328 = vector.broadcast %326 : f32 to vector<1x64xf32>
    %329 = arith.mulf %328, %327 : vector<1x64xf32>
    %330 = arith.addf %325, %329 : vector<1x64xf32>
    %cst_103 = arith.constant 0.000000e+00 : f32
    %331 = vector.broadcast %cst_103 : f32 to vector<2x8xf32>
    %332 = vector.extract_strided_slice %202 {offsets = [0, 0], sizes = [2, 56], strides = [1, 1]} : vector<2x64xf32> to vector<2x56xf32>
    %333 = tpu.concatenate %331, %332 in 1 : vector<2x8xf32>, vector<2x56xf32> -> vector<2x64xf32>
    %c7 = arith.constant 7 : index
    %334 = memref.load %arg12[%c7] : memref<50xf32, #tpu.memory_space<smem>>
    %335 = vector.extract_strided_slice %333 {offsets = [0, 0], sizes = [1, 64], strides = [1, 1]} : vector<2x64xf32> to vector<1x64xf32>
    %336 = vector.broadcast %334 : f32 to vector<1x64xf32>
    %337 = arith.mulf %336, %335 : vector<1x64xf32>
    %338 = arith.addf %330, %337 : vector<1x64xf32>
    %c32 = arith.constant 32 : index
    %339 = memref.load %arg12[%c32] : memref<50xf32, #tpu.memory_space<smem>>
    %340 = vector.extract_strided_slice %333 {offsets = [1, 0], sizes = [1, 64], strides = [1, 1]} : vector<2x64xf32> to vector<1x64xf32>
    %341 = vector.broadcast %339 : f32 to vector<1x64xf32>
    %342 = arith.mulf %341, %340 : vector<1x64xf32>
    %343 = arith.addf %338, %342 : vector<1x64xf32>
    %cst_104 = arith.constant 0.000000e+00 : f32
    %344 = vector.broadcast %cst_104 : f32 to vector<2x7xf32>
    %345 = vector.extract_strided_slice %202 {offsets = [0, 0], sizes = [2, 57], strides = [1, 1]} : vector<2x64xf32> to vector<2x57xf32>
    %346 = tpu.concatenate %344, %345 in 1 : vector<2x7xf32>, vector<2x57xf32> -> vector<2x64xf32>
    %c7_i32_105 = arith.constant 7 : i32
    %347 = vector.broadcast %c7_i32_105 : i32 to vector<1x64xi32>
    %348 = arith.cmpi slt, %16, %347 : vector<1x64xi32>
    %cst_106 = arith.constant 0.000000e+00 : f32
    %349 = vector.broadcast %cst_106 : f32 to vector<2x64xf32>
    %350 = vector.shape_cast %348 : vector<1x64xi1> to vector<1x64xi1>
    %351 = vector.broadcast %350 : vector<1x64xi1> to vector<2x64xi1>
    %352 = arith.select %351, %346, %349 : vector<2x64xi1>, vector<2x64xf32>
    %c8 = arith.constant 8 : index
    %353 = memref.load %arg12[%c8] : memref<50xf32, #tpu.memory_space<smem>>
    %354 = vector.extract_strided_slice %352 {offsets = [0, 0], sizes = [1, 64], strides = [1, 1]} : vector<2x64xf32> to vector<1x64xf32>
    %355 = vector.broadcast %353 : f32 to vector<1x64xf32>
    %356 = arith.mulf %355, %354 : vector<1x64xf32>
    %357 = arith.addf %343, %356 : vector<1x64xf32>
    %c33 = arith.constant 33 : index
    %358 = memref.load %arg12[%c33] : memref<50xf32, #tpu.memory_space<smem>>
    %359 = vector.extract_strided_slice %352 {offsets = [1, 0], sizes = [1, 64], strides = [1, 1]} : vector<2x64xf32> to vector<1x64xf32>
    %360 = vector.broadcast %358 : f32 to vector<1x64xf32>
    %361 = arith.mulf %360, %359 : vector<1x64xf32>
    %362 = arith.addf %357, %361 : vector<1x64xf32>
    %cst_107 = arith.constant 0.000000e+00 : f32
    %363 = vector.broadcast %cst_107 : f32 to vector<2x6xf32>
    %364 = vector.extract_strided_slice %202 {offsets = [0, 0], sizes = [2, 58], strides = [1, 1]} : vector<2x64xf32> to vector<2x58xf32>
    %365 = tpu.concatenate %363, %364 in 1 : vector<2x6xf32>, vector<2x58xf32> -> vector<2x64xf32>
    %c6_i32_108 = arith.constant 6 : i32
    %366 = vector.broadcast %c6_i32_108 : i32 to vector<1x64xi32>
    %367 = arith.cmpi slt, %16, %366 : vector<1x64xi32>
    %cst_109 = arith.constant 0.000000e+00 : f32
    %368 = vector.broadcast %cst_109 : f32 to vector<2x64xf32>
    %369 = vector.shape_cast %367 : vector<1x64xi1> to vector<1x64xi1>
    %370 = vector.broadcast %369 : vector<1x64xi1> to vector<2x64xi1>
    %371 = arith.select %370, %365, %368 : vector<2x64xi1>, vector<2x64xf32>
    %c9 = arith.constant 9 : index
    %372 = memref.load %arg12[%c9] : memref<50xf32, #tpu.memory_space<smem>>
    %373 = vector.extract_strided_slice %371 {offsets = [0, 0], sizes = [1, 64], strides = [1, 1]} : vector<2x64xf32> to vector<1x64xf32>
    %374 = vector.broadcast %372 : f32 to vector<1x64xf32>
    %375 = arith.mulf %374, %373 : vector<1x64xf32>
    %376 = arith.addf %362, %375 : vector<1x64xf32>
    %c34 = arith.constant 34 : index
    %377 = memref.load %arg12[%c34] : memref<50xf32, #tpu.memory_space<smem>>
    %378 = vector.extract_strided_slice %371 {offsets = [1, 0], sizes = [1, 64], strides = [1, 1]} : vector<2x64xf32> to vector<1x64xf32>
    %379 = vector.broadcast %377 : f32 to vector<1x64xf32>
    %380 = arith.mulf %379, %378 : vector<1x64xf32>
    %381 = arith.addf %376, %380 : vector<1x64xf32>
    %cst_110 = arith.constant 0.000000e+00 : f32
    %382 = vector.broadcast %cst_110 : f32 to vector<2x2xf32>
    %383 = vector.extract_strided_slice %202 {offsets = [0, 0], sizes = [2, 62], strides = [1, 1]} : vector<2x64xf32> to vector<2x62xf32>
    %384 = tpu.concatenate %382, %383 in 1 : vector<2x2xf32>, vector<2x62xf32> -> vector<2x64xf32>
    %c2_i32_111 = arith.constant 2 : i32
    %385 = vector.broadcast %c2_i32_111 : i32 to vector<1x64xi32>
    %386 = arith.cmpi sge, %16, %385 : vector<1x64xi32>
    %cst_112 = arith.constant 0.000000e+00 : f32
    %387 = vector.broadcast %cst_112 : f32 to vector<2x64xf32>
    %388 = vector.shape_cast %386 : vector<1x64xi1> to vector<1x64xi1>
    %389 = vector.broadcast %388 : vector<1x64xi1> to vector<2x64xi1>
    %390 = arith.select %389, %384, %387 : vector<2x64xi1>, vector<2x64xf32>
    %c10 = arith.constant 10 : index
    %391 = memref.load %arg12[%c10] : memref<50xf32, #tpu.memory_space<smem>>
    %392 = vector.extract_strided_slice %390 {offsets = [0, 0], sizes = [1, 64], strides = [1, 1]} : vector<2x64xf32> to vector<1x64xf32>
    %393 = vector.broadcast %391 : f32 to vector<1x64xf32>
    %394 = arith.mulf %393, %392 : vector<1x64xf32>
    %395 = arith.addf %381, %394 : vector<1x64xf32>
    %c35 = arith.constant 35 : index
    %396 = memref.load %arg12[%c35] : memref<50xf32, #tpu.memory_space<smem>>
    %397 = vector.extract_strided_slice %390 {offsets = [1, 0], sizes = [1, 64], strides = [1, 1]} : vector<2x64xf32> to vector<1x64xf32>
    %398 = vector.broadcast %396 : f32 to vector<1x64xf32>
    %399 = arith.mulf %398, %397 : vector<1x64xf32>
    %400 = arith.addf %395, %399 : vector<1x64xf32>
    %cst_113 = arith.constant 0.000000e+00 : f32
    %401 = vector.broadcast %cst_113 : f32 to vector<2x1xf32>
    %402 = vector.extract_strided_slice %202 {offsets = [0, 0], sizes = [2, 63], strides = [1, 1]} : vector<2x64xf32> to vector<2x63xf32>
    %403 = tpu.concatenate %401, %402 in 1 : vector<2x1xf32>, vector<2x63xf32> -> vector<2x64xf32>
    %c1_i32_114 = arith.constant 1 : i32
    %404 = vector.broadcast %c1_i32_114 : i32 to vector<1x64xi32>
    %405 = arith.cmpi sge, %16, %404 : vector<1x64xi32>
    %cst_115 = arith.constant 0.000000e+00 : f32
    %406 = vector.broadcast %cst_115 : f32 to vector<2x64xf32>
    %407 = vector.shape_cast %405 : vector<1x64xi1> to vector<1x64xi1>
    %408 = vector.broadcast %407 : vector<1x64xi1> to vector<2x64xi1>
    %409 = arith.select %408, %403, %406 : vector<2x64xi1>, vector<2x64xf32>
    %c11 = arith.constant 11 : index
    %410 = memref.load %arg12[%c11] : memref<50xf32, #tpu.memory_space<smem>>
    %411 = vector.extract_strided_slice %409 {offsets = [0, 0], sizes = [1, 64], strides = [1, 1]} : vector<2x64xf32> to vector<1x64xf32>
    %412 = vector.broadcast %410 : f32 to vector<1x64xf32>
    %413 = arith.mulf %412, %411 : vector<1x64xf32>
    %414 = arith.addf %400, %413 : vector<1x64xf32>
    %c36 = arith.constant 36 : index
    %415 = memref.load %arg12[%c36] : memref<50xf32, #tpu.memory_space<smem>>
    %416 = vector.extract_strided_slice %409 {offsets = [1, 0], sizes = [1, 64], strides = [1, 1]} : vector<2x64xf32> to vector<1x64xf32>
    %417 = vector.broadcast %415 : f32 to vector<1x64xf32>
    %418 = arith.mulf %417, %416 : vector<1x64xf32>
    %419 = arith.addf %414, %418 : vector<1x64xf32>
    %c12 = arith.constant 12 : index
    %420 = memref.load %arg12[%c12] : memref<50xf32, #tpu.memory_space<smem>>
    %421 = vector.extract_strided_slice %202 {offsets = [0, 0], sizes = [1, 64], strides = [1, 1]} : vector<2x64xf32> to vector<1x64xf32>
    %422 = vector.broadcast %420 : f32 to vector<1x64xf32>
    %423 = arith.mulf %422, %421 : vector<1x64xf32>
    %424 = arith.addf %419, %423 : vector<1x64xf32>
    %c37 = arith.constant 37 : index
    %425 = memref.load %arg12[%c37] : memref<50xf32, #tpu.memory_space<smem>>
    %426 = vector.extract_strided_slice %202 {offsets = [1, 0], sizes = [1, 64], strides = [1, 1]} : vector<2x64xf32> to vector<1x64xf32>
    %427 = vector.broadcast %425 : f32 to vector<1x64xf32>
    %428 = arith.mulf %427, %426 : vector<1x64xf32>
    %429 = arith.addf %424, %428 : vector<1x64xf32>
    %430 = vector.extract_strided_slice %202 {offsets = [0, 1], sizes = [2, 63], strides = [1, 1]} : vector<2x64xf32> to vector<2x63xf32>
    %cst_116 = arith.constant 0.000000e+00 : f32
    %431 = vector.broadcast %cst_116 : f32 to vector<2x1xf32>
    %432 = tpu.concatenate %430, %431 in 1 : vector<2x63xf32>, vector<2x1xf32> -> vector<2x64xf32>
    %c7_i32_117 = arith.constant 7 : i32
    %433 = vector.broadcast %c7_i32_117 : i32 to vector<1x64xi32>
    %434 = arith.cmpi slt, %16, %433 : vector<1x64xi32>
    %cst_118 = arith.constant 0.000000e+00 : f32
    %435 = vector.broadcast %cst_118 : f32 to vector<2x64xf32>
    %436 = vector.shape_cast %434 : vector<1x64xi1> to vector<1x64xi1>
    %437 = vector.broadcast %436 : vector<1x64xi1> to vector<2x64xi1>
    %438 = arith.select %437, %432, %435 : vector<2x64xi1>, vector<2x64xf32>
    %c13 = arith.constant 13 : index
    %439 = memref.load %arg12[%c13] : memref<50xf32, #tpu.memory_space<smem>>
    %440 = vector.extract_strided_slice %438 {offsets = [0, 0], sizes = [1, 64], strides = [1, 1]} : vector<2x64xf32> to vector<1x64xf32>
    %441 = vector.broadcast %439 : f32 to vector<1x64xf32>
    %442 = arith.mulf %441, %440 : vector<1x64xf32>
    %443 = arith.addf %429, %442 : vector<1x64xf32>
    %c38 = arith.constant 38 : index
    %444 = memref.load %arg12[%c38] : memref<50xf32, #tpu.memory_space<smem>>
    %445 = vector.extract_strided_slice %438 {offsets = [1, 0], sizes = [1, 64], strides = [1, 1]} : vector<2x64xf32> to vector<1x64xf32>
    %446 = vector.broadcast %444 : f32 to vector<1x64xf32>
    %447 = arith.mulf %446, %445 : vector<1x64xf32>
    %448 = arith.addf %443, %447 : vector<1x64xf32>
    %449 = vector.extract_strided_slice %202 {offsets = [0, 2], sizes = [2, 62], strides = [1, 1]} : vector<2x64xf32> to vector<2x62xf32>
    %cst_119 = arith.constant 0.000000e+00 : f32
    %450 = vector.broadcast %cst_119 : f32 to vector<2x2xf32>
    %451 = tpu.concatenate %449, %450 in 1 : vector<2x62xf32>, vector<2x2xf32> -> vector<2x64xf32>
    %c6_i32_120 = arith.constant 6 : i32
    %452 = vector.broadcast %c6_i32_120 : i32 to vector<1x64xi32>
    %453 = arith.cmpi slt, %16, %452 : vector<1x64xi32>
    %cst_121 = arith.constant 0.000000e+00 : f32
    %454 = vector.broadcast %cst_121 : f32 to vector<2x64xf32>
    %455 = vector.shape_cast %453 : vector<1x64xi1> to vector<1x64xi1>
    %456 = vector.broadcast %455 : vector<1x64xi1> to vector<2x64xi1>
    %457 = arith.select %456, %451, %454 : vector<2x64xi1>, vector<2x64xf32>
    %c14 = arith.constant 14 : index
    %458 = memref.load %arg12[%c14] : memref<50xf32, #tpu.memory_space<smem>>
    %459 = vector.extract_strided_slice %457 {offsets = [0, 0], sizes = [1, 64], strides = [1, 1]} : vector<2x64xf32> to vector<1x64xf32>
    %460 = vector.broadcast %458 : f32 to vector<1x64xf32>
    %461 = arith.mulf %460, %459 : vector<1x64xf32>
    %462 = arith.addf %448, %461 : vector<1x64xf32>
    %c39 = arith.constant 39 : index
    %463 = memref.load %arg12[%c39] : memref<50xf32, #tpu.memory_space<smem>>
    %464 = vector.extract_strided_slice %457 {offsets = [1, 0], sizes = [1, 64], strides = [1, 1]} : vector<2x64xf32> to vector<1x64xf32>
    %465 = vector.broadcast %463 : f32 to vector<1x64xf32>
    %466 = arith.mulf %465, %464 : vector<1x64xf32>
    %467 = arith.addf %462, %466 : vector<1x64xf32>
    %468 = vector.extract_strided_slice %202 {offsets = [0, 6], sizes = [2, 58], strides = [1, 1]} : vector<2x64xf32> to vector<2x58xf32>
    %cst_122 = arith.constant 0.000000e+00 : f32
    %469 = vector.broadcast %cst_122 : f32 to vector<2x6xf32>
    %470 = tpu.concatenate %468, %469 in 1 : vector<2x58xf32>, vector<2x6xf32> -> vector<2x64xf32>
    %c2_i32_123 = arith.constant 2 : i32
    %471 = vector.broadcast %c2_i32_123 : i32 to vector<1x64xi32>
    %472 = arith.cmpi sge, %16, %471 : vector<1x64xi32>
    %cst_124 = arith.constant 0.000000e+00 : f32
    %473 = vector.broadcast %cst_124 : f32 to vector<2x64xf32>
    %474 = vector.shape_cast %472 : vector<1x64xi1> to vector<1x64xi1>
    %475 = vector.broadcast %474 : vector<1x64xi1> to vector<2x64xi1>
    %476 = arith.select %475, %470, %473 : vector<2x64xi1>, vector<2x64xf32>
    %c15 = arith.constant 15 : index
    %477 = memref.load %arg12[%c15] : memref<50xf32, #tpu.memory_space<smem>>
    %478 = vector.extract_strided_slice %476 {offsets = [0, 0], sizes = [1, 64], strides = [1, 1]} : vector<2x64xf32> to vector<1x64xf32>
    %479 = vector.broadcast %477 : f32 to vector<1x64xf32>
    %480 = arith.mulf %479, %478 : vector<1x64xf32>
    %481 = arith.addf %467, %480 : vector<1x64xf32>
    %c40 = arith.constant 40 : index
    %482 = memref.load %arg12[%c40] : memref<50xf32, #tpu.memory_space<smem>>
    %483 = vector.extract_strided_slice %476 {offsets = [1, 0], sizes = [1, 64], strides = [1, 1]} : vector<2x64xf32> to vector<1x64xf32>
    %484 = vector.broadcast %482 : f32 to vector<1x64xf32>
    %485 = arith.mulf %484, %483 : vector<1x64xf32>
    %486 = arith.addf %481, %485 : vector<1x64xf32>
    %487 = vector.extract_strided_slice %202 {offsets = [0, 7], sizes = [2, 57], strides = [1, 1]} : vector<2x64xf32> to vector<2x57xf32>
    %cst_125 = arith.constant 0.000000e+00 : f32
    %488 = vector.broadcast %cst_125 : f32 to vector<2x7xf32>
    %489 = tpu.concatenate %487, %488 in 1 : vector<2x57xf32>, vector<2x7xf32> -> vector<2x64xf32>
    %c1_i32_126 = arith.constant 1 : i32
    %490 = vector.broadcast %c1_i32_126 : i32 to vector<1x64xi32>
    %491 = arith.cmpi sge, %16, %490 : vector<1x64xi32>
    %cst_127 = arith.constant 0.000000e+00 : f32
    %492 = vector.broadcast %cst_127 : f32 to vector<2x64xf32>
    %493 = vector.shape_cast %491 : vector<1x64xi1> to vector<1x64xi1>
    %494 = vector.broadcast %493 : vector<1x64xi1> to vector<2x64xi1>
    %495 = arith.select %494, %489, %492 : vector<2x64xi1>, vector<2x64xf32>
    %c16 = arith.constant 16 : index
    %496 = memref.load %arg12[%c16] : memref<50xf32, #tpu.memory_space<smem>>
    %497 = vector.extract_strided_slice %495 {offsets = [0, 0], sizes = [1, 64], strides = [1, 1]} : vector<2x64xf32> to vector<1x64xf32>
    %498 = vector.broadcast %496 : f32 to vector<1x64xf32>
    %499 = arith.mulf %498, %497 : vector<1x64xf32>
    %500 = arith.addf %486, %499 : vector<1x64xf32>
    %c41 = arith.constant 41 : index
    %501 = memref.load %arg12[%c41] : memref<50xf32, #tpu.memory_space<smem>>
    %502 = vector.extract_strided_slice %495 {offsets = [1, 0], sizes = [1, 64], strides = [1, 1]} : vector<2x64xf32> to vector<1x64xf32>
    %503 = vector.broadcast %501 : f32 to vector<1x64xf32>
    %504 = arith.mulf %503, %502 : vector<1x64xf32>
    %505 = arith.addf %500, %504 : vector<1x64xf32>
    %506 = vector.extract_strided_slice %202 {offsets = [0, 8], sizes = [2, 56], strides = [1, 1]} : vector<2x64xf32> to vector<2x56xf32>
    %cst_128 = arith.constant 0.000000e+00 : f32
    %507 = vector.broadcast %cst_128 : f32 to vector<2x8xf32>
    %508 = tpu.concatenate %506, %507 in 1 : vector<2x56xf32>, vector<2x8xf32> -> vector<2x64xf32>
    %c17 = arith.constant 17 : index
    %509 = memref.load %arg12[%c17] : memref<50xf32, #tpu.memory_space<smem>>
    %510 = vector.extract_strided_slice %508 {offsets = [0, 0], sizes = [1, 64], strides = [1, 1]} : vector<2x64xf32> to vector<1x64xf32>
    %511 = vector.broadcast %509 : f32 to vector<1x64xf32>
    %512 = arith.mulf %511, %510 : vector<1x64xf32>
    %513 = arith.addf %505, %512 : vector<1x64xf32>
    %c42 = arith.constant 42 : index
    %514 = memref.load %arg12[%c42] : memref<50xf32, #tpu.memory_space<smem>>
    %515 = vector.extract_strided_slice %508 {offsets = [1, 0], sizes = [1, 64], strides = [1, 1]} : vector<2x64xf32> to vector<1x64xf32>
    %516 = vector.broadcast %514 : f32 to vector<1x64xf32>
    %517 = arith.mulf %516, %515 : vector<1x64xf32>
    %518 = arith.addf %513, %517 : vector<1x64xf32>
    %519 = vector.extract_strided_slice %202 {offsets = [0, 9], sizes = [2, 55], strides = [1, 1]} : vector<2x64xf32> to vector<2x55xf32>
    %cst_129 = arith.constant 0.000000e+00 : f32
    %520 = vector.broadcast %cst_129 : f32 to vector<2x9xf32>
    %521 = tpu.concatenate %519, %520 in 1 : vector<2x55xf32>, vector<2x9xf32> -> vector<2x64xf32>
    %c7_i32_130 = arith.constant 7 : i32
    %522 = vector.broadcast %c7_i32_130 : i32 to vector<1x64xi32>
    %523 = arith.cmpi slt, %16, %522 : vector<1x64xi32>
    %cst_131 = arith.constant 0.000000e+00 : f32
    %524 = vector.broadcast %cst_131 : f32 to vector<2x64xf32>
    %525 = vector.shape_cast %523 : vector<1x64xi1> to vector<1x64xi1>
    %526 = vector.broadcast %525 : vector<1x64xi1> to vector<2x64xi1>
    %527 = arith.select %526, %521, %524 : vector<2x64xi1>, vector<2x64xf32>
    %c18 = arith.constant 18 : index
    %528 = memref.load %arg12[%c18] : memref<50xf32, #tpu.memory_space<smem>>
    %529 = vector.extract_strided_slice %527 {offsets = [0, 0], sizes = [1, 64], strides = [1, 1]} : vector<2x64xf32> to vector<1x64xf32>
    %530 = vector.broadcast %528 : f32 to vector<1x64xf32>
    %531 = arith.mulf %530, %529 : vector<1x64xf32>
    %532 = arith.addf %518, %531 : vector<1x64xf32>
    %c43 = arith.constant 43 : index
    %533 = memref.load %arg12[%c43] : memref<50xf32, #tpu.memory_space<smem>>
    %534 = vector.extract_strided_slice %527 {offsets = [1, 0], sizes = [1, 64], strides = [1, 1]} : vector<2x64xf32> to vector<1x64xf32>
    %535 = vector.broadcast %533 : f32 to vector<1x64xf32>
    %536 = arith.mulf %535, %534 : vector<1x64xf32>
    %537 = arith.addf %532, %536 : vector<1x64xf32>
    %538 = vector.extract_strided_slice %202 {offsets = [0, 10], sizes = [2, 54], strides = [1, 1]} : vector<2x64xf32> to vector<2x54xf32>
    %cst_132 = arith.constant 0.000000e+00 : f32
    %539 = vector.broadcast %cst_132 : f32 to vector<2x10xf32>
    %540 = tpu.concatenate %538, %539 in 1 : vector<2x54xf32>, vector<2x10xf32> -> vector<2x64xf32>
    %c6_i32_133 = arith.constant 6 : i32
    %541 = vector.broadcast %c6_i32_133 : i32 to vector<1x64xi32>
    %542 = arith.cmpi slt, %16, %541 : vector<1x64xi32>
    %cst_134 = arith.constant 0.000000e+00 : f32
    %543 = vector.broadcast %cst_134 : f32 to vector<2x64xf32>
    %544 = vector.shape_cast %542 : vector<1x64xi1> to vector<1x64xi1>
    %545 = vector.broadcast %544 : vector<1x64xi1> to vector<2x64xi1>
    %546 = arith.select %545, %540, %543 : vector<2x64xi1>, vector<2x64xf32>
    %c19 = arith.constant 19 : index
    %547 = memref.load %arg12[%c19] : memref<50xf32, #tpu.memory_space<smem>>
    %548 = vector.extract_strided_slice %546 {offsets = [0, 0], sizes = [1, 64], strides = [1, 1]} : vector<2x64xf32> to vector<1x64xf32>
    %549 = vector.broadcast %547 : f32 to vector<1x64xf32>
    %550 = arith.mulf %549, %548 : vector<1x64xf32>
    %551 = arith.addf %537, %550 : vector<1x64xf32>
    %c44 = arith.constant 44 : index
    %552 = memref.load %arg12[%c44] : memref<50xf32, #tpu.memory_space<smem>>
    %553 = vector.extract_strided_slice %546 {offsets = [1, 0], sizes = [1, 64], strides = [1, 1]} : vector<2x64xf32> to vector<1x64xf32>
    %554 = vector.broadcast %552 : f32 to vector<1x64xf32>
    %555 = arith.mulf %554, %553 : vector<1x64xf32>
    %556 = arith.addf %551, %555 : vector<1x64xf32>
    %557 = vector.extract_strided_slice %202 {offsets = [0, 14], sizes = [2, 50], strides = [1, 1]} : vector<2x64xf32> to vector<2x50xf32>
    %cst_135 = arith.constant 0.000000e+00 : f32
    %558 = vector.broadcast %cst_135 : f32 to vector<2x14xf32>
    %559 = tpu.concatenate %557, %558 in 1 : vector<2x50xf32>, vector<2x14xf32> -> vector<2x64xf32>
    %c2_i32_136 = arith.constant 2 : i32
    %560 = vector.broadcast %c2_i32_136 : i32 to vector<1x64xi32>
    %561 = arith.cmpi sge, %16, %560 : vector<1x64xi32>
    %cst_137 = arith.constant 0.000000e+00 : f32
    %562 = vector.broadcast %cst_137 : f32 to vector<2x64xf32>
    %563 = vector.shape_cast %561 : vector<1x64xi1> to vector<1x64xi1>
    %564 = vector.broadcast %563 : vector<1x64xi1> to vector<2x64xi1>
    %565 = arith.select %564, %559, %562 : vector<2x64xi1>, vector<2x64xf32>
    %c20 = arith.constant 20 : index
    %566 = memref.load %arg12[%c20] : memref<50xf32, #tpu.memory_space<smem>>
    %567 = vector.extract_strided_slice %565 {offsets = [0, 0], sizes = [1, 64], strides = [1, 1]} : vector<2x64xf32> to vector<1x64xf32>
    %568 = vector.broadcast %566 : f32 to vector<1x64xf32>
    %569 = arith.mulf %568, %567 : vector<1x64xf32>
    %570 = arith.addf %556, %569 : vector<1x64xf32>
    %c45 = arith.constant 45 : index
    %571 = memref.load %arg12[%c45] : memref<50xf32, #tpu.memory_space<smem>>
    %572 = vector.extract_strided_slice %565 {offsets = [1, 0], sizes = [1, 64], strides = [1, 1]} : vector<2x64xf32> to vector<1x64xf32>
    %573 = vector.broadcast %571 : f32 to vector<1x64xf32>
    %574 = arith.mulf %573, %572 : vector<1x64xf32>
    %575 = arith.addf %570, %574 : vector<1x64xf32>
    %576 = vector.extract_strided_slice %202 {offsets = [0, 15], sizes = [2, 49], strides = [1, 1]} : vector<2x64xf32> to vector<2x49xf32>
    %cst_138 = arith.constant 0.000000e+00 : f32
    %577 = vector.broadcast %cst_138 : f32 to vector<2x15xf32>
    %578 = tpu.concatenate %576, %577 in 1 : vector<2x49xf32>, vector<2x15xf32> -> vector<2x64xf32>
    %c1_i32_139 = arith.constant 1 : i32
    %579 = vector.broadcast %c1_i32_139 : i32 to vector<1x64xi32>
    %580 = arith.cmpi sge, %16, %579 : vector<1x64xi32>
    %cst_140 = arith.constant 0.000000e+00 : f32
    %581 = vector.broadcast %cst_140 : f32 to vector<2x64xf32>
    %582 = vector.shape_cast %580 : vector<1x64xi1> to vector<1x64xi1>
    %583 = vector.broadcast %582 : vector<1x64xi1> to vector<2x64xi1>
    %584 = arith.select %583, %578, %581 : vector<2x64xi1>, vector<2x64xf32>
    %c21 = arith.constant 21 : index
    %585 = memref.load %arg12[%c21] : memref<50xf32, #tpu.memory_space<smem>>
    %586 = vector.extract_strided_slice %584 {offsets = [0, 0], sizes = [1, 64], strides = [1, 1]} : vector<2x64xf32> to vector<1x64xf32>
    %587 = vector.broadcast %585 : f32 to vector<1x64xf32>
    %588 = arith.mulf %587, %586 : vector<1x64xf32>
    %589 = arith.addf %575, %588 : vector<1x64xf32>
    %c46 = arith.constant 46 : index
    %590 = memref.load %arg12[%c46] : memref<50xf32, #tpu.memory_space<smem>>
    %591 = vector.extract_strided_slice %584 {offsets = [1, 0], sizes = [1, 64], strides = [1, 1]} : vector<2x64xf32> to vector<1x64xf32>
    %592 = vector.broadcast %590 : f32 to vector<1x64xf32>
    %593 = arith.mulf %592, %591 : vector<1x64xf32>
    %594 = arith.addf %589, %593 : vector<1x64xf32>
    %595 = vector.extract_strided_slice %202 {offsets = [0, 16], sizes = [2, 48], strides = [1, 1]} : vector<2x64xf32> to vector<2x48xf32>
    %cst_141 = arith.constant 0.000000e+00 : f32
    %596 = vector.broadcast %cst_141 : f32 to vector<2x16xf32>
    %597 = tpu.concatenate %595, %596 in 1 : vector<2x48xf32>, vector<2x16xf32> -> vector<2x64xf32>
    %c22 = arith.constant 22 : index
    %598 = memref.load %arg12[%c22] : memref<50xf32, #tpu.memory_space<smem>>
    %599 = vector.extract_strided_slice %597 {offsets = [0, 0], sizes = [1, 64], strides = [1, 1]} : vector<2x64xf32> to vector<1x64xf32>
    %600 = vector.broadcast %598 : f32 to vector<1x64xf32>
    %601 = arith.mulf %600, %599 : vector<1x64xf32>
    %602 = arith.addf %594, %601 : vector<1x64xf32>
    %c47 = arith.constant 47 : index
    %603 = memref.load %arg12[%c47] : memref<50xf32, #tpu.memory_space<smem>>
    %604 = vector.extract_strided_slice %597 {offsets = [1, 0], sizes = [1, 64], strides = [1, 1]} : vector<2x64xf32> to vector<1x64xf32>
    %605 = vector.broadcast %603 : f32 to vector<1x64xf32>
    %606 = arith.mulf %605, %604 : vector<1x64xf32>
    %607 = arith.addf %602, %606 : vector<1x64xf32>
    %608 = vector.extract_strided_slice %202 {offsets = [0, 17], sizes = [2, 47], strides = [1, 1]} : vector<2x64xf32> to vector<2x47xf32>
    %cst_142 = arith.constant 0.000000e+00 : f32
    %609 = vector.broadcast %cst_142 : f32 to vector<2x17xf32>
    %610 = tpu.concatenate %608, %609 in 1 : vector<2x47xf32>, vector<2x17xf32> -> vector<2x64xf32>
    %c7_i32_143 = arith.constant 7 : i32
    %611 = vector.broadcast %c7_i32_143 : i32 to vector<1x64xi32>
    %612 = arith.cmpi slt, %16, %611 : vector<1x64xi32>
    %cst_144 = arith.constant 0.000000e+00 : f32
    %613 = vector.broadcast %cst_144 : f32 to vector<2x64xf32>
    %614 = vector.shape_cast %612 : vector<1x64xi1> to vector<1x64xi1>
    %615 = vector.broadcast %614 : vector<1x64xi1> to vector<2x64xi1>
    %616 = arith.select %615, %610, %613 : vector<2x64xi1>, vector<2x64xf32>
    %c23 = arith.constant 23 : index
    %617 = memref.load %arg12[%c23] : memref<50xf32, #tpu.memory_space<smem>>
    %618 = vector.extract_strided_slice %616 {offsets = [0, 0], sizes = [1, 64], strides = [1, 1]} : vector<2x64xf32> to vector<1x64xf32>
    %619 = vector.broadcast %617 : f32 to vector<1x64xf32>
    %620 = arith.mulf %619, %618 : vector<1x64xf32>
    %621 = arith.addf %607, %620 : vector<1x64xf32>
    %c48 = arith.constant 48 : index
    %622 = memref.load %arg12[%c48] : memref<50xf32, #tpu.memory_space<smem>>
    %623 = vector.extract_strided_slice %616 {offsets = [1, 0], sizes = [1, 64], strides = [1, 1]} : vector<2x64xf32> to vector<1x64xf32>
    %624 = vector.broadcast %622 : f32 to vector<1x64xf32>
    %625 = arith.mulf %624, %623 : vector<1x64xf32>
    %626 = arith.addf %621, %625 : vector<1x64xf32>
    %627 = vector.extract_strided_slice %202 {offsets = [0, 18], sizes = [2, 46], strides = [1, 1]} : vector<2x64xf32> to vector<2x46xf32>
    %cst_145 = arith.constant 0.000000e+00 : f32
    %628 = vector.broadcast %cst_145 : f32 to vector<2x18xf32>
    %629 = tpu.concatenate %627, %628 in 1 : vector<2x46xf32>, vector<2x18xf32> -> vector<2x64xf32>
    %c6_i32_146 = arith.constant 6 : i32
    %630 = vector.broadcast %c6_i32_146 : i32 to vector<1x64xi32>
    %631 = arith.cmpi slt, %16, %630 : vector<1x64xi32>
    %cst_147 = arith.constant 0.000000e+00 : f32
    %632 = vector.broadcast %cst_147 : f32 to vector<2x64xf32>
    %633 = vector.shape_cast %631 : vector<1x64xi1> to vector<1x64xi1>
    %634 = vector.broadcast %633 : vector<1x64xi1> to vector<2x64xi1>
    %635 = arith.select %634, %629, %632 : vector<2x64xi1>, vector<2x64xf32>
    %c24 = arith.constant 24 : index
    %636 = memref.load %arg12[%c24] : memref<50xf32, #tpu.memory_space<smem>>
    %637 = vector.extract_strided_slice %635 {offsets = [0, 0], sizes = [1, 64], strides = [1, 1]} : vector<2x64xf32> to vector<1x64xf32>
    %638 = vector.broadcast %636 : f32 to vector<1x64xf32>
    %639 = arith.mulf %638, %637 : vector<1x64xf32>
    %640 = arith.addf %626, %639 : vector<1x64xf32>
    %c49 = arith.constant 49 : index
    %641 = memref.load %arg12[%c49] : memref<50xf32, #tpu.memory_space<smem>>
    %642 = vector.extract_strided_slice %635 {offsets = [1, 0], sizes = [1, 64], strides = [1, 1]} : vector<2x64xf32> to vector<1x64xf32>
    %643 = vector.broadcast %641 : f32 to vector<1x64xf32>
    %644 = arith.mulf %643, %642 : vector<1x64xf32>
    %645 = arith.addf %640, %644 : vector<1x64xf32>
    %646 = arith.negf %645 : vector<1x64xf32>
    %647 = math.exp %646 : vector<1x64xf32>
    %cst_148 = arith.constant 1.000000e+00 : f32
    %648 = vector.broadcast %cst_148 : f32 to vector<1x64xf32>
    %649 = arith.addf %648, %647 : vector<1x64xf32>
    %650 = arith.divf %648, %649 : vector<1x64xf32>
    %651 = vector.broadcast %650 : vector<1x64xf32> to vector<16x64xf32>
    %652 = arith.mulf %180, %651 : vector<16x64xf32>
    %653 = arith.truncf %652 : vector<16x64xf32> to vector<16x64xbf16>
    %654 = vector.broadcast %195 : vector<16x1xf32> to vector<16x64xf32>
    %655 = arith.mulf %180, %654 : vector<16x64xf32>
    %656 = arith.truncf %655 : vector<16x64xf32> to vector<16x64xbf16>
    %c0_149 = arith.constant 0 : index
    %c0_150 = arith.constant 0 : index
    %657 = vector.load %arg8[%c0_149, %c0_150] : memref<16x16xbf16, #tpu.memory_space<vmem>>, vector<16x16xbf16>
    %cst_151 = arith.constant dense<0.000000e+00> : vector<16x64xf32>
    %658 = tpu.matmul %657, %653, %cst_151 {dimension_numbers = #tpu.dot_dimension_numbers<[1], [0], [0], [1], [0, 0, 1, 1], [], []>} : vector<16x16xbf16>, vector<16x64xbf16>, vector<16x64xf32> -> vector<16x64xf32>
    %c0_152 = arith.constant 0 : index
    %c0_153 = arith.constant 0 : index
    %659 = vector.load %arg9[%c0_152, %c0_153] : memref<16x16xbf16, #tpu.memory_space<vmem>>, vector<16x16xbf16>
    %cst_154 = arith.constant dense<0.000000e+00> : vector<16x64xf32>
    %660 = tpu.matmul %659, %656, %cst_154 {dimension_numbers = #tpu.dot_dimension_numbers<[1], [0], [0], [1], [0, 0, 1, 1], [], []>} : vector<16x16xbf16>, vector<16x64xbf16>, vector<16x64xf32> -> vector<16x64xf32>
    %661 = arith.addf %658, %660 : vector<16x64xf32>
    %662 = arith.addf %661, %50 : vector<16x64xf32>
    %663 = vector.extract_strided_slice %662 {offsets = [0, 0], sizes = [4, 64], strides = [1, 1]} : vector<16x64xf32> to vector<4x64xf32>
    %c0_155 = arith.constant 0 : index
    %c0_156 = arith.constant 0 : index
    %c0_157 = arith.constant 0 : index
    %664 = vector.load %arg3[%c0_155, %c0_156, %c0_157] : memref<4x64x256xf32, #tpu.memory_space<vmem>>, vector<1x64x256xf32>
    %665 = vector.shape_cast %664 : vector<1x64x256xf32> to vector<64x256xf32>
    %cst_158 = arith.constant dense<0.000000e+00> : vector<4x256xf32>
    %666 = tpu.matmul %663, %665, %cst_158 {dimension_numbers = #tpu.dot_dimension_numbers<[1], [0], [0], [1], [0, 0, 1, 1], [], []>} : vector<4x64xf32>, vector<64x256xf32>, vector<4x256xf32> -> vector<4x256xf32>
    %667 = vector.extract_strided_slice %662 {offsets = [4, 0], sizes = [4, 64], strides = [1, 1]} : vector<16x64xf32> to vector<4x64xf32>
    %c1_159 = arith.constant 1 : index
    %c0_160 = arith.constant 0 : index
    %c0_161 = arith.constant 0 : index
    %668 = vector.load %arg3[%c1_159, %c0_160, %c0_161] : memref<4x64x256xf32, #tpu.memory_space<vmem>>, vector<1x64x256xf32>
    %669 = vector.shape_cast %668 : vector<1x64x256xf32> to vector<64x256xf32>
    %cst_162 = arith.constant dense<0.000000e+00> : vector<4x256xf32>
    %670 = tpu.matmul %667, %669, %cst_162 {dimension_numbers = #tpu.dot_dimension_numbers<[1], [0], [0], [1], [0, 0, 1, 1], [], []>} : vector<4x64xf32>, vector<64x256xf32>, vector<4x256xf32> -> vector<4x256xf32>
    %671 = arith.addf %666, %670 : vector<4x256xf32>
    %672 = vector.extract_strided_slice %662 {offsets = [8, 0], sizes = [4, 64], strides = [1, 1]} : vector<16x64xf32> to vector<4x64xf32>
    %c2_163 = arith.constant 2 : index
    %c0_164 = arith.constant 0 : index
    %c0_165 = arith.constant 0 : index
    %673 = vector.load %arg3[%c2_163, %c0_164, %c0_165] : memref<4x64x256xf32, #tpu.memory_space<vmem>>, vector<1x64x256xf32>
    %674 = vector.shape_cast %673 : vector<1x64x256xf32> to vector<64x256xf32>
    %cst_166 = arith.constant dense<0.000000e+00> : vector<4x256xf32>
    %675 = tpu.matmul %672, %674, %cst_166 {dimension_numbers = #tpu.dot_dimension_numbers<[1], [0], [0], [1], [0, 0, 1, 1], [], []>} : vector<4x64xf32>, vector<64x256xf32>, vector<4x256xf32> -> vector<4x256xf32>
    %676 = arith.addf %671, %675 : vector<4x256xf32>
    %677 = vector.extract_strided_slice %662 {offsets = [12, 0], sizes = [4, 64], strides = [1, 1]} : vector<16x64xf32> to vector<4x64xf32>
    %c3_167 = arith.constant 3 : index
    %c0_168 = arith.constant 0 : index
    %c0_169 = arith.constant 0 : index
    %678 = vector.load %arg3[%c3_167, %c0_168, %c0_169] : memref<4x64x256xf32, #tpu.memory_space<vmem>>, vector<1x64x256xf32>
    %679 = vector.shape_cast %678 : vector<1x64x256xf32> to vector<64x256xf32>
    %cst_170 = arith.constant dense<0.000000e+00> : vector<4x256xf32>
    %680 = tpu.matmul %677, %679, %cst_170 {dimension_numbers = #tpu.dot_dimension_numbers<[1], [0], [0], [1], [0, 0, 1, 1], [], []>} : vector<4x64xf32>, vector<64x256xf32>, vector<4x256xf32> -> vector<4x256xf32>
    %681 = arith.addf %676, %680 : vector<4x256xf32>
    %682 = tpu.concatenate %681, %37 in 0 : vector<4x256xf32>, vector<4x256xf32> -> vector<8x256xf32>
    %c0_171 = arith.constant 0 : index
    %c0_172 = arith.constant 0 : index
    %683 = vector.load %arg10[%c0_171, %c0_172] : memref<8x72xbf16, #tpu.memory_space<vmem>>, vector<8x72xbf16>
    %cst_173 = arith.constant 0.000000e+00 : f32
    %684 = vector.broadcast %cst_173 : f32 to vector<8x17xf32>
    %685 = vector.extract_strided_slice %682 {offsets = [0, 0], sizes = [8, 239], strides = [1, 1]} : vector<8x256xf32> to vector<8x239xf32>
    %686 = tpu.concatenate %684, %685 in 1 : vector<8x17xf32>, vector<8x239xf32> -> vector<8x256xf32>
    %c1_i32_174 = arith.constant 1 : i32
    %687 = vector.broadcast %c1_i32_174 : i32 to vector<1x256xi32>
    %688 = arith.cmpi sge, %33, %687 : vector<1x256xi32>
    %cst_175 = arith.constant 0.000000e+00 : f32
    %689 = vector.broadcast %cst_175 : f32 to vector<8x256xf32>
    %690 = vector.shape_cast %688 : vector<1x256xi1> to vector<1x256xi1>
    %691 = vector.broadcast %690 : vector<1x256xi1> to vector<8x256xi1>
    %692 = arith.select %691, %686, %689 : vector<8x256xi1>, vector<8x256xf32>
    %cst_176 = arith.constant 0.000000e+00 : f32
    %693 = vector.broadcast %cst_176 : f32 to vector<8x16xf32>
    %694 = vector.extract_strided_slice %682 {offsets = [0, 0], sizes = [8, 240], strides = [1, 1]} : vector<8x256xf32> to vector<8x240xf32>
    %695 = tpu.concatenate %693, %694 in 1 : vector<8x16xf32>, vector<8x240xf32> -> vector<8x256xf32>
    %cst_177 = arith.constant 0.000000e+00 : f32
    %696 = vector.broadcast %cst_177 : f32 to vector<8x15xf32>
    %697 = vector.extract_strided_slice %682 {offsets = [0, 0], sizes = [8, 241], strides = [1, 1]} : vector<8x256xf32> to vector<8x241xf32>
    %698 = tpu.concatenate %696, %697 in 1 : vector<8x15xf32>, vector<8x241xf32> -> vector<8x256xf32>
    %c15_i32 = arith.constant 15 : i32
    %699 = vector.broadcast %c15_i32 : i32 to vector<1x256xi32>
    %700 = arith.cmpi slt, %33, %699 : vector<1x256xi32>
    %cst_178 = arith.constant 0.000000e+00 : f32
    %701 = vector.broadcast %cst_178 : f32 to vector<8x256xf32>
    %702 = vector.shape_cast %700 : vector<1x256xi1> to vector<1x256xi1>
    %703 = vector.broadcast %702 : vector<1x256xi1> to vector<8x256xi1>
    %704 = arith.select %703, %698, %701 : vector<8x256xi1>, vector<8x256xf32>
    %cst_179 = arith.constant 0.000000e+00 : f32
    %705 = vector.broadcast %cst_179 : f32 to vector<8x1xf32>
    %706 = vector.extract_strided_slice %682 {offsets = [0, 0], sizes = [8, 255], strides = [1, 1]} : vector<8x256xf32> to vector<8x255xf32>
    %707 = tpu.concatenate %705, %706 in 1 : vector<8x1xf32>, vector<8x255xf32> -> vector<8x256xf32>
    %c1_i32_180 = arith.constant 1 : i32
    %708 = vector.broadcast %c1_i32_180 : i32 to vector<1x256xi32>
    %709 = arith.cmpi sge, %33, %708 : vector<1x256xi32>
    %cst_181 = arith.constant 0.000000e+00 : f32
    %710 = vector.broadcast %cst_181 : f32 to vector<8x256xf32>
    %711 = vector.shape_cast %709 : vector<1x256xi1> to vector<1x256xi1>
    %712 = vector.broadcast %711 : vector<1x256xi1> to vector<8x256xi1>
    %713 = arith.select %712, %707, %710 : vector<8x256xi1>, vector<8x256xf32>
    %714 = vector.extract_strided_slice %682 {offsets = [0, 1], sizes = [8, 255], strides = [1, 1]} : vector<8x256xf32> to vector<8x255xf32>
    %cst_182 = arith.constant 0.000000e+00 : f32
    %715 = vector.broadcast %cst_182 : f32 to vector<8x1xf32>
    %716 = tpu.concatenate %714, %715 in 1 : vector<8x255xf32>, vector<8x1xf32> -> vector<8x256xf32>
    %c15_i32_183 = arith.constant 15 : i32
    %717 = vector.broadcast %c15_i32_183 : i32 to vector<1x256xi32>
    %718 = arith.cmpi slt, %33, %717 : vector<1x256xi32>
    %cst_184 = arith.constant 0.000000e+00 : f32
    %719 = vector.broadcast %cst_184 : f32 to vector<8x256xf32>
    %720 = vector.shape_cast %718 : vector<1x256xi1> to vector<1x256xi1>
    %721 = vector.broadcast %720 : vector<1x256xi1> to vector<8x256xi1>
    %722 = arith.select %721, %716, %719 : vector<8x256xi1>, vector<8x256xf32>
    %723 = vector.extract_strided_slice %682 {offsets = [0, 15], sizes = [8, 241], strides = [1, 1]} : vector<8x256xf32> to vector<8x241xf32>
    %cst_185 = arith.constant 0.000000e+00 : f32
    %724 = vector.broadcast %cst_185 : f32 to vector<8x15xf32>
    %725 = tpu.concatenate %723, %724 in 1 : vector<8x241xf32>, vector<8x15xf32> -> vector<8x256xf32>
    %c1_i32_186 = arith.constant 1 : i32
    %726 = vector.broadcast %c1_i32_186 : i32 to vector<1x256xi32>
    %727 = arith.cmpi sge, %33, %726 : vector<1x256xi32>
    %cst_187 = arith.constant 0.000000e+00 : f32
    %728 = vector.broadcast %cst_187 : f32 to vector<8x256xf32>
    %729 = vector.shape_cast %727 : vector<1x256xi1> to vector<1x256xi1>
    %730 = vector.broadcast %729 : vector<1x256xi1> to vector<8x256xi1>
    %731 = arith.select %730, %725, %728 : vector<8x256xi1>, vector<8x256xf32>
    %732 = vector.extract_strided_slice %682 {offsets = [0, 16], sizes = [8, 240], strides = [1, 1]} : vector<8x256xf32> to vector<8x240xf32>
    %cst_188 = arith.constant 0.000000e+00 : f32
    %733 = vector.broadcast %cst_188 : f32 to vector<8x16xf32>
    %734 = tpu.concatenate %732, %733 in 1 : vector<8x240xf32>, vector<8x16xf32> -> vector<8x256xf32>
    %735 = vector.extract_strided_slice %682 {offsets = [0, 17], sizes = [8, 239], strides = [1, 1]} : vector<8x256xf32> to vector<8x239xf32>
    %cst_189 = arith.constant 0.000000e+00 : f32
    %736 = vector.broadcast %cst_189 : f32 to vector<8x17xf32>
    %737 = tpu.concatenate %735, %736 in 1 : vector<8x239xf32>, vector<8x17xf32> -> vector<8x256xf32>
    %c15_i32_190 = arith.constant 15 : i32
    %738 = vector.broadcast %c15_i32_190 : i32 to vector<1x256xi32>
    %739 = arith.cmpi slt, %33, %738 : vector<1x256xi32>
    %cst_191 = arith.constant 0.000000e+00 : f32
    %740 = vector.broadcast %cst_191 : f32 to vector<8x256xf32>
    %741 = vector.shape_cast %739 : vector<1x256xi1> to vector<1x256xi1>
    %742 = vector.broadcast %741 : vector<1x256xi1> to vector<8x256xi1>
    %743 = arith.select %742, %737, %740 : vector<8x256xi1>, vector<8x256xf32>
    %744 = tpu.concatenate %692, %695, %704, %713, %682, %722, %731, %734, %743 in 0 : vector<8x256xf32>, vector<8x256xf32>, vector<8x256xf32>, vector<8x256xf32>, vector<8x256xf32>, vector<8x256xf32>, vector<8x256xf32>, vector<8x256xf32>, vector<8x256xf32> -> vector<72x256xf32>
    %745 = arith.truncf %744 : vector<72x256xf32> to vector<72x256xbf16>
    %cst_192 = arith.constant dense<0.000000e+00> : vector<8x256xf32>
    %746 = tpu.matmul %683, %745, %cst_192 {dimension_numbers = #tpu.dot_dimension_numbers<[1], [0], [0], [1], [0, 0, 1, 1], [], []>} : vector<8x72xbf16>, vector<72x256xbf16>, vector<8x256xf32> -> vector<8x256xf32>
    %cst_193 = arith.constant 0.000000e+00 : f32
    %747 = vector.broadcast %cst_193 : f32 to vector<8x256xf32>
    %748 = arith.maximumf %746, %747 : vector<8x256xf32>
    %c0_194 = arith.constant 0 : index
    %c0_195 = arith.constant 0 : index
    %749 = vector.load %arg11[%c0_194, %c0_195] : memref<8x8xbf16, #tpu.memory_space<vmem>>, vector<8x8xbf16>
    %750 = arith.truncf %35 : vector<8x256xf32> to vector<8x256xbf16>
    %cst_196 = arith.constant dense<0.000000e+00> : vector<8x256xf32>
    %751 = tpu.matmul %749, %750, %cst_196 {dimension_numbers = #tpu.dot_dimension_numbers<[1], [0], [0], [1], [0, 0, 1, 1], [], []>} : vector<8x8xbf16>, vector<8x256xbf16>, vector<8x256xf32> -> vector<8x256xf32>
    %752 = arith.addf %748, %751 : vector<8x256xf32>
    %753 = vector.shape_cast %752 : vector<8x256xf32> to vector<1x8x256xf32>
    %c0_197 = arith.constant 0 : index
    %c0_198 = arith.constant 0 : index
    %c0_199 = arith.constant 0 : index
    %754 = vector.load %arg13[%c0_197, %c0_198, %c0_199] : memref<1x8x256xf32, #tpu.memory_space<vmem>>, vector<1x8x256xf32>
    tpu.vector_store %arg13[%c0_197, %c0_198, %c0_199], %753 {strides = array<i32>} : memref<1x8x256xf32, #tpu.memory_space<vmem>>, vector<1x8x256xf32>,
    return
  }
  func.func @transform_0(%arg0: i32) -> (i32, i32, i32) {
    %c0_i32 = arith.constant 0 : i32
    %c0_i32_0 = arith.constant 0 : i32
    %c0_i32_1 = arith.constant 0 : i32
    return %arg0, %c0_i32, %c0_i32_0 : i32, i32, i32
  }
  func.func @transform_1(%arg0: i32) -> (i32, i32, i32) {
    %c0_i32 = arith.constant 0 : i32
    %c0_i32_0 = arith.constant 0 : i32
    %c0_i32_1 = arith.constant 0 : i32
    %c0_i32_2 = arith.constant 0 : i32
    return %c0_i32, %c0_i32_0, %c0_i32_1 : i32, i32, i32
  }
  func.func @transform_2(%arg0: i32) -> (i32, i32, i32) {
    %c0_i32 = arith.constant 0 : i32
    %c0_i32_0 = arith.constant 0 : i32
    %c0_i32_1 = arith.constant 0 : i32
    %c0_i32_2 = arith.constant 0 : i32
    return %c0_i32, %c0_i32_0, %c0_i32_1 : i32, i32, i32
  }
  func.func @transform_3(%arg0: i32) -> (i32, i32) {
    %c0_i32 = arith.constant 0 : i32
    %c0_i32_0 = arith.constant 0 : i32
    %c0_i32_1 = arith.constant 0 : i32
    return %c0_i32, %c0_i32_0 : i32, i32
  }
  func.func @transform_4(%arg0: i32) -> (i32, i32) {
    %c0_i32 = arith.constant 0 : i32
    %c0_i32_0 = arith.constant 0 : i32
    %c0_i32_1 = arith.constant 0 : i32
    return %c0_i32, %c0_i32_0 : i32, i32
  }
  func.func @transform_5(%arg0: i32) -> (i32, i32) {
    %c0_i32 = arith.constant 0 : i32
    %c0_i32_0 = arith.constant 0 : i32
    %c0_i32_1 = arith.constant 0 : i32
    return %c0_i32, %c0_i32_0 : i32, i32
  }
  func.func @transform_6(%arg0: i32) -> (i32, i32) {
    %c0_i32 = arith.constant 0 : i32
    %c0_i32_0 = arith.constant 0 : i32
    %c0_i32_1 = arith.constant 0 : i32
    return %c0_i32, %c0_i32_0 : i32, i32
  }
  func.func @transform_7(%arg0: i32) -> (i32, i32) {
    %c0_i32 = arith.constant 0 : i32
    %c0_i32_0 = arith.constant 0 : i32
    %c0_i32_1 = arith.constant 0 : i32
    return %c0_i32, %c0_i32_0 : i32, i32
  }
  func.func @transform_8(%arg0: i32) -> (i32, i32) {
    %c0_i32 = arith.constant 0 : i32
    %c0_i32_0 = arith.constant 0 : i32
    %c0_i32_1 = arith.constant 0 : i32
    return %c0_i32, %c0_i32_0 : i32, i32
  }
  func.func @transform_9(%arg0: i32) -> (i32, i32) {
    %c0_i32 = arith.constant 0 : i32
    %c0_i32_0 = arith.constant 0 : i32
    %c0_i32_1 = arith.constant 0 : i32
    return %c0_i32, %c0_i32_0 : i32, i32
  }
  func.func @transform_10(%arg0: i32) -> (i32, i32) {
    %c0_i32 = arith.constant 0 : i32
    %c0_i32_0 = arith.constant 0 : i32
    %c0_i32_1 = arith.constant 0 : i32
    return %c0_i32, %c0_i32_0 : i32, i32
  }
  func.func @transform_11(%arg0: i32) -> i32 {
    %c0_i32 = arith.constant 0 : i32
    %c0_i32_0 = arith.constant 0 : i32
    return %c0_i32 : i32
  }
  func.func @transform_12(%arg0: i32) -> (i32, i32, i32) {
    %c0_i32 = arith.constant 0 : i32
    %c0_i32_0 = arith.constant 0 : i32
    %c0_i32_1 = arith.constant 0 : i32
    return %arg0, %c0_i32, %c0_i32_0 : i32, i32, i32
  }
}

</mosaic_0001>

<bundles_post_ra>
// kernel: hwb1_forward.1
= control target key start
LH: loop header
LB: loop body
LE: loop exit
PB: predicated region body
PF: predicated region fallthrough
CT: control target
= control target key end

     0   :  { %17 = vsyncpa [#allocation3], 0  ;;  %s3927_s0 = inlined_call_operand.vmem [shape: f32[2,8,256], index: 0, kind: input, shape index: {}]   ;;  %s3928_s1 = inlined_call_operand.hbm [shape: f32[4,256,64], index: 1, kind: input, shape index: {}]   ;;  %s3929_s2 = inlined_call_operand.hbm [shape: f32[4,64,256], index: 2, kind: input, shape index: {}]   ;;  %s3930_s3 = inlined_call_operand.vmem [shape: bf16[8,144], index: 3, kind: input, shape index: {}]   ;;  %s3931_s4 = inlined_call_operand.vmem [shape: bf16[16,72], index: 4, kind: input, shape index: {}]   ;;  %s3932_s5 = inlined_call_operand.vmem [shape: f32[4,16], index: 5, kind: input, shape index: {}]   ;;  %s3933_s6 = inlined_call_operand.vmem [shape: f32[16,4], index: 6, kind: input, shape index: {}]   ;;  %s3934_s7 = inlined_call_operand.vmem [shape: bf16[16,16], index: 7, kind: input, shape index: {}]   ;;  %s3935_s8 = inlined_call_operand.vmem [shape: bf16[16,16], index: 8, kind: input, shape index: {}]   ;;  %s3936_s9 = inlined_call_operand.vmem [shape: bf16[8,72], index: 9, kind: input, shape index: {}]   ;;  %s3937_s10 = inlined_call_operand.vmem [shape: bf16[8,8], index: 10, kind: input, shape index: {}]   ;;  %s3938_s11 = inlined_call_operand.vmem [shape: f32[50], index: 11, kind: input, shape index: {}]   ;;  %s3939_s12 = inlined_call_operand.vmem [shape: f32[2,8,256], index: 12, kind: output, shape index: {}]  }
   0x1   :  { %18 = vsyncpa [#allocation6], 0 }
   0x2   :  { %19 = vsyncpa [#allocation4], 0  ;;  %s3298_s21 = smov 0  }
   0x3 LB: > { %s3198_s22 = smov [#allocation2]   ;;  %s3304_s24 = sadd.s32 4294967295, %s3196_s21   ;;  %s3196_s21 = sphi %s3298_s21, %s25_s21  }
   0x4   : > { %s325_s23 = sshll.u32 %s3198_s22, 4  ;;  %p2591_p0 = scmp.ge.s32.totalorder %s3196_s21, 1  ;;  %s326_s23 = int_to_ptr.vmem [resolvable:$true] %s325_s23 }
   0x5   : > { %p313_p1 = scmp.lt.s32.totalorder %s3196_s21, 3  ;;  %p2961_p2 = scmp.eq.s32.totalorder %s3304_s24, 0 }
   0x6   : > { %s3199_s26 = smov [#allocation5]   ;;  %s376_s13 = sshll.u32 %s3938_s11, 4  ;;  %s3326_s13 = int_to_ptr.vmem [resolvable:$true] %s376_s13 }
   0x7   : > { %p3309_p3 = pnand %p2591_p0, %p313_p1  ;;  %s338_s27 = sshll.u32 %s3199_s26, 4  ;;  %s3315_s27 = int_to_ptr.vmem [resolvable:$true] %s338_s27 }
   0x8   : > { %s3122_s14 = scalar_lea.vmem %s326_s23, 16384  ;;  %p3130_p10 = scmp.lt.s32.totalorder %s326_s23, %s326_s23 }
   0x9   : > { %p2951_p4 = pneg %p3309_p3  ;;  %p3123_p7 = scmp.ne.s32.totalorder %s326_s23, %s3122_s14 }
   0xa   : > { %p3131_p11 = scmp.lt.s32.totalorder %s3122_s14, %s3122_s14 }
   0xb   : > { %p3319_p5 = pnand %p2961_p2, %p2951_p4 }
   0xc   : > { %p3132_p12 = por %p3131_p11, %p3130_p10 }
   0xd   : > { %p3113_p6 = pneg %p3319_p5 }
   0xf   : > { %p3125_p8 = pnand %p3123_p7, %p3113_p6 }
  0x11   : > { %p3126_p9 = pneg %p3125_p8 }
  0x13   : > { %p3133_p13 = pnand %p3132_p12, %p3126_p9 }
  0x15   : > { %3136 = shalt.err (!%p3133_p13)
}
  0x16   : > { %s3200_s15 = smov 128   ;;  %s3201_s16 = smov 8  }
  0x17   : > { %2954 = dma.hbm_to_vmem [thread:$0]  (!%p3319_p5), %s3928_s1, 16384, %s326_s23, [#allocation3], %s3200_s15, %s3200_s15, %s3201_s16  }
  0x18   : > { %s3148_s19 = scalar_lea.vmem %s3315_s27, 8192  ;;  %p3156_p7 = scmp.lt.s32.totalorder %s3315_s27, %s3315_s27 }
  0x19   : > { %p3149_p0 = scmp.ne.s32.totalorder %s3315_s27, %s3148_s19  ;;  %p3157_p8 = scmp.lt.s32.totalorder %s3148_s19, %s3148_s19 }
  0x1b   : > { %p3151_p1 = pnand %p3149_p0, %p3113_p6  ;;  %p3158_p9 = por %p3157_p8, %p3156_p7 }
  0x1d   : > { %p3152_p4 = pneg %p3151_p1 }
  0x1f   : > { %p3159_p10 = pnand %p3158_p9, %p3152_p4 }
  0x21   : > { %3162 = shalt.err (!%p3159_p10)
}
  0x22   : > { %s3202_s20 = smov 256   ;;  %s3203_s22 = smov 16  }
  0x23   : > { %2957 = dma.hbm_to_vmem [thread:$0]  (!%p3319_p5), %s3929_s2, 8192, %s3315_s27, [#allocation6], %s3202_s20, %s3202_s20, %s3203_s22  }
  0x24   : > { %s3163_s29 = scalar_lea.vmem %s3326_s13, 16  ;;  %p3171_p0 = scmp.lt.s32.totalorder %s3326_s13, %s3326_s13 }
  0x25   : > { %p3164_p11 = scmp.ne.s32.totalorder %s3326_s13, %s3163_s29  ;;  %p3172_p1 = scmp.lt.s32.totalorder %s3163_s29, %s3163_s29 }
  0x27   : > { %p3166_p12 = pnand %p3164_p11, %p3113_p6  ;;  %p3173_p4 = por %p3172_p1, %p3171_p0 }
  0x29   : > { %p3167_p13 = pneg %p3166_p12 }
  0x2b   : > { %p3174_p7 = pnand %p3173_p4, %p3167_p13 }
  0x2d   : > { %3177 = shalt.err (!%p3174_p7)
}
  0x2e   : > { %s3204_s30 = smov [#allocation7]   ;;  %397 = sbr.rel (%p3309_p3) target bundleno = 2474 (0x9aa), region = 68 }
  0x2f   : > { %2960 = dma.vmem_to_smem (!%p3319_p5), %s3326_s13, 16, %s3204_s30, [#allocation4]  }
  0x33   : > { %3183 = dma.done.wait (%p2961_p2), [#allocation3], 16384  }
  0x34   : > { %3185 = vsyncadd (%p2961_p2), [#allocation3], 4294950912 }
  0x35   : > { %3187 = dma.done.wait (%p2961_p2), [#allocation6], 8192  }
  0x36   : > { %3189 = vsyncadd (%p2961_p2), [#allocation6], 4294959104 }
  0x37   : > { %3191 = dma.done.wait (%p2961_p2), [#allocation4], 16  }
  0x38   : > { %3193 = vsyncadd (%p2961_p2), [#allocation4], 4294967280 }
  0x39   : > { %411 = sfence }
  0x3a   : > { %v531_v0 = vld [vmem:[#allocation2 + $0xf8] sm:$0xff]  ;;  %v530_v4 = vld [vmem:[#allocation2 + $0xf0] sm:$0xff]  ;;  %v529_v8 = vld [vmem:[#allocation2 + $0xe8] sm:$0xff]  ;;  %p448_p2 = scmp.lt.s32.totalorder %s3304_s24, 1  ;;  %vm3940_vm0 = vcmask 1043456   ;;  %s3206_s14 = smov 127  }
  0x3b   : > { %v634_v1 = vld [vmem:[#allocation2 + $0x1f8] sm:$0xff]  ;;  %2745 = vmatprep.subr.mxu0 %v531_v0  ;;  %v633_v5 = vld [vmem:[#allocation2 + $0x1f0] sm:$0xff]  ;;  %v632_v9 = vld [vmem:[#allocation2 + $0x1e8] sm:$0xff]  ;;  %s3207_s15 = smov 120   ;;  %s3208_s16 = smov 1   ;;  %vm1028_vm1 = vcmask 130048  }
  0x3c   : > { %v515_v2 = vld [vmem:[#allocation2 + $0x78] sm:$0xff]  ;;  %2780 = vmatprep.subr.mxu1 %v634_v1  ;;  %v514_v6 = vld [vmem:[#allocation2 + $0x70] sm:$0xff]  ;;  %v513_v10 = vld [vmem:[#allocation2 + $0x68] sm:$0xff]  ;;  %s3984_s24 = smov (!%p448_p2, %s3304_s24), 1  ;;  %s3209_s17 = smov 121   ;;  %vm999_vm2 = vcmask 457728  }
  0x3d   : > { %v618_v3 = vld [vmem:[#allocation2 + $0x178] sm:$0xff]  ;;  %2746 = vmatpush3.msra.mxu0 %v515_v2  ;;  %v617_v7 = vld [vmem:[#allocation2 + $0x170] sm:$0xff]  ;;  %v616_v11 = vld [vmem:[#allocation2 + $0x168] sm:$0xff]  ;;  %s3944_s25 = sshll.u32 %s3984_s24, 4  ;;  %s3210_s18 = smov 8   ;;  %vm988_vm4 = vcmask 465920  }
  0x3e   : > { %2781 = vmatpush3.msra.mxu1 %v618_v3  ;;  %2747 = vmatprep.subr.mxu0 %v530_v4  ;;  %v528_v12 = vld [vmem:[#allocation2 + $0xe0] sm:$0xff]  ;;  %v527_v16 = vld [vmem:[#allocation2 + $0xd8] sm:$0xff]  ;;  %v526_v20 = vld [vmem:[#allocation2 + $0xd0] sm:$0xff]  ;;  %s3387_s13 = scalar_lea.vmem %s3927_s0, %s3944_s25  ;;  %s3211_s19 = smov 7   ;;  %vm977_vm6 = vcmask 515072   ;;  %vm966_vm10 = vcmask 7168  }
  0x3f   : > { %2782 = vmatprep.subr.mxu1 %v633_v5  ;;  %2748 = vmatpush3.msra.mxu0 %v514_v6  ;;  %v631_v13 = vld [vmem:[#allocation2 + $0x1e0] sm:$0xff]  ;;  %v630_v17 = vld [vmem:[#allocation2 + $0x1d8] sm:$0xff]  ;;  %v629_v21 = vld [vmem:[#allocation2 + $0x1d0] sm:$0xff]  ;;  %s3212_s20 = smov 119   ;;  %s3213_s22 = smov 9   ;;  %vm952_vm11 = vcmask 56320  }
  0x40   : > { %2783 = vmatpush3.msra.mxu1 %v617_v7  ;;  %2749 = vmatprep.subr.mxu0 %v529_v8  ;;  %v512_v14 = vld [vmem:[#allocation2 + $0x60] sm:$0xff]  ;;  %v511_v18 = vld [vmem:[#allocation2 + $0x58] sm:$0xff]  ;;  %v510_v22 = vld [vmem:[#allocation2 + $0x50] sm:$0xff]  ;;  %vm943_vm12 = vcmask 64512   ;;  %vm929_vm14 = vcmask 72704   ;;  %s3945_s27 = smov 17  }
  0x41   : > { %2784 = vmatprep.subr.mxu1 %v632_v9  ;;  %v615_v15 = vld [vmem:[#allocation2 + $0x160] sm:$0xff]  ;;  %2750 = vmatpush3.msra.mxu0 %v513_v10  ;;  %v614_v19 = vld [vmem:[#allocation2 + $0x158] sm:$0xff]  ;;  %v613_v23 = vld [vmem:[#allocation2 + $0x150] sm:$0xff]  ;;  %s3218_s28 = smov 15   ;;  %s3219_s23 = smov 18  }
  0x42   : > { %2785 = vmatpush3.msra.mxu1 %v616_v11  ;;  %2751 = vmatprep.subr.mxu0 %v528_v12  ;;  %v525_v24 = vld [vmem:[#allocation2 + $0xc8] sm:$0xff]  ;;  %v524_v28 = vld [vmem:[#allocation2 + $0xc0] sm:$0xff]  ;;  %v523_v32 = vld [vmem:[#allocation2 + $0xb8] sm:$0xff]  ;;  %s3220_s26 = smov 10   ;;  %s3946_s29 = smov 16  }
  0x43   : > { %2786 = vmatprep.subr.mxu1 %v631_v13  ;;  %2752 = vmatpush3.msra.mxu0 %v512_v14  ;;  %v628_v25 = vld [vmem:[#allocation2 + $0x1c8] sm:$0xff]  ;;  %v627_v29 = vld [vmem:[#allocation2 + $0x1c0] sm:$0xff]  ;;  %v626_v33 = vld [vmem:[#allocation2 + $0x1b8] sm:$0xff]  ;;  %s3222_s30 = smov 14   ;;  %s3223_s25 = smov 6  }
  0x44   : > { %2787 = vmatpush3.msra.mxu1 %v615_v15  ;;  %2753 = vmatprep.subr.mxu0 %v527_v16  ;;  %v509_v26 = vld [vmem:[#allocation2 + $0x48] sm:$0xff]  ;;  %v508_v30 = vld [vmem:[#allocation2 + $0x40] sm:$0xff]  ;;  %v507_v34 = vld [vmem:[#allocation2 + $0x38] sm:$0xff] }
  0x45   : > { %2788 = vmatprep.subr.mxu1 %v630_v17  ;;  %2754 = vmatpush3.msra.mxu0 %v511_v18  ;;  %v612_v27 = vld [vmem:[#allocation2 + $0x148] sm:$0xff]  ;;  %v611_v31 = vld [vmem:[#allocation2 + $0x140] sm:$0xff]  ;;  %v610_v35 = vld [vmem:[#allocation2 + $0x138] sm:$0xff] }
  0x46   : > { %2789 = vmatpush3.msra.mxu1 %v614_v19  ;;  %2755 = vmatprep.subr.mxu0 %v526_v20  ;;  %v522_v36 = vld [vmem:[#allocation2 + $0xb0] sm:$0xff]  ;;  %v521_v40 = vld [vmem:[#allocation2 + $0xa8] sm:$0xff]  ;;  %v520_v44 = vld [vmem:[#allocation2 + $0xa0] sm:$0xff] }
  0x47   : > { %2790 = vmatprep.subr.mxu1 %v629_v21  ;;  %2756 = vmatpush3.msra.mxu0 %v510_v22  ;;  %v625_v37 = vld [vmem:[#allocation2 + $0x1b0] sm:$0xff]  ;;  %v624_v41 = vld [vmem:[#allocation2 + $0x1a8] sm:$0xff]  ;;  %v623_v45 = vld [vmem:[#allocation2 + $0x1a0] sm:$0xff] }
  0x48   : > { %2791 = vmatpush3.msra.mxu1 %v613_v23  ;;  %2757 = vmatprep.subr.mxu0 %v525_v24  ;;  %v506_v38 = vld [vmem:[#allocation2 + $0x30] sm:$0xff]  ;;  %v505_v42 = vld [vmem:[#allocation2 + $0x28] sm:$0xff]  ;;  %v504_v46 = vld [vmem:[#allocation2 + $0x20] sm:$0xff] }
  0x49   : > { %2792 = vmatprep.subr.mxu1 %v628_v25  ;;  %2758 = vmatpush3.msra.mxu0 %v509_v26  ;;  %v609_v39 = vld [vmem:[#allocation2 + $0x130] sm:$0xff]  ;;  %v608_v43 = vld [vmem:[#allocation2 + $0x128] sm:$0xff]  ;;  %v607_v47 = vld [vmem:[#allocation2 + $0x120] sm:$0xff] }
  0x4a   : > { %2793 = vmatpush3.msra.mxu1 %v612_v27  ;;  %2759 = vmatprep.subr.mxu0 %v524_v28  ;;  %v519_v48 = vld [vmem:[#allocation2 + $0x98] sm:$0xff]  ;;  %v518_v52 = vld [vmem:[#allocation2 + $0x90] sm:$0xff]  ;;  %v517_v56 = vld [vmem:[#allocation2 + $0x88] sm:$0xff] }
  0x4b   : > { %2794 = vmatprep.subr.mxu1 %v627_v29  ;;  %2760 = vmatpush3.msra.mxu0 %v508_v30  ;;  %v622_v49 = vld [vmem:[#allocation2 + $0x198] sm:$0xff]  ;;  %v621_v53 = vld [vmem:[#allocation2 + $0x190] sm:$0xff]  ;;  %v620_v57 = vld [vmem:[#allocation2 + $0x188] sm:$0xff] }
  0x4c   : > { %2795 = vmatpush3.msra.mxu1 %v611_v31  ;;  %2761 = vmatprep.subr.mxu0 %v523_v32  ;;  %v503_v50 = vld [vmem:[#allocation2 + $0x18] sm:$0xff]  ;;  %v502_v54 = vld [vmem:[#allocation2 + $0x10] sm:$0xff]  ;;  %v501_v58 = vld [vmem:[#allocation2 + $0x8] sm:$0xff] }
  0x4d   : > { %2796 = vmatprep.subr.mxu1 %v626_v33  ;;  %2762 = vmatpush3.msra.mxu0 %v507_v34  ;;  %v606_v51 = vld [vmem:[#allocation2 + $0x118] sm:$0xff]  ;;  %v605_v55 = vld [vmem:[#allocation2 + $0x110] sm:$0xff]  ;;  %v604_v59 = vld [vmem:[#allocation2 + $0x108] sm:$0xff] }
  0x4e   : > { %2797 = vmatpush3.msra.mxu1 %v610_v35  ;;  %2763 = vmatprep.subr.mxu0 %v522_v36  ;;  %v516_v60 = vld [vmem:[#allocation2 + $0x80] sm:$0xff]  ;;  %v3390_v0 = vld [vmem:[%s3387_s13 + $0x8] sm:$0xff]  ;;  %v737_v2 = vld [vmem:[#allocation2 + $0x2f8] sm:$0xff] }
  0x4f   : > { %2798 = vmatprep.subr.mxu1 %v625_v37  ;;  %2764 = vmatpush3.msra.mxu0 %v506_v38  ;;  %v619_v61 = vld [vmem:[#allocation2 + $0x180] sm:$0xff]  ;;  %v840_v3 = vld [vmem:[#allocation2 + $0x3f8] sm:$0xff]  ;;  %v736_v6 = vld [vmem:[#allocation2 + $0x2f0] sm:$0xff] }
  0x50   : > { %2799 = vmatpush3.msra.mxu1 %v609_v39  ;;  %2765 = vmatprep.subr.mxu0 %v521_v40  ;;  %v500_v62 = vld [vmem:[#allocation2] sm:$0xff]  ;;  %v721_v4 = vld [vmem:[#allocation2 + $0x278] sm:$0xff]  ;;  %v839_v7 = vld [vmem:[#allocation2 + $0x3f0] sm:$0xff] }
  0x51   : > { %2800 = vmatprep.subr.mxu1 %v624_v41  ;;  %2766 = vmatpush3.msra.mxu0 %v505_v42  ;;  %v603_v63 = vld [vmem:[#allocation2 + $0x100] sm:$0xff]  ;;  %v824_v5 = vld [vmem:[#allocation2 + $0x378] sm:$0xff]  ;;  %v720_v8 = vld [vmem:[#allocation2 + $0x270] sm:$0xff] }
  0x52   : > { %2801 = vmatpush3.msra.mxu1 %v608_v43  ;;  %2767 = vmatprep.subr.mxu0 %v520_v44  ;;  %v3393_v1 = vld [vmem:[%s3387_s13] sm:$0xff]  ;;  %v823_v9 = vld [vmem:[#allocation2 + $0x370] sm:$0xff]  ;;  %v735_v10 = vld [vmem:[#allocation2 + $0x2e8] sm:$0xff] }
  0x53   : > { %2802 = vmatprep.subr.mxu1 %v623_v45  ;;  %2768 = vmatpush3.msra.mxu0 %v504_v46  ;;  %v838_v11 = vld [vmem:[#allocation2 + $0x3e8] sm:$0xff]  ;;  %v734_v14 = vld [vmem:[#allocation2 + $0x2e0] sm:$0xff]  ;;  %v733_v18 = vld [vmem:[#allocation2 + $0x2d8] sm:$0xff] }
  0x54   : > { %2803 = vmatpush3.msra.mxu1 %v607_v47  ;;  %2769 = vmatprep.subr.mxu0 %v519_v48  ;;  %v719_v12 = vld [vmem:[#allocation2 + $0x268] sm:$0xff]  ;;  %v837_v15 = vld [vmem:[#allocation2 + $0x3e0] sm:$0xff]  ;;  %v836_v19 = vld [vmem:[#allocation2 + $0x3d8] sm:$0xff] }
  0x55   : > { %2804 = vmatprep.subr.mxu1 %v622_v49  ;;  %2770 = vmatpush3.msra.mxu0 %v503_v50  ;;  %v822_v13 = vld [vmem:[#allocation2 + $0x368] sm:$0xff]  ;;  %v718_v16 = vld [vmem:[#allocation2 + $0x260] sm:$0xff]  ;;  %v717_v20 = vld [vmem:[#allocation2 + $0x258] sm:$0xff] }
  0x56   : > { %2805 = vmatpush3.msra.mxu1 %v606_v51  ;;  %2771 = vmatprep.subr.mxu0 %v518_v52  ;;  %v821_v17 = vld [vmem:[#allocation2 + $0x360] sm:$0xff]  ;;  %v820_v21 = vld [vmem:[#allocation2 + $0x358] sm:$0xff]  ;;  %v732_v22 = vld [vmem:[#allocation2 + $0x2d0] sm:$0xff] }
  0x57   : > { %2806 = vmatprep.subr.mxu1 %v621_v53  ;;  %2772 = vmatpush3.msra.mxu0 %v502_v54  ;;  %v835_v23 = vld [vmem:[#allocation2 + $0x3d0] sm:$0xff]  ;;  %v731_v26 = vld [vmem:[#allocation2 + $0x2c8] sm:$0xff]  ;;  %v730_v30 = vld [vmem:[#allocation2 + $0x2c0] sm:$0xff] }
  0x58   : > { %2807 = vmatpush3.msra.mxu1 %v605_v55  ;;  %2773 = vmatprep.subr.mxu0 %v517_v56  ;;  %v716_v24 = vld [vmem:[#allocation2 + $0x250] sm:$0xff]  ;;  %v834_v27 = vld [vmem:[#allocation2 + $0x3c8] sm:$0xff]  ;;  %v833_v31 = vld [vmem:[#allocation2 + $0x3c0] sm:$0xff] }
  0x59   : > { %2808 = vmatprep.subr.mxu1 %v620_v57  ;;  %2774 = vmatpush3.msra.mxu0 %v501_v58  ;;  %v819_v25 = vld [vmem:[#allocation2 + $0x350] sm:$0xff]  ;;  %v715_v28 = vld [vmem:[#allocation2 + $0x248] sm:$0xff]  ;;  %v714_v32 = vld [vmem:[#allocation2 + $0x240] sm:$0xff] }
  0x5a   : > { %2809 = vmatpush3.msra.mxu1 %v604_v59  ;;  %2775 = vmatprep.subr.mxu0 %v516_v60  ;;  %v818_v29 = vld [vmem:[#allocation2 + $0x348] sm:$0xff]  ;;  %v817_v33 = vld [vmem:[#allocation2 + $0x340] sm:$0xff]  ;;  %v729_v34 = vld [vmem:[#allocation2 + $0x2b8] sm:$0xff] }
  0x5b   : > { %2810 = vmatprep.subr.mxu1 %v619_v61  ;;  %2776 = vmatpush3.msra.mxu0 %v500_v62  ;;  %v832_v35 = vld [vmem:[#allocation2 + $0x3b8] sm:$0xff]  ;;  %v728_v38 = vld [vmem:[#allocation2 + $0x2b0] sm:$0xff]  ;;  %v727_v42 = vld [vmem:[#allocation2 + $0x2a8] sm:$0xff] }
  0x5c   : > { %2811 = vmatpush3.msra.mxu1 %v603_v63  ;;  %699 = vmatprep.mubr.f32.mxu1 %v3390_v0  ;;  %v713_v36 = vld [vmem:[#allocation2 + $0x238] sm:$0xff]  ;;  %v831_v39 = vld [vmem:[#allocation2 + $0x3b0] sm:$0xff]  ;;  %v830_v43 = vld [vmem:[#allocation2 + $0x3a8] sm:$0xff] }
  0x5d   : > { %596 = vmatprep.mubr.f32.mxu0 %v3390_v0  ;;  %700 = vmatmul.mubr.f32.vlgmr.msra.gmra.mxu1 %v3393_v1  ;;  %v816_v37 = vld [vmem:[#allocation2 + $0x338] sm:$0xff]  ;;  %v712_v40 = vld [vmem:[#allocation2 + $0x230] sm:$0xff]  ;;  %v711_v44 = vld [vmem:[#allocation2 + $0x228] sm:$0xff] }
  0x5e   : > { %2815 = vmatprep.subr.mxu0 %v737_v2  ;;  %2850 = vmatprep.subr.mxu1 %v840_v3  ;;  %v815_v41 = vld [vmem:[#allocation2 + $0x330] sm:$0xff]  ;;  %v814_v45 = vld [vmem:[#allocation2 + $0x328] sm:$0xff]  ;;  %v726_v46 = vld [vmem:[#allocation2 + $0x2a0] sm:$0xff] }
  0x5f   : > { %597 = vmatmul.mubr.f32.vlgmr.msra.gmra.mxu0 %v3393_v1  ;;  %2851 = vmatpush3.msra.mxu1 %v824_v5  ;;  %v829_v47 = vld [vmem:[#allocation2 + $0x3a0] sm:$0xff]  ;;  %v725_v50 = vld [vmem:[#allocation2 + $0x298] sm:$0xff]  ;;  %v724_v54 = vld [vmem:[#allocation2 + $0x290] sm:$0xff] }
  0x60   : > { %2816 = vmatpush3.msra.mxu0 %v721_v4  ;;  %2852 = vmatprep.subr.mxu1 %v839_v7  ;;  %v710_v48 = vld [vmem:[#allocation2 + $0x220] sm:$0xff]  ;;  %v828_v51 = vld [vmem:[#allocation2 + $0x398] sm:$0xff]  ;;  %v827_v55 = vld [vmem:[#allocation2 + $0x390] sm:$0xff] }
  0x61   : > { %2817 = vmatprep.subr.mxu0 %v736_v6  ;;  %2853 = vmatpush3.msra.mxu1 %v823_v9  ;;  %v813_v49 = vld [vmem:[#allocation2 + $0x320] sm:$0xff]  ;;  %v709_v52 = vld [vmem:[#allocation2 + $0x218] sm:$0xff]  ;;  %v708_v56 = vld [vmem:[#allocation2 + $0x210] sm:$0xff] }
  0x62   : > { %2818 = vmatpush3.msra.mxu0 %v720_v8  ;;  %2854 = vmatprep.subr.mxu1 %v838_v11  ;;  %v812_v53 = vld [vmem:[#allocation2 + $0x318] sm:$0xff]  ;;  %v811_v57 = vld [vmem:[#allocation2 + $0x310] sm:$0xff]  ;;  %v723_v58 = vld [vmem:[#allocation2 + $0x288] sm:$0xff]  ;;  %v3205_v11 = vmov 0  }
  0x63   : > { %2819 = vmatprep.subr.mxu0 %v735_v10  ;;  %2855 = vmatpush3.msra.mxu1 %v822_v13  ;;  %v826_v59 = vld [vmem:[#allocation2 + $0x388] sm:$0xff]  ;;  %v722_v62 = vld [vmem:[#allocation2 + $0x280] sm:$0xff]  ;;  %vm2606_vm3 = vmpackc.low %vm999_vm2, %vm999_vm2 }
  0x64   : > { %2820 = vmatpush3.msra.mxu0 %v719_v12  ;;  %2856 = vmatprep.subr.mxu1 %v837_v15  ;;  %v707_v60 = vld [vmem:[#allocation2 + $0x208] sm:$0xff]  ;;  %v825_v63 = vld [vmem:[#allocation2 + $0x380] sm:$0xff]  ;;  %vm3476_vm13 = vmneg %vm943_vm12 }
  0x65   : > { %2821 = vmatprep.subr.mxu0 %v734_v14  ;;  %2857 = vmatpush3.msra.mxu1 %v821_v17  ;;  %v810_v61 = vld [vmem:[#allocation2 + $0x308] sm:$0xff]  ;;  %v706_v2 = vld [vmem:[#allocation2 + $0x200] sm:$0xff]  ;;  %vm2623_vm15 = vmpackc.low %vm3476_vm13, %vm3476_vm13 }
  0x66   : > { %2822 = vmatpush3.msra.mxu0 %v718_v16  ;;  %2858 = vmatprep.subr.mxu1 %v836_v19  ;;  %v809_v3 = vld [vmem:[#allocation2 + $0x300] sm:$0xff] }
  0x67   : > { %2823 = vmatprep.subr.mxu0 %v733_v18  ;;  %2859 = vmatpush3.msra.mxu1 %v820_v21 }
  0x68   : > { %2824 = vmatpush3.msra.mxu0 %v717_v20  ;;  %2860 = vmatprep.subr.mxu1 %v835_v23  ;;  %v3425_v20 = vld [vmem:[%s3930_s3] sm:$0xff] }
  0x69   : > { %2825 = vmatprep.subr.mxu0 %v732_v22  ;;  %2861 = vmatpush3.msra.mxu1 %v819_v25  ;;  %v2605_v21 = vcombine.high %v3425_v20, %v3425_v20  ;;  %v459_v22 = vlaneseq }
  0x6a   : > { %2826 = vmatpush3.msra.mxu0 %v716_v24  ;;  %2862 = vmatprep.subr.mxu1 %v834_v27 }
  0x6b   : > { %2827 = vmatprep.subr.mxu0 %v731_v26  ;;  %2863 = vmatpush3.msra.mxu1 %v818_v29  ;;  %v3431_v23 = vand.u32 127, %v459_v22 }
  0x6c   : > { %2828 = vmatpush3.msra.mxu0 %v715_v28  ;;  %2864 = vmatprep.subr.mxu1 %v833_v31 }
  0x6d   : > { %2829 = vmatprep.subr.mxu0 %v730_v30  ;;  %2865 = vmatpush3.msra.mxu1 %v817_v33  ;;  %v3434_v25 = vand.u32 7, %v3431_v23 }
  0x6e   : > { %2830 = vmatpush3.msra.mxu0 %v714_v32  ;;  %2866 = vmatprep.subr.mxu1 %v832_v35 }
  0x6f   : > { %2831 = vmatprep.subr.mxu0 %v729_v34  ;;  %2867 = vmatpush3.msra.mxu1 %v816_v37  ;;  %vm932_vm5 = vcmp.ge.s32.totalorder %v3434_v25, 1  ;;  %vm955_vm8 = vcmp.lt.s32.totalorder %v3434_v25, 7 }
  0x70   : > { %2832 = vmatpush3.msra.mxu0 %v713_v36  ;;  %2868 = vmatprep.subr.mxu1 %v831_v39  ;;  %vm3445_vm7 = vmpackc.low %vm932_vm5, %vm932_vm5 }
  0x71   : > { %2833 = vmatprep.subr.mxu0 %v728_v38  ;;  %2869 = vmatpush3.msra.mxu1 %v815_v41  ;;  %vm3458_vm9 = vmpackc.low %vm955_vm8, %vm955_vm8 }
  0x72   : > { %2834 = vmatpush3.msra.mxu0 %v712_v40  ;;  %2870 = vmatprep.subr.mxu1 %v830_v43 }
  0x73   : > { %2835 = vmatprep.subr.mxu0 %v727_v42  ;;  %2871 = vmatpush3.msra.mxu1 %v814_v45 }
  0x74   : > { %2836 = vmatpush3.msra.mxu0 %v711_v44  ;;  %2872 = vmatprep.subr.mxu1 %v829_v47 }
  0x75   : > { %2837 = vmatprep.subr.mxu0 %v726_v46  ;;  %2873 = vmatpush3.msra.mxu1 %v813_v49 }
  0x76   : > { %2838 = vmatpush3.msra.mxu0 %v710_v48  ;;  %2874 = vmatprep.subr.mxu1 %v828_v51 }
  0x77   : > { %2839 = vmatprep.subr.mxu0 %v725_v50  ;;  %2875 = vmatpush3.msra.mxu1 %v812_v53 }
  0x78   : > { %2840 = vmatpush3.msra.mxu0 %v709_v52  ;;  %2876 = vmatprep.subr.mxu1 %v827_v55 }
  0x79   : > { %2841 = vmatprep.subr.mxu0 %v724_v54  ;;  %2877 = vmatpush3.msra.mxu1 %v811_v57 }
  0x7a   : > { %2842 = vmatpush3.msra.mxu0 %v708_v56  ;;  %2878 = vmatprep.subr.mxu1 %v826_v59 }
  0x7b   : > { %2843 = vmatprep.subr.mxu0 %v723_v58  ;;  %2879 = vmatpush3.msra.mxu1 %v810_v61 }
  0x7c   : > { %2844 = vmatpush3.msra.mxu0 %v707_v60  ;;  %2880 = vmatprep.subr.mxu1 %v825_v63 }
  0x7d   : > { %2845 = vmatprep.subr.mxu0 %v722_v62  ;;  %802 = vmatprep.mubr.f32.mxu0 %v3390_v0 }
  0x7e   : > { %2846 = vmatpush3.msra.mxu0 %v706_v2  ;;  %2881 = vmatpush3.msra.mxu1 %v809_v3 }
  0x7f   : > { %905 = vmatprep.mubr.f32.mxu1 %v3390_v0  ;;  %803 = vmatmul.mubr.f32.vlgmr.msra.gmra.mxu0 %v3393_v1 }
  0x80   : > { %906 = vmatmul.mubr.f32.vlgmr.msra.gmra.mxu1 %v3393_v1  ;;  %1032 = vmatprep.subr.bf16.mxu0 %v3205_v11 }
  0x81   : > { %3051 = vset.pattern.permute.xlu1 %v3205_v11  ;;  %3050 = vset.pattern.permute.xlu0 %v3205_v11 }
  0x82   : > { %2632 = vmatprep.mubr.msk.bf16.mxu0 %vm1028_vm1, %v2605_v21 }
 0x11d   : > { %v2812_v4 = vpop.f32.mrf.mxu1 }
 0x11f   : > { %v2777_v5 = vpop.f32.mrf.mxu0  ;;  %v2813_v6 = vpop.f32.mrf.mxu1 }
 0x120   : > { %v2814_v8 = vadd.f32 %v2813_v6, %v2812_v4 }
 0x121   : > { %v2778_v7 = vpop.f32.mrf.mxu0 }
 0x122   : > { %v912_v0 = vrot.slane %v2814_v8, 4  ;;  %v2779_v14 = vadd.f32 %v2778_v7, %v2777_v5 }
 0x124   : > { %v3407_v17 = vsel %vm3940_vm0, %v2779_v14, %v912_v0 }
 0x13f   : > { %v2847_v9 = vpop.f32.mrf.mxu0 }
 0x140   : > { %v2882_v10 = vpop.f32.mrf.mxu1 }
 0x141   : > { %v2848_v12 = vpop.f32.mrf.mxu0 }
 0x142   : > { %v2883_v13 = vpop.f32.mrf.mxu1  ;;  %v2849_v1 = vadd.f32 %v2848_v12, %v2847_v9  ;;  %v2604_v12 = vcombine.low %v3425_v20, %v3425_v20 }
 0x143   : > { %v2884_v15 = vadd.f32 %v2883_v13, %v2882_v10  ;;  %v3214_v13 = vmov 0.0  }
 0x144   : > { %2901 = vmatprep.subr.bf16.mxu1 %v3214_v13 }
 0x145   : > { %v915_v16 = vrot.slane %v2884_v15, 4 }
 0x147   : > { %v3410_v18 = vsel %vm3940_vm0, %v2849_v1, %v915_v16 }
 0x148   : > { %v3020_v19 = vpack.i.bf16 %v3410_v18, %v3407_v17  ;;  %v1017_v47 = vpack.c.bf16 %v3410_v18, %v3407_v17 }
 0x14a   : > { %3021 = vrot.lane.b32.xlu1 %v3020_v19, %s3206_s14  ;;  %3011 = vrot.lane.b32.xlu0 %v3020_v19, %s3207_s15 }
 0x14e   : > { %3026 = vrot.lane.b32.xlu1 %v3020_v19, %s3208_s16  ;;  %3016 = vrot.lane.b32.xlu0 %v3020_v19, %s3209_s17 }
 0x152   : > { %3036 = vrot.lane.b32.xlu1 %v3020_v19, %s3210_s18  ;;  %3031 = vrot.lane.b32.xlu0 %v3020_v19, %s3211_s19 }
 0x156   : > { %3046 = vrot.lane.b32.xlu1 %v3020_v19, %s3212_s20  ;;  %3041 = vrot.lane.b32.xlu0 %v3020_v19, %s3213_s22 }
 0x1bc   : > { %v3012_v24 = vpop.permute.xlu0 %3011  ;;  %v3022_v28 = vpop.permute.xlu1 %3021 }
 0x1bd   : > { %v3014_v26 = vunpack.i.h.bf16 %v3012_v24  ;;  %v3013_v27 = vunpack.i.l.bf16 %v3012_v24  ;;  %v3024_v31 = vunpack.i.h.bf16 %v3022_v28  ;;  %v3023_v32 = vunpack.i.l.bf16 %v3022_v28 }
 0x1bf   : > { %v2607_v29 = vpack.c.bf16 %v3014_v26, %v3013_v27  ;;  %v979_v39 = vsel %vm977_vm6, %v3024_v31, 0.0  ;;  %v978_v40 = vsel %vm977_vm6, %v3023_v32, 0.0 }
 0x1c0   : > { %v3017_v30 = vpop.permute.xlu0 %3016  ;;  %v3027_v41 = vpop.permute.xlu1 %3026  ;;  %v2613_v43 = vpack.c.bf16 %v979_v39, %v978_v40 }
 0x1c1   : > { %v3019_v33 = vunpack.i.h.bf16 %v3017_v30  ;;  %v3018_v34 = vunpack.i.l.bf16 %v3017_v30  ;;  %2608 = vmatpush1.bf16.msk.msra.mxu0 %vm2606_vm3, %v2607_v29  ;;  %v3029_v44 = vunpack.i.h.bf16 %v3027_v41  ;;  %v3028_v45 = vunpack.i.l.bf16 %v3027_v41 }
 0x1c2   : > { %1034 = vmatprep.subr.bf16.mxu0 %v3205_v11  ;;  %vm3943_vm3 = vcmask 449536  }
 0x1c3   : > { %v990_v35 = vsel %vm988_vm4, %v3019_v33, 0.0  ;;  %v989_v36 = vsel %vm988_vm4, %v3018_v34, 0.0  ;;  %v968_v48 = vsel %vm966_vm10, 0.0, %v3029_v44  ;;  %v967_v49 = vsel %vm966_vm10, 0.0, %v3028_v45 }
 0x1c4   : > { %v2610_v38 = vpack.c.bf16 %v990_v35, %v989_v36  ;;  %v3032_v46 = vpop.permute.xlu0 %3031  ;;  %v2616_v52 = vpack.c.bf16 %v968_v48, %v967_v49  ;;  %v3037_v53 = vpop.permute.xlu1 %3036 }
 0x1c5   : > { %v3034_v50 = vunpack.i.h.bf16 %v3032_v46  ;;  %v3033_v51 = vunpack.i.l.bf16 %v3032_v46  ;;  %v3039_v57 = vunpack.i.h.bf16 %v3037_v53  ;;  %v3038_v58 = vunpack.i.l.bf16 %v3037_v53 }
 0x1c6   : > { %2611 = vmatpush1.bf16.msk.msra.mxu0 %vm3445_vm7, %v2610_v38 }
 0x1c7   : > { %1036 = vmatprep.subr.bf16.mxu0 %v3205_v11  ;;  %v954_v54 = vsel %vm952_vm11, 0.0, %v3034_v50  ;;  %v953_v55 = vsel %vm952_vm11, 0.0, %v3033_v51  ;;  %v2624_v2 = vpack.c.bf16 %v3039_v57, %v3038_v58 }
 0x1c8   : > { %v3042_v56 = vpop.permute.xlu0 %3041  ;;  %v2619_v59 = vpack.c.bf16 %v954_v54, %v953_v55  ;;  %v3047_v63 = vpop.permute.xlu1 %3046 }
 0x1c9   : > { %v3044_v61 = vunpack.i.h.bf16 %v3042_v56  ;;  %v3043_v62 = vunpack.i.l.bf16 %v3042_v56  ;;  %v3049_v3 = vunpack.i.h.bf16 %v3047_v63  ;;  %v3048_v4 = vunpack.i.l.bf16 %v3047_v63 }
 0x1ca   : > { %2614 = vmatpush1.bf16.msk.msra.mxu0 %vm3458_vm9, %v2613_v43  ;;  %v3094_v43 = vld [vmem:[%s3931_s4] sm:$0xff]  }
 0x1cb   : > { %1038 = vmatprep.subr.bf16.mxu0 %v3205_v11  ;;  %v931_v5 = vsel %vm929_vm14, 0.0, %v3044_v61  ;;  %v930_v6 = vsel %vm929_vm14, 0.0, %v3043_v62  ;;  %v1010_v8 = vsel %vm3943_vm3, %v3049_v3, 0.0  ;;  %v1009_v9 = vsel %vm3943_vm3, %v3048_v4, 0.0 }
 0x1cc   : > { %v2627_v7 = vpack.c.bf16 %v931_v5, %v930_v6  ;;  %v2630_v10 = vpack.c.bf16 %v1010_v8, %v1009_v9 }
 0x1ce   : > { %1039 = vmatpush1.bf16.msra.mxu0 %v1017_v47 }
 0x1cf   : > { %1040 = vmatprep.subr.bf16.mxu0 %v3205_v11 }
 0x1d2   : > { %2617 = vmatpush1.bf16.msk.msra.mxu0 %vm3445_vm7, %v2616_v52 }
 0x1d3   : > { %1042 = vmatprep.subr.bf16.mxu0 %v3205_v11 }
 0x1d6   : > { %2620 = vmatpush1.bf16.msk.msra.mxu0 %vm3458_vm9, %v2619_v59 }
 0x1d7   : > { %1044 = vmatprep.subr.bf16.mxu0 %v3205_v11 }
 0x1da   : > { %2625 = vmatpush1.bf16.msk.msra.mxu0 %vm2623_vm15, %v2624_v2  ;;  %vm3941_vm15 = vmmov 1  }
 0x1db   : > { %1046 = vmatprep.subr.bf16.mxu0 %v3205_v11 }
 0x1de   : > { %2628 = vmatpush1.bf16.msk.msra.mxu0 %vm3445_vm7, %v2627_v7  ;;  %vm3215_vm7 = vmmov 0  }
 0x1df   : > { %1062 = vmatprep.subr.bf16.mxu0 %v3205_v11  ;;  %2911 = vmatprep.mubr.msk.bf16.mxu1 %vm3215_vm7, %v3214_v13 }
 0x1e2   : > { %2631 = vmatpush2.bf16.msk.msra.mxu0 %vm3458_vm9, %v2630_v10  ;;  %vm2634_vm9 = vmpackc.low %vm999_vm2, %vm932_vm5 }
 0x1e3   : > { %2915 = vmatprep.subr.mxu0 %v3214_v13 }
 0x1e5   : > { %1065 = vmatmul.mubr.bf16.vlgmr.msra.gmra.mxu0 %v2604_v12 }
 0x1e6   : > { %2919 = vmatprep.mubr.msk.f32.mxu0 %vm3215_vm7, %v3214_v13 }
 0x2a5   : > { %v1066_v0 = vpop.f32.mrf.mxu0 }
 0x2a6   : > { %v1072_v14 = vmax.f32 %v1066_v0, 0.0  ;;  %v1181_v0 = vld [vmem:[%s3932_s5] sm:$0xf] }
 0x2a7   : > { %v1068_v15 = vpop.f32.mrf.mxu0 }
 0x2a8   : > { %1100 = vrot.lane.b32.xlu1 %v1072_v14, %s3209_s17  ;;  %1109 = vrot.lane.b32.xlu0 %v1072_v14, %s3212_s20 }
 0x2a9   : > { %v1069_v1 = vpop.f32.mrf.mxu0 }
 0x2ab   : > { %v1070_v16 = vpop.f32.mrf.mxu0 }
 0x2ac   : > { %1095 = vrot.lane.b32.xlu1 %v1072_v14, %s3206_s14  ;;  %1105 = vrot.lane.b32.xlu0 %v1072_v14, %s3207_s15 }
 0x2b0   : > { %1090 = vrot.lane.b32.xlu1 %v1072_v14, %s3208_s16  ;;  %1085 = vrot.lane.b32.xlu0 %v1072_v14, %s3211_s19 }
 0x2b4   : > { %1081 = vrot.lane.b32.xlu1 %v1072_v14, %s3210_s18  ;;  %1076 = vrot.lane.b32.xlu0 %v1072_v14, %s3213_s22 }
 0x31a   : > { %v1101_v19 = vpop.permute.xlu1 %1100  ;;  %v1110_v20 = vpop.permute.xlu0 %1109 }
 0x31b   : > { %v1112_v21 = vsel %vm3943_vm3, %v1110_v20, 0.0  ;;  %v1103_v30 = vsel %vm988_vm4, %v1101_v19, 0.0  ;;  %vm1172_vm3 = vcmask 523264  }
 0x31c   : > { %v1113_v24 = vsel %vm955_vm8, %v1112_v21, 0.0 }
 0x31d   : > { %v1118_v26 = vpack.c.bf16 %v1113_v24, %v1113_v24 }
 0x31e   : > { %v1096_v27 = vpop.permute.xlu1 %1095  ;;  %v1106_v28 = vpop.permute.xlu0 %1105 }
 0x31f   : > { %v1129_v29 = vsel %vm3940_vm0, %v1118_v26, 0  ;;  %v2635_v31 = vpack.c.bf16 %v1106_v28, %v1103_v30  ;;  %v1098_v33 = vsel %vm977_vm6, %v1096_v27, 0.0  ;;  %vm2637_vm0 = vmpackc.low %vm955_vm8, %vm3941_vm15 }
 0x320   : > { %2902 = vmatpush3.bf16.msra.mxu1 %v1129_v29  ;;  %v2638_v35 = vpack.c.bf16 %v1098_v33, %v1072_v14  ;;  %vm2644_vm15 = vmpackc.low %vm3476_vm13, %vm932_vm5  ;;  %vm1372_vm13 = vcmask 1040384  }
 0x321   : > { %2903 = vmatprep.subr.bf16.mxu1 %v3214_v13 }
 0x322   : > { %v1086_v32 = vpop.permute.xlu0 %1085  ;;  %v1091_v34 = vpop.permute.xlu1 %1090 }
 0x323   : > { %v1093_v36 = vsel %vm966_vm10, 0.0, %v1091_v34  ;;  %v1088_v37 = vsel %vm952_vm11, 0.0, %v1086_v32 }
 0x324   : > { %2904 = vmatpush3.bf16.msk.msra.mxu1 %vm2634_vm9, %v2635_v31  ;;  %vm2640_vm9 = vmpackc.low %vm932_vm5, %vm955_vm8  ;;  %v2641_v39 = vpack.c.bf16 %v1093_v36, %v1088_v37 }
 0x325   : > { %2905 = vmatprep.subr.bf16.mxu1 %v3214_v13 }
 0x326   : > { %v1077_v38 = vpop.permute.xlu0 %1076  ;;  %v1082_v40 = vpop.permute.xlu1 %1081 }
 0x327   : > { %v1079_v41 = vsel %vm929_vm14, 0.0, %v1077_v38 }
 0x328   : > { %2906 = vmatpush3.bf16.msk.msra.mxu1 %vm2637_vm0, %v2638_v35  ;;  %v2645_v42 = vpack.c.bf16 %v1082_v40, %v1079_v41  ;;  %vm3947_vm0 = vcmask 588800  }
 0x329   : > { %2907 = vmatprep.subr.bf16.mxu1 %v3214_v13 }
 0x32c   : > { %2908 = vmatpush3.bf16.msk.msra.mxu1 %vm2640_vm9, %v2641_v39  ;;  %vm1378_vm9 = vcmask 146432  }
 0x32d   : > { %2909 = vmatprep.subr.bf16.mxu1 %v3214_v13 }
 0x330   : > { %2910 = vmatpush3.bf16.msk.msra.mxu1 %vm2644_vm15, %v2645_v42  ;;  %vm3948_vm15 = vcmask 138240  }
 0x333   : > { %2912 = vmatmul.mubr.msk.bf16.vlgmr.msra.gmra.mxu1 %vm3947_vm0, %v3094_v43  ;;  %vm1447_vm0 = vcmask 113664  }
 0x3f3   : > { %v3543_v44 = vpop.f32.mrf.mxu1 }
 0x3f4   : > { %v1173_v45 = vsel %vm1172_vm3, %v3543_v44, 0.0  ;;  %v1355_v48 = vsel %vm1172_vm3, %v3543_v44, -inf }
 0x3f5   : > { %1174 = vadd.xlane.f32.xlu1 %v1173_v45  ;;  %v2913_v46 = vpop.f32.mrf.mxu1 }
 0x3f7   : > { %v3547_v47 = vpop.f32.mrf.mxu1 }
 0x3f8   : > { %v1356_v49 = vsel %vm1172_vm3, %v3547_v47, -inf  ;;  %v1176_v50 = vsel %vm1172_vm3, %v3547_v47, 0.0 }
 0x3f9   : > { %v1357_v51 = vmax.f32 %v1355_v48, %v1356_v49  ;;  %1177 = vadd.xlane.f32.xlu0 %v1176_v50  ;;  %v1364_v52 = vadd.f32 %v1176_v50, %v1173_v45  ;;  %v2914_v53 = vpop.f32.mrf.mxu1 }
 0x3fb   : > { %v1358_v54 = vrot.slane %v1357_v51, 4  ;;  %v1365_v55 = vrot.slane %v1364_v52, 4 }
 0x3fd   : > { %v1359_v56 = vmax.f32 %v1357_v51, %v1358_v54  ;;  %v1366_v57 = vadd.f32 %v1365_v55, %v1364_v52 }
 0x3ff   : > { %v1360_v58 = vrot.slane %v1359_v56, 2  ;;  %v1367_v59 = vrot.slane %v1366_v57, 2 }
 0x401   : > { %v1361_v60 = vmax.f32 %v1359_v56, %v1360_v58  ;;  %v1368_v61 = vadd.f32 %v1367_v59, %v1366_v57 }
 0x403   : > { %v1362_v62 = vrot.slane %v1361_v60, 1  ;;  %v1369_v63 = vrot.slane %v1368_v61, 1 }
 0x405   : > { %v1370_v2 = vadd.f32 %v1369_v63, %v1368_v61  ;;  %v1363_v3 = vmax.f32 %v1361_v60, %v1362_v62 }
 0x407   : > { %v1371_v4 = vmul.f32 0.0625, %v1370_v2 }
 0x409   : > { %v3555_v5 = vsel %vm1372_vm13, %v1363_v3, %v1371_v4  ;;  %vm1380_vm13 = vcmp.ge.s32.totalorder %v3434_v25, 2 }
 0x40a   : > { %1395 = vrot.lane.b32.xlu1 %v3555_v5, %s3945_s27  ;;  %s3609_s27 = sld [smem:[#allocation7 + $0x2]] }
 0x40e   : > { %1427 = vrot.lane.b32.xlu1 %v3555_v5, %s3218_s28 }
 0x40f   : > { %1375 = vrot.lane.b32.xlu0 %v3555_v5, %s3219_s23  ;;  %s3224_s23 = smov 126  }
 0x410   : > { %v1417_v37 = vstv %s3609_s27  ;;  %s3641_s27 = sld [smem:[#allocation7 + $0x5]] }
 0x412   : > { %1464 = vrot.lane.b32.xlu1 %v3555_v5, %s3220_s26  ;;  %s3225_s26 = smov 2  }
 0x413   : > { %1412 = vrot.lane.b32.xlu0 %v3555_v5, %s3946_s29  ;;  %s3614_s29 = sld [smem:[#allocation7 + $0x1c]] }
 0x416   : > { %1497 = vrot.lane.b32.xlu1 %v3555_v5, %s3210_s18  ;;  %s3227_s18 = smov 114  }
 0x417   : > { %1444 = vrot.lane.b32.xlu0 %v3555_v5, %s3222_s30  ;;  %s3232_s30 = smov 111  }
 0x419   : > { %v1438_v42 = vstv %s3614_s29  ;;  %s3646_s29 = sld [smem:[#allocation7 + $0x1f]] }
 0x41a   : > { %1528 = vrot.lane.b32.xlu1 %v3555_v5, %s3223_s25  ;;  %s3226_s25 = smov 122  }
 0x41b   : > { %1481 = vrot.lane.b32.xlu0 %v3555_v5, %s3213_s22  ;;  %s3230_s22 = smov 110  }
 0x41e   : > { %1562 = vrot.lane.b32.xlu1 %v3555_v5, %s3208_s16 }
 0x41f   : > { %1512 = vrot.lane.b32.xlu0 %v3555_v5, %s3211_s19  ;;  %s3228_s19 = smov 112  }
 0x422   : > { %1605 = vrot.lane.b32.xlu1 %v3555_v5, %s3224_s23  ;;  %s3595_s23 = sld [smem:[#allocation7 + $0x1a]] }
 0x423   : > { %1545 = vrot.lane.b32.xlu0 %v3555_v5, %s3225_s26  ;;  %s3597_s26 = sld [smem:[#allocation7]] }
 0x426   : > { %1639 = vrot.lane.b32.xlu1 %v3555_v5, %s3209_s17  ;;  %s3229_s17 = smov 118  }
 0x427   : > { %1589 = vrot.lane.b32.xlu0 %v3555_v5, %s3206_s14 }
 0x428   : > { %v1406_v16 = vstv %s3595_s23  ;;  %s3628_s23 = sld [smem:[#allocation7 + $0x1d]] }
 0x429   : > { %v1385_v20 = vstv %s3597_s26  ;;  %s3632_s26 = sld [smem:[#allocation7 + $0x4]] }
 0x42a   : > { %1670 = vrot.lane.b32.xlu1 %v3555_v5, %s3212_s20  ;;  %s3231_s20 = smov 113  }
 0x42b   : > { %1622 = vrot.lane.b32.xlu0 %v3555_v5, %s3226_s25  ;;  %s3599_s25 = sld [smem:[#allocation7 + $0x1]] }
 0x42e   : > { %1703 = vrot.lane.b32.xlu1 %v3555_v5, %s3227_s18  ;;  %s3601_s18 = sld [smem:[#allocation7 + $0x1b]]  ;;  %v1458_v54 = vstv %s3628_s23 }
 0x42f   : > { %1655 = vrot.lane.b32.xlu0 %v3555_v5, %s3207_s15  ;;  %s2654_s15 = sld [smem:[#allocation7 + $0x19]]  ;;  %v1454_v59 = vstv %s3632_s26 }
 0x430   : > { %s3666_s23 = sld [smem:[#allocation7 + $0x8]] }
 0x431   : > { %v1402_v26 = vstv %s3599_s25  ;;  %s3637_s25 = sld [smem:[#allocation7 + $0x1e]] }
 0x432   : > { %1737 = vrot.lane.b32.xlu1 %v3555_v5, %s3228_s19  ;;  %s3670_s26 = sld [smem:[#allocation7 + $0x22]] }
 0x433   : > { %1686 = vrot.lane.b32.xlu0 %v3555_v5, %s3229_s17  ;;  %s3654_s17 = sld [smem:[#allocation7 + $0x20]] }
 0x434   : > { %v1421_v32 = vstv %s3601_s18  ;;  %s3649_s18 = sld [smem:[#allocation7 + $0x6]] }
 0x435   : > { %v1389_v14 = vstv %s2654_s15  ;;  %s3624_s15 = sld [smem:[#allocation7 + $0x3]] }
 0x436   : > { %1770 = vrot.lane.b32.xlu1 %v3555_v5, %s3230_s22  ;;  %s3658_s22 = sld [smem:[#allocation7 + $0x7]] }
 0x437   : > { %1720 = vrot.lane.b32.xlu0 %v3555_v5, %s3231_s20  ;;  %v1475_v2 = vstv %s3637_s25  ;;  %s3674_s25 = sld [smem:[#allocation7 + $0x9]] }
 0x43b   : > { %1753 = vrot.lane.b32.xlu0 %v3555_v5, %s3232_s30  ;;  %v1434_v49 = vstv %s3624_s15  ;;  %s3663_s15 = sld [smem:[#allocation7 + $0x21]] }
 0x47e   : > { %v1175_v6 = vpop.xlane.xlu1 %1174 }
 0x47f   : > { %v1179_v10 = vmul.f32 0.015625, %v1175_v6 }
 0x482   : > { %v1178_v7 = vpop.xlane.xlu0 %1177  ;;  %v1396_v8 = vpop.permute.xlu1 %1395 }
 0x483   : > { %v1180_v9 = vmul.f32 0.015625, %v1178_v7  ;;  %v1399_v12 = vsel %vm3948_vm15, 0.0, %v1396_v8  ;;  %vm1449_vm15 = vcmp.lt.s32.totalorder %v3434_v25, 6  ;;  %v1471_v8 = vstv %s3641_s27  ;;  %s3679_s27 = sld [smem:[#allocation7 + $0x23]] }
 0x484   : > { %v1400_v19 = vsel %vm932_vm5, %v1399_v12, 0.0 }
 0x485   : > { %2916 = vmatpush3.msra.mxu0 %v1180_v9  ;;  %v1407_v29 = vmul.f32 %v1406_v16, %v1400_v19  ;;  %v1403_v34 = vmul.f32 %v1402_v26, %v1400_v19  ;;  %v1487_v19 = vstv %s3649_s18  ;;  %s2676_s18 = sld [smem:[#allocation7 + $0x24]] }
 0x486   : > { %2917 = vmatprep.subr.mxu0 %v3214_v13  ;;  %v1376_v15 = vpop.permute.xlu0 %1375  ;;  %v1428_v27 = vpop.permute.xlu1 %1427 }
 0x487   : > { %v1379_v1 = vsel %vm1378_vm9, 0.0, %v1376_v15  ;;  %2918 = vmatpush3.msra.mxu0 %v1179_v10  ;;  %vm3949_vm9 = vcmask 121856   ;;  %v1409_v39 = vrot.slane %v1407_v29, 1 }
 0x488   : > { %v1383_v21 = vsel %vm1380_vm13, %v1379_v1, 0.0  ;;  %2920 = vmatmul.mubr.msk.f32.vlgmr.msra.gmra.mxu0 %vm1028_vm1, %v1181_v0  ;;  %2933 = vmatprep.subr.bf16.mxu0 %v3214_v13  ;;  %v1431_v35 = vsel %vm3949_vm9, 0.0, %v1428_v27  ;;  %vm1467_vm9 = vcmask 80896   ;;  %v1506_v27 = vstv %s3654_s17  ;;  %s2675_s17 = sld [smem:[#allocation7 + $0xb]] }
 0x489   : > { %v1390_v24 = vmul.f32 %v1389_v14, %v1383_v21  ;;  %2935 = vmatprep.mubr.msk.bf16.mxu0 %vm3215_vm7, %v3214_v13  ;;  %v1386_v30 = vmul.f32 %v1385_v20, %v1383_v21  ;;  %v1432_v43 = vsel %vm955_vm8, %v1431_v35, 0.0  ;;  %v1491_v14 = vstv %s3646_s29  ;;  %s3682_s29 = sld [smem:[#allocation7 + $0xa]] }
 0x48a   : > { %v1413_v28 = vpop.permute.xlu0 %1412  ;;  %v1465_v50 = vpop.permute.xlu1 %1464  ;;  %v1439_v51 = vmul.f32 %v1438_v42, %v1432_v43  ;;  %v1435_v56 = vmul.f32 %v1434_v49, %v1432_v43  ;;  %v1518_v42 = vstv %s3666_s23  ;;  %v1539_v49 = vstv %s3670_s26  ;;  %s3699_s23 = sld [smem:[#allocation7 + $0x26]] }
 0x48b   : > { %v1392_v31 = vrot.slane %v1390_v24, 1  ;;  %v1415_v33 = vsel %vm1028_vm1, 0.0, %v1413_v28  ;;  %v1468_v57 = vsel %vm1467_vm9, 0.0, %v1465_v50  ;;  %s3701_s26 = sld [smem:[#allocation7 + $0xd]]  ;;  %vm1689_vm9 = vcmask 441344  }
 0x48c   : > { %v1422_v41 = vmul.f32 %v1421_v32, %v1415_v33  ;;  %v1418_v46 = vmul.f32 %v1417_v37, %v1415_v33  ;;  %v1441_v61 = vrot.slane %v1439_v51, 1  ;;  %v1469_v3 = vsel %vm1380_vm13, %v1468_v57, 0.0 }
 0x48d   : > { %v1394_v36 = vadd.f32 %v1392_v31, %v1386_v30  ;;  %v1476_v9 = vmul.f32 %v1475_v2, %v1469_v3  ;;  %v1472_v1 = vmul.f32 %v1471_v8, %v1469_v3  ;;  %v1502_v32 = vstv %s3658_s22  ;;  %s3691_s22 = sld [smem:[#allocation7 + $0x25]] }
 0x48e   : > { %v1445_v38 = vpop.permute.xlu0 %1444  ;;  %v1424_v53 = vrot.slane %v1422_v41, 1  ;;  %v1498_v0 = vpop.permute.xlu1 %1497  ;;  %v1522_v37 = vstv %s3663_s15  ;;  %s3695_s15 = sld [smem:[#allocation7 + $0xc]] }
 0x48f   : > { %v1404_v40 = vadd.f32 %v1403_v34, %v1394_v36  ;;  %v1448_v48 = vsel %vm1447_vm0, 0.0, %v1445_v38  ;;  %v1478_v21 = vrot.slane %v1476_v9, 1  ;;  %v1500_v28 = vsel %vm943_vm12, 0.0, %v1498_v0 }
 0x490   : > { %v1452_v55 = vsel %vm1449_vm15, %v1448_v48, 0.0  ;;  %v1507_v34 = vmul.f32 %v1506_v27, %v1500_v28  ;;  %v1552_v2 = vstv %s3682_s29  ;;  %vm1608_vm0 = vcmask 506880   ;;  %s3714_s29 = sld [smem:[#allocation7 + $0x28]] }
 0x491   : > { %v1411_v45 = vadd.f32 %v1409_v39, %v1404_v40  ;;  %v1459_v63 = vmul.f32 %v1458_v54, %v1452_v55  ;;  %v1455_v6 = vmul.f32 %v1454_v59, %v1452_v55  ;;  %v1503_v39 = vmul.f32 %v1502_v32, %v1500_v28 }
 0x492   : > { %v1482_v60 = vpop.permute.xlu0 %1481  ;;  %v1529_v33 = vpop.permute.xlu1 %1528  ;;  %v1535_v54 = vstv %s3674_s25  ;;  %v1556_v59 = vstv %s3679_s27  ;;  %s3703_s25 = sld [smem:[#allocation7 + $0x27]] }
 0x493   : > { %v1419_v52 = vadd.f32 %v1418_v46, %v1411_v45  ;;  %v1484_v7 = vsel %vm929_vm14, 0.0, %v1482_v60  ;;  %v1461_v12 = vrot.slane %v1459_v63, 1  ;;  %vm1531_vm14 = vcmask 48128   ;;  %s3707_s27 = sld [smem:[#allocation7 + $0xe]] }
 0x494   : > { %v1485_v15 = vsel %vm932_vm5, %v1484_v7, 0.0  ;;  %v1532_v40 = vsel %vm1531_vm14, 0.0, %v1529_v33  ;;  %v1509_v45 = vrot.slane %v1507_v34, 1  ;;  %v1572_v7 = vstv %s2676_s18  ;;  %s3718_s18 = sld [smem:[#allocation7 + $0xf]] }
 0x495   : > { %v1426_v58 = vadd.f32 %v1424_v53, %v1419_v52  ;;  %v1492_v26 = vmul.f32 %v1491_v14, %v1485_v15  ;;  %v1488_v30 = vmul.f32 %v1487_v19, %v1485_v15  ;;  %v1533_v50 = vsel %vm1449_vm15, %v1532_v40, 0.0 }
 0x496   : > { %v1513_v20 = vpop.permute.xlu0 %1512  ;;  %v1563_v55 = vpop.permute.xlu1 %1562  ;;  %vm1706_vm14 = vcmask 408576  }
 0x497   : > { %v1436_v62 = vadd.f32 %v1435_v56, %v1426_v58  ;;  %v1515_v31 = vsel %vm952_vm11, 0.0, %v1513_v20  ;;  %v1494_v36 = vrot.slane %v1492_v26, 1  ;;  %vm1548_vm11 = vcmask 15360  }
 0x498   : > { %v1516_v38 = vsel %vm955_vm8, %v1515_v31, 0.0  ;;  %v1540_v56 = vmul.f32 %v1539_v49, %v1533_v50  ;;  %v1579_v26 = vstv %s3695_s15  ;;  %v1616_v40 = vstv %s3703_s25  ;;  %s3729_s15 = sld [smem:[#allocation7 + $0x2a]] }
 0x499   : > { %v1443_v4 = vadd.f32 %v1441_v61, %v1436_v62  ;;  %v1523_v48 = vmul.f32 %v1522_v37, %v1516_v38  ;;  %v1519_v52 = vmul.f32 %v1518_v42, %v1516_v38  ;;  %v1536_v61 = vmul.f32 %v1535_v54, %v1533_v50  ;;  %s3740_s25 = sld [smem:[#allocation7 + $0x12]] }
 0x49a   : > { %v1546_v43 = vpop.permute.xlu0 %1545  ;;  %v1565_v62 = vsel %vm966_vm10, 0.0, %v1563_v55  ;;  %v1542_v3 = vrot.slane %v1540_v56, 1  ;;  %v1580_v34 = vmul.f32 %v1579_v26, %v3555_v5  ;;  %v1629_v56 = vstv %s3718_s18  ;;  %s3753_s18 = sld [smem:[#allocation7 + $0x2d]]  ;;  %v1256_v26 = vld [vmem:[%s3933_s6] sm:$0xff] }
 0x49b   : > { %v1456_v10 = vadd.f32 %v1455_v6, %v1443_v4  ;;  %v1549_v53 = vsel %vm1548_vm11, 0.0, %v1546_v43  ;;  %v1525_v58 = vrot.slane %v1523_v48, 1  ;;  %v1566_v8 = vsel %vm932_vm5, %v1565_v62, 0.0 }
 0x49c   : > { %v1550_v60 = vsel %vm1380_vm13, %v1549_v53, 0.0  ;;  %v1573_v14 = vmul.f32 %v1572_v7, %v1566_v8  ;;  %vm1723_vm11 = vcmask 400384  }
 0x49d   : > { %v1463_v16 = vadd.f32 %v1461_v12, %v1456_v10  ;;  %v1557_v6 = vmul.f32 %v1556_v59, %v1550_v60  ;;  %v1553_v10 = vmul.f32 %v1552_v2, %v1550_v60  ;;  %v1568_v12 = vstv %s2675_s17  ;;  %s2686_s17 = sld [smem:[#allocation7 + $0x29]] }
 0x49e   : > { %v1590_v0 = vpop.permute.xlu0 %1589  ;;  %v1569_v19 = vmul.f32 %v1568_v12, %v1566_v8  ;;  %v1575_v27 = vrot.slane %v1573_v14, 1 }
 0x49f   : > { %v1473_v24 = vadd.f32 %v1472_v1, %v1463_v16  ;;  %v1559_v1 = vrot.slane %v1557_v6, 1  ;;  %v1583_v16 = vstv %s3691_s22  ;;  %s3724_s22 = sld [smem:[#allocation7 + $0x10]] }
 0x4a1   : > { %v1480_v29 = vadd.f32 %v1478_v21, %v1473_v24  ;;  %v1592_v21 = vsel %vm977_vm6, %v1590_v0, 0.0  ;;  %v1606_v24 = vpop.permute.xlu1 %1605  ;;  %vm1625_vm6 = vcmask 474112  }
 0x4a2   : > { %v1593_v31 = vsel %vm955_vm8, %v1592_v21, 0.0  ;;  %v1609_v32 = vsel %vm1608_vm0, %v1606_v24, 0.0  ;;  %vm1756_vm0 = vcmask 384000  }
 0x4a3   : > { %v1489_v35 = vadd.f32 %v1488_v30, %v1480_v29  ;;  %v1584_v29 = vmul.f32 %v1583_v16, %v3555_v5  ;;  %v1599_v30 = vstv %s3699_s23  ;;  %s3733_s23 = sld [smem:[#allocation7 + $0x11]]  ;;  %v1649_v60 = vstv %s2686_s17 }
 0x4a4   : > { %s2702_s17 = sld [smem:[#allocation7 + $0x31]] }
 0x4a5   : > { %v1496_v41 = vadd.f32 %v1494_v36, %v1489_v35  ;;  %v1595_v35 = vstv %s3701_s26  ;;  %v1623_v36 = vpop.permute.xlu0 %1622  ;;  %v1586_v38 = vrot.slane %v1584_v29, 1  ;;  %v1640_v5 = vpop.permute.xlu1 %1639  ;;  %s3737_s26 = sld [smem:[#allocation7 + $0x2b]] }
 0x4a6   : > { %v1596_v43 = vmul.f32 %v1595_v35, %v1593_v31  ;;  %v1642_v54 = vsel %vm988_vm4, %v1640_v5, 0.0  ;;  %vm3958_vm4 = vcmask 449536  }
 0x4a7   : > { %v1504_v46 = vadd.f32 %v1503_v39, %v1496_v41  ;;  %v1600_v39 = vmul.f32 %v1599_v30, %v1593_v31  ;;  %v1610_v41 = vsel %vm1449_vm15, %v1609_v32, 0.0  ;;  %v1676_v30 = vstv %s3740_s25  ;;  %s3773_s25 = sld [smem:[#allocation7 + $0x2f]] }
 0x4a8   : > { %v1617_v48 = vmul.f32 %v1616_v40, %v1610_v41 }
 0x4a9   : > { %v1511_v51 = vadd.f32 %v1509_v45, %v1504_v46  ;;  %v1626_v45 = vsel %vm1625_vm6, %v1623_v36, 0.0  ;;  %v1612_v46 = vstv %s3707_s27  ;;  %v1602_v50 = vrot.slane %v1600_v39, 1  ;;  %v1656_v62 = vpop.permute.xlu0 %1655  ;;  %s3744_s27 = sld [smem:[#allocation7 + $0x2c]] }
 0x4aa   : > { %v1613_v53 = vmul.f32 %v1612_v46, %v1610_v41  ;;  %v1714_v46 = vstv %s3753_s18  ;;  %s2699_s18 = sld [smem:[#allocation7 + $0x17]] }
 0x4ab   : > { %v1520_v57 = vadd.f32 %v1519_v52, %v1511_v51  ;;  %v1633_v51 = vstv %s3714_s29  ;;  %v1627_v52 = vsel %vm1380_vm13, %v1626_v45, 0.0  ;;  %s3748_s29 = sld [smem:[#allocation7 + $0x13]]  ;;  %v1680_v21 = vstv %s3737_s26 }
 0x4ac   : > { %v1634_v59 = vmul.f32 %v1633_v51, %v1627_v52  ;;  %v1630_v2 = vmul.f32 %v1629_v56, %v1627_v52  ;;  %s3768_s26 = sld [smem:[#allocation7 + $0x15]] }
 0x4ad   : > { %v1527_v63 = vadd.f32 %v1525_v58, %v1520_v57  ;;  %v1619_v57 = vrot.slane %v1617_v48, 1 }
 0x4ae   : > { %v1636_v8 = vrot.slane %v1634_v59, 1 }
 0x4af   : > { %v1537_v4 = vadd.f32 %v1536_v61, %v1527_v63  ;;  %v1643_v61 = vsel %vm932_vm5, %v1642_v54, 0.0  ;;  %v1697_v35 = vstv %s3744_s27  ;;  %s3776_s27 = sld [smem:[#allocation7 + $0x16]] }
 0x4b0   : > { %v1650_v6 = vmul.f32 %v1649_v60, %v1643_v61 }
 0x4b1   : > { %v1544_v9 = vadd.f32 %v1542_v3, %v1537_v4  ;;  %v1645_v3 = vstv %s3724_s22  ;;  %v1671_v4 = vpop.permute.xlu1 %1670  ;;  %v1693_v40 = vstv %s3748_s29  ;;  %s3781_s29 = sld [smem:[#allocation7 + $0x30]] }
 0x4b2   : > { %v1646_v12 = vmul.f32 %v1645_v3, %v1643_v61  ;;  %v1673_v0 = vsel %vm3958_vm4, %v1671_v4, 0.0  ;;  %v1652_v16 = vrot.slane %v1650_v6, 1  ;;  %v1727_v60 = vstv %s3768_s26  ;;  %s2701_s22 = sld [smem:[#allocation7 + $0x18]] }
 0x4b3   : > { %v1554_v15 = vadd.f32 %v1553_v10, %v1544_v9  ;;  %v1664_v9 = vstv %s3729_s15  ;;  %v1658_v10 = vsel %vm999_vm2, %v1656_v62, 0.0  ;;  %v1674_v24 = vsel %vm955_vm8, %v1673_v0, 0.0  ;;  %s3760_s15 = sld [smem:[#allocation7 + $0x14]] }
 0x4b4   : > { %vm1258_vm2 = vcmask 31744   ;;  %v1681_v32 = vmul.f32 %v1680_v21, %v1674_v24  ;;  %v1747_v3 = vstv %s3773_s25  ;;  %v1760_v21 = vstv %s2699_s18 }
 0x4b5   : > { %v1561_v20 = vadd.f32 %v1559_v1, %v1554_v15  ;;  %v1660_v15 = vstv %s3733_s23  ;;  %v1687_v1 = vpop.permute.xlu0 %1686  ;;  %2924 = vmatprep.mubr.msk.f32.mxu1 %vm1258_vm2, %v1256_v26  ;;  %v1704_v31 = vpop.permute.xlu1 %1703  ;;  %s3765_s23 = sld [smem:[#allocation7 + $0x2e]] }
 0x4b6   : > { %v1690_v29 = vsel %vm1689_vm9, %v1687_v1, 0.0  ;;  %vm2374_vm9 = vcmask 908288  }
 0x4b7   : > { %v1570_v28 = vadd.f32 %v1569_v19, %v1561_v20  ;;  %v1665_v20 = vmul.f32 %v1664_v9, %v1658_v10  ;;  %v1691_v36 = vsel %vm1449_vm15, %v1690_v29, 0.0  ;;  %v1743_v9 = vstv %s3776_s27 }
 0x4b8   : > { %v1698_v45 = vmul.f32 %v1697_v35, %v1691_v36 }
 0x4b9   : > { %v1577_v33 = vadd.f32 %v1575_v27, %v1570_v28  ;;  %v1661_v28 = vmul.f32 %v1660_v15, %v1658_v10  ;;  %v1721_v41 = vpop.permute.xlu0 %1720  ;;  %v1710_v51 = vstv %s3760_s15  ;;  %v1764_v15 = vstv %s3781_s29 }
 0x4ba   : > { %v1700_v54 = vrot.slane %v1698_v45, 1  ;;  %v1794_v45 = vshrl.u32 %v459_v22, 7 }
 0x4bb   : > { %v1581_v37 = vadd.f32 %v1580_v34, %v1577_v33  ;;  %v1667_v34 = vrot.slane %v1665_v20, 1  ;;  %v1731_v56 = vstv %s3765_s23 }
 0x4bc   : > { %v1795_v25 = vsub.s32 0, %v1794_v45  ;;  %v1918_v45 = vld [vmem:[#allocation5 + $0x8] sm:$0xff] }
 0x4bd   : > { %v1588_v42 = vadd.f32 %v1586_v38, %v1581_v37  ;;  %v1677_v37 = vmul.f32 %v1676_v30, %v1674_v24  ;;  %v1707_v38 = vsel %vm1706_vm14, %v1704_v31, 0.0  ;;  %v1754_v61 = vpop.permute.xlu0 %1753 }
 0x4be   : > { %v1708_v5 = vsel %vm1380_vm13, %v1707_v38, 0.0  ;;  %vm1740_vm13 = vcmask 392192  }
 0x4bf   : > { %v1597_v49 = vadd.f32 %v1596_v43, %v1588_v42  ;;  %v1683_v42 = vrot.slane %v1681_v32, 1  ;;  %v1715_v52 = vmul.f32 %v1714_v46, %v1708_v5  ;;  %v1777_v32 = vstv %s2701_s22 }
 0x4c1   : > { %v1604_v55 = vadd.f32 %v1602_v50, %v1597_v49  ;;  %v1694_v49 = vmul.f32 %v1693_v40, %v1691_v36  ;;  %v1724_v50 = vsel %vm1723_vm11, %v1721_v41, 0.0  ;;  %v1717_v62 = vrot.slane %v1715_v52, 1 }
 0x4c3   : > { %v1614_v58 = vadd.f32 %v1613_v53, %v1604_v55  ;;  %v1738_v55 = vpop.permute.xlu1 %1737 }
 0x4c4   : > { %v1741_v4 = vsel %vm1740_vm13, %v1738_v55, 0.0  ;;  %vm2365_vm13 = vcmask 916480  }
 0x4c5   : > { %v1621_v63 = vadd.f32 %v1619_v57, %v1614_v58  ;;  %v1725_v57 = vsel %vm932_vm5, %v1724_v50, 0.0  ;;  %v1711_v58 = vmul.f32 %v1710_v51, %v1708_v5  ;;  %vm1773_vm5 = vcmask 375808  }
 0x4c7   : > { %v1631_v7 = vadd.f32 %v1630_v2, %v1621_v63  ;;  %v1732_v2 = vmul.f32 %v1731_v56, %v1725_v57  ;;  %v1771_v10 = vpop.permute.xlu1 %1770 }
 0x4c9   : > { %v1638_v14 = vadd.f32 %v1636_v8, %v1631_v7  ;;  %v1728_v7 = vmul.f32 %v1727_v60, %v1725_v57  ;;  %v1757_v8 = vsel %vm1756_vm0, %v1754_v61, 0.0  ;;  %vm2343_vm0 = vcmask 1039360  }
 0x4ca   : > { %v1758_v1 = vsel %vm955_vm8, %v1757_v8, 0.0  ;;  %vm3959_vm8 = vcmask 1043456   ;;  %v1928_v8 = vld [vmem:[#allocation5 + $0x58] sm:$0xff] }
 0x4cb   : > { %v1647_v19 = vadd.f32 %v1646_v12, %v1638_v14  ;;  %v1748_v12 = vmul.f32 %v1747_v3, %v1741_v4  ;;  %v1734_v14 = vrot.slane %v1732_v2, 1  ;;  %v1761_v31 = vmul.f32 %v1760_v21, %v1758_v1  ;;  %v1932_v3 = vld [vmem:[#allocation5 + $0x78] sm:$0xff] }
 0x4cd   : > { %v1654_v27 = vadd.f32 %v1652_v16, %v1647_v19  ;;  %v1744_v16 = vmul.f32 %v1743_v9, %v1741_v4  ;;  %v1774_v19 = vsel %vm1773_vm5, %v1771_v10, 0.0  ;;  %v1750_v24 = vrot.slane %v1748_v12, 1  ;;  %v1931_v4 = vld [vmem:[#allocation5 + $0x70] sm:$0xff]  ;;  %v1926_v10 = vld [vmem:[#allocation5 + $0x48] sm:$0xff]  ;;  %v1925_v12 = vld [vmem:[#allocation5 + $0x40] sm:$0xff] }
 0x4ce   : > { %v1775_v29 = vsel %vm1449_vm15, %v1774_v19, 0.0  ;;  %vm3960_vm15 = vmmov %vm3959_vm8  ;;  %v1927_v9 = vld [vmem:[#allocation5 + $0x50] sm:$0xff] }
 0x4cf   : > { %v1662_v33 = vadd.f32 %v1661_v28, %v1654_v27  ;;  %v1765_v27 = vmul.f32 %v1764_v15, %v1758_v1  ;;  %v1781_v28 = vstv %s2702_s17  ;;  %v1778_v36 = vmul.f32 %v1777_v32, %v1775_v29  ;;  %v1922_v15 = vld [vmem:[#allocation5 + $0x28] sm:$0xff]  ;;  %v1921_v1 = vld [vmem:[#allocation5 + $0x20] sm:$0xff] }
 0x4d0   : > { %v1942_v32 = vld [vmem:[#allocation5 + $0xc0] sm:$0xff] }
 0x4d1   : > { %v1669_v39 = vadd.f32 %v1667_v34, %v1662_v33  ;;  %v1782_v33 = vmul.f32 %v1781_v28, %v1775_v29  ;;  %v1767_v35 = vrot.slane %v1765_v27, 1  ;;  %v3095_v27 = vld [vmem:[%s3935_s8] sm:$0xff]   ;;  %v1948_v28 = vld [vmem:[#allocation5 + $0xf0] sm:$0xff]  ;;  %v1947_v29 = vld [vmem:[#allocation5 + $0xe8] sm:$0xff] }
 0x4d3   : > { %v1678_v43 = vadd.f32 %v1677_v37, %v1669_v39  ;;  %v1784_v38 = vrot.slane %v1782_v33, 1  ;;  %v1941_v33 = vld [vmem:[#allocation5 + $0xb8] sm:$0xff] }
 0x4d5   : > { %v1685_v48 = vadd.f32 %v1683_v42, %v1678_v43 }
 0x4d7   : > { %v1695_v53 = vadd.f32 %v1694_v49, %v1685_v48 }
 0x4d9   : > { %v1702_v59 = vadd.f32 %v1700_v54, %v1695_v53  ;;  %v1257_v54 = vld [vmem:[%s3933_s6 + $0x8] sm:$0xff] }
 0x4db   : > { %v1712_v63 = vadd.f32 %v1711_v58, %v1702_v59 }
 0x4dd   : > { %v1719_v6 = vadd.f32 %v1717_v62, %v1712_v63  ;;  %v3096_v63 = vld [vmem:[%s3934_s7] sm:$0xff]  }
 0x4df   : > { %v1729_v0 = vadd.f32 %v1728_v7, %v1719_v6  ;;  %v1930_v6 = vld [vmem:[#allocation5 + $0x68] sm:$0xff]  ;;  %v1929_v7 = vld [vmem:[#allocation5 + $0x60] sm:$0xff] }
 0x4e1   : > { %v1736_v20 = vadd.f32 %v1734_v14, %v1729_v0  ;;  %v1924_v0 = vld [vmem:[#allocation5 + $0x38] sm:$0xff]  ;;  %v1923_v14 = vld [vmem:[#allocation5 + $0x30] sm:$0xff] }
 0x4e3   : > { %v1745_v26 = vadd.f32 %v1744_v16, %v1736_v20 }
 0x4e5   : > { %v1752_v30 = vadd.f32 %v1750_v24, %v1745_v26  ;;  %v1949_v26 = vld [vmem:[#allocation5 + $0xf8] sm:$0xff] }
 0x4e7   : > { %v1762_v34 = vadd.f32 %v1761_v31, %v1752_v30  ;;  %v1946_v30 = vld [vmem:[#allocation5 + $0xe0] sm:$0xff]  ;;  %v1945_v31 = vld [vmem:[#allocation5 + $0xd8] sm:$0xff] }
 0x4e9   : > { %v1769_v37 = vadd.f32 %v1767_v35, %v1762_v34  ;;  %v1940_v34 = vld [vmem:[#allocation5 + $0xb0] sm:$0xff] }
 0x4eb   : > { %v1779_v39 = vadd.f32 %v1778_v36, %v1769_v37 }
 0x4ed   : > { %v1786_v40 = vadd.f32 %v1784_v38, %v1779_v39  ;;  %v1939_v38 = vld [vmem:[#allocation5 + $0xa8] sm:$0xff]  ;;  %v1920_v39 = vld [vmem:[#allocation5 + $0x18] sm:$0xff] }
 0x4ef   : > { %v2703_v41 = vmul.f32 -1.442695, %v1786_v40  ;;  %v1938_v40 = vld [vmem:[#allocation5 + $0xa0] sm:$0xff] }
 0x4f1   : > { %3097 = vpow2.f32 %v2703_v41  ;;  %v1919_v41 = vld [vmem:[#allocation5 + $0x10] sm:$0xff] }
 0x4fe   : > { %v3098_v42 = vpop.eup %3097 }
 0x4ff   : > { %v1790_v43 = vadd.f32 1.0, %v3098_v42 }
 0x501   : > { %3099 = vrcp.f32 %v1790_v43  ;;  %v1937_v43 = vld [vmem:[#allocation5 + $0x98] sm:$0xff] }
 0x50e   : > { %v3100_v46 = vpop.eup %3099 }
 0x50f   : > { %v1796_v5 = vrot.slane %v3100_v46, %v1795_v25  ;;  %v1936_v25 = vld [vmem:[#allocation5 + $0x90] sm:$0xff]  ;;  %v1917_v46 = vld [vmem:[#allocation5] sm:$0xff] }
 0x511   : > { %v1797_v48 = vmul.f32 %v1796_v5, %v3543_v44  ;;  %v1798_v49 = vmul.f32 %v1796_v5, %v3547_v47  ;;  %v1935_v5 = vld [vmem:[#allocation5 + $0x88] sm:$0xff] }
 0x513   : > { %v1799_v50 = vpack.c.bf16 %v1798_v49, %v1797_v48  ;;  %v2207_v48 = vld [vmem:[#allocation5 + $0x1f8] sm:$0xff]  ;;  %v1934_v49 = vld [vmem:[#allocation5 + $0x80] sm:$0xff] }
 0x515   : > { %2934 = vmatpush3.bf16.msra.mxu0 %v1799_v50  ;;  %v2114_v50 = vld [vmem:[#allocation5 + $0x178] sm:$0xff] }
 0x516   : > { %2043 = vmatprep.subr.mxu0 %v1932_v3  ;;  %v2201_v3 = vld [vmem:[#allocation5 + $0x1c8] sm:$0xff] }
 0x518   : > { %2936 = vmatmul.mubr.msk.bf16.vlgmr.msra.gmra.mxu0 %vm1028_vm1, %v3096_v63  ;;  %v2111_v63 = vld [vmem:[#allocation5 + $0x160] sm:$0xff] }
 0x519   : > { %2091 = vmatprep.mubr.f32.mxu0 %v3214_v13  ;;  %2044 = vmatpush1.msra.mxu0 %v1931_v4  ;;  %v2109_v4 = vld [vmem:[#allocation5 + $0x150] sm:$0xff] }
 0x51a   : > { %2045 = vmatprep.subr.mxu0 %v1930_v6  ;;  %v2200_v6 = vld [vmem:[#allocation5 + $0x1c0] sm:$0xff] }
 0x51b   : > { %2046 = vmatpush1.msra.mxu0 %v1929_v7  ;;  %v2108_v7 = vld [vmem:[#allocation5 + $0x148] sm:$0xff] }
 0x51c   : > { %2047 = vmatprep.subr.mxu0 %v1928_v8  ;;  %v2199_v8 = vld [vmem:[#allocation5 + $0x1b8] sm:$0xff] }
 0x51d   : > { %2048 = vmatpush1.msra.mxu0 %v1927_v9 }
 0x51e   : > { %2049 = vmatprep.subr.mxu0 %v1926_v10  ;;  %v2107_v10 = vld [vmem:[#allocation5 + $0x140] sm:$0xff] }
 0x51f   : > { %2050 = vmatpush1.msra.mxu0 %v1925_v12  ;;  %v2198_v12 = vld [vmem:[#allocation5 + $0x1b0] sm:$0xff] }
 0x520   : > { %2051 = vmatprep.subr.mxu0 %v1924_v0  ;;  %v2106_v0 = vld [vmem:[#allocation5 + $0x138] sm:$0xff] }
 0x521   : > { %2052 = vmatpush1.msra.mxu0 %v1923_v14  ;;  %v2197_v14 = vld [vmem:[#allocation5 + $0x1a8] sm:$0xff] }
 0x522   : > { %2053 = vmatprep.subr.mxu0 %v1922_v15  ;;  %v2105_v15 = vld [vmem:[#allocation5 + $0x130] sm:$0xff] }
 0x523   : > { %2054 = vmatpush1.msra.mxu0 %v1921_v1  ;;  %v2196_v1 = vld [vmem:[#allocation5 + $0x1a0] sm:$0xff] }
 0x524   : > { %2055 = vmatprep.subr.mxu0 %v1920_v39 }
 0x525   : > { %2056 = vmatpush1.msra.mxu0 %v1919_v41 }
 0x526   : > { %2057 = vmatprep.subr.mxu0 %v1918_v45 }
 0x527   : > { %2058 = vmatpush1.msra.mxu0 %v1917_v46 }
 0x528   : > { %2227 = vmatprep.subr.mxu0 %v2207_v48 }
 0x548   : > { %v1251_v51 = vpop.f32.mrf.mxu0 }
 0x549   : > { %v1255_v52 = vmax.f32 %v1251_v51, 0.0 }
 0x54a   : > { %v2921_v53 = vpop.f32.mrf.mxu0 }
 0x54b   : > { %2922 = vmatprep.subr.msk.mxu1 %vm3959_vm8, %v1255_v52 }
 0x54c   : > { %2923 = vmatpush3.msk.msra.mxu1 %vm3960_vm15, %v1255_v52 }
 0x54d   : > { %2925 = vmatmul.mubr.msk.f32.vlgmr.msra.gmra.mxu1 %vm1258_vm2, %v1257_v54  ;;  %2927 = vmatprep.subr.bf16.mxu1 %v3214_v13 }
 0x54e   : > { %2929 = vmatprep.mubr.msk.bf16.mxu1 %vm3215_vm7, %v3214_v13 }
 0x5d8   : > { %v1908_v35 = vpop.f32.mrf.mxu0 }
 0x5da   : > { %v2937_v36 = vpop.f32.mrf.mxu0 }
 0x5dc   : > { %v1911_v37 = vpop.f32.mrf.mxu0 }
 0x5de   : > { %v2938_v42 = vpop.f32.mrf.mxu0 }
 0x60d   : > { %v2926_v22 = vpop.f32.mrf.mxu1 }
 0x60e   : > { %v2653_v55 = vmul.f32 -1.442695, %v2926_v22  ;;  %v2206_v22 = vld [vmem:[#allocation5 + $0x1f0] sm:$0xff] }
 0x60f   : > { %v1334_v56 = vpop.f32.mrf.mxu1 }
 0x610   : > { %3101 = vpow2.f32 %v2653_v55  ;;  %v2652_v57 = vmul.f32 -1.442695, %v1334_v56  ;;  %v2205_v56 = vld [vmem:[#allocation5 + $0x1e8] sm:$0xff] }
 0x612   : > { %3103 = vpow2.f32 %v2652_v57 }
 0x61d   : > { %v3102_v58 = vpop.eup %3101 }
 0x61e   : > { %v1350_v59 = vadd.f32 1.0, %v3102_v58  ;;  %v2113_v58 = vld [vmem:[#allocation5 + $0x170] sm:$0xff] }
 0x61f   : > { %v3104_v60 = vpop.eup %3103 }
 0x620   : > { %3105 = vrcp.f32 %v1350_v59  ;;  %v1349_v61 = vadd.f32 1.0, %v3104_v60  ;;  %v2204_v59 = vld [vmem:[#allocation5 + $0x1e0] sm:$0xff] }
 0x622   : > { %3107 = vrcp.f32 %v1349_v61  ;;  %v2112_v61 = vld [vmem:[#allocation5 + $0x168] sm:$0xff] }
 0x62d   : > { %v3106_v62 = vpop.eup %3105 }
 0x62e   : > { %1807 = vperm.xlu1 %3051, %v3106_v62   ;;  %v2203_v62 = vld [vmem:[#allocation5 + $0x1d8] sm:$0xff] }
 0x62f   : > { %v3108_v2 = vpop.eup %3107 }
 0x630   : > { %1802 = vperm.xlu0 %3050, %v3108_v2   ;;  %v2202_v2 = vld [vmem:[#allocation5 + $0x1d0] sm:$0xff] }
 0x6a9   : > { %v1808_v16 = vpop.permute.xlu1 %1807 }
 0x6aa   : > { %v1811_v20 = vmul.f32 %v1808_v16, %v3547_v47  ;;  %v1944_v47 = vld [vmem:[#allocation5 + $0xd0] sm:$0xff]  ;;  %v2104_v16 = vld [vmem:[#allocation5 + $0x128] sm:$0xff] }
 0x6ab   : > { %v1803_v19 = vpop.permute.xlu0 %1802 }
 0x6ac   : > { %v1810_v21 = vmul.f32 %v1803_v19, %v3543_v44  ;;  %v1943_v44 = vld [vmem:[#allocation5 + $0xc8] sm:$0xff]  ;;  %v2195_v19 = vld [vmem:[#allocation5 + $0x198] sm:$0xff] }
 0x6ae   : > { %v1812_v24 = vpack.c.bf16 %v1811_v20, %v1810_v21  ;;  %v2103_v21 = vld [vmem:[#allocation5 + $0x120] sm:$0xff] }
 0x6b0   : > { %2928 = vmatpush3.bf16.msra.mxu1 %v1812_v24  ;;  %v2194_v24 = vld [vmem:[#allocation5 + $0x190] sm:$0xff] }
 0x6b1   : > { %1970 = vmatprep.subr.mxu1 %v1949_v26  ;;  %v2102_v26 = vld [vmem:[#allocation5 + $0x118] sm:$0xff] }
 0x6b3   : > { %2930 = vmatmul.mubr.msk.bf16.vlgmr.msra.gmra.mxu1 %vm1028_vm1, %v3095_v27  ;;  %v2193_v27 = vld [vmem:[#allocation5 + $0x188] sm:$0xff] }
 0x6b4   : > { %1971 = vmatpush1.msra.mxu1 %v1948_v28  ;;  %2018 = vmatprep.mubr.f32.mxu1 %v3214_v13  ;;  %v2101_v28 = vld [vmem:[#allocation5 + $0x110] sm:$0xff] }
 0x6b5   : > { %1972 = vmatprep.subr.mxu1 %v1947_v29  ;;  %v2192_v29 = vld [vmem:[#allocation5 + $0x180] sm:$0xff] }
 0x6b6   : > { %1973 = vmatpush1.msra.mxu1 %v1946_v30  ;;  %v2100_v30 = vld [vmem:[#allocation5 + $0x108] sm:$0xff] }
 0x6b7   : > { %1974 = vmatprep.subr.mxu1 %v1945_v31 }
 0x6b8   : > { %1975 = vmatpush1.msra.mxu1 %v1944_v47  ;;  %v2099_v47 = vld [vmem:[#allocation5 + $0x100] sm:$0xff] }
 0x6b9   : > { %1976 = vmatprep.subr.mxu1 %v1943_v44 }
 0x6ba   : > { %1977 = vmatpush1.msra.mxu1 %v1942_v32 }
 0x6bb   : > { %1978 = vmatprep.subr.mxu1 %v1941_v33 }
 0x6bc   : > { %1979 = vmatpush1.msra.mxu1 %v1940_v34 }
 0x6bd   : > { %1980 = vmatprep.subr.mxu1 %v1939_v38 }
 0x6be   : > { %1981 = vmatpush1.msra.mxu1 %v1938_v40 }
 0x6bf   : > { %1982 = vmatprep.subr.mxu1 %v1937_v43  ;;  %v3109_v43 = vld [vmem:[%s3387_s13] sm:$0xff] }
 0x6c0   : > { %1983 = vmatpush1.msra.mxu1 %v1936_v25 }
 0x6c1   : > { %1984 = vmatprep.subr.mxu1 %v1935_v5 }
 0x6c2   : > { %1985 = vmatpush1.msra.mxu1 %v1934_v49  ;;  %v2444_v49 = vpack.c.bf16 %v3109_v43, %v3109_v43 }
 0x6c3   : > { %2134 = vmatprep.subr.mxu1 %v2114_v50 }
 0x773   : > { %v1859_v51 = vpop.f32.mrf.mxu1 }
 0x774   : > { %v1909_v52 = vadd.f32 %v1908_v35, %v1859_v51  ;;  %v2443_v51 = vld [vmem:[%s3937_s10] sm:$0xf] }
 0x775   : > { %v2931_v53 = vpop.f32.mrf.mxu1 }
 0x776   : > { %v1915_v54 = vadd.f32 %v1909_v52, %v3407_v17  ;;  %v2110_v17 = vld [vmem:[#allocation5 + $0x158] sm:$0xff]  ;;  %v473_v52 = vadd.s32 128, %v3431_v23 }
 0x777   : > { %v1862_v55 = vpop.f32.mrf.mxu1 }
 0x778   : > { %v1951_v57 = vrot.slane %v1915_v54, 4  ;;  %2709 = vmatmul.mubr.msk.f32.vlgmr.msra.gmra.mxu0 %vm1172_vm3, %v1915_v54  ;;  %v1912_v9 = vadd.f32 %v1911_v37, %v1862_v55  ;;  %v485_v53 = vand.u32 15, %v473_v52  ;;  %v478_v54 = vand.u32 15, %v3431_v23 }
 0x779   : > { %2228 = vmatpush1.msra.mxu0 %v2206_v22  ;;  %v2932_v60 = vpop.f32.mrf.mxu1  ;;  %2275 = vmatprep.mubr.f32.mxu0 %v3214_v13 }
 0x77a   : > { %2229 = vmatprep.subr.mxu0 %v2205_v56  ;;  %2708 = vmatmul.mubr.msk.f32.vlgmr.msra.gmra.mxu1 %vm1172_vm3, %v1951_v57  ;;  %v1916_v20 = vadd.f32 %v1912_v9, %v3410_v18  ;;  %vm3853_vm2 = vcmp.lt.s32.totalorder %v485_v53, 15  ;;  %vm3857_vm14 = vcmp.lt.s32.totalorder %v478_v54, 15  ;;  %vm3865_vm11 = vcmp.ge.s32.totalorder %v485_v53, 1 }
 0x77b   : > { %2135 = vmatpush1.msra.mxu1 %v2113_v58  ;;  %2230 = vmatpush1.msra.mxu0 %v2204_v59  ;;  %vm3874_vm15 = vcmp.ge.s32.totalorder %v478_v54, 1 }
 0x77c   : > { %2136 = vmatprep.subr.mxu1 %v2112_v61  ;;  %2231 = vmatprep.subr.mxu0 %v2203_v62  ;;  %v2208_v31 = vrot.slane %v1916_v20, 4 }
 0x77d   : > { %2137 = vmatpush1.msra.mxu1 %v2111_v63  ;;  %2232 = vmatpush1.msra.mxu0 %v2202_v2 }
 0x77e   : > { %2138 = vmatprep.subr.mxu1 %v2110_v17  ;;  %2233 = vmatprep.subr.mxu0 %v2201_v3 }
 0x77f   : > { %2139 = vmatpush1.msra.mxu1 %v2109_v4  ;;  %2234 = vmatpush1.msra.mxu0 %v2200_v6 }
 0x780   : > { %2140 = vmatprep.subr.mxu1 %v2108_v7  ;;  %2235 = vmatprep.subr.mxu0 %v2199_v8 }
 0x781   : > { %2141 = vmatpush1.msra.mxu1 %v2107_v10  ;;  %2236 = vmatpush1.msra.mxu0 %v2198_v12 }
 0x782   : > { %2142 = vmatprep.subr.mxu1 %v2106_v0  ;;  %2237 = vmatprep.subr.mxu0 %v2197_v14 }
 0x783   : > { %2143 = vmatpush1.msra.mxu1 %v2105_v15  ;;  %2238 = vmatpush1.msra.mxu0 %v2196_v1 }
 0x784   : > { %2144 = vmatprep.subr.mxu1 %v2104_v16  ;;  %2239 = vmatprep.subr.mxu0 %v2195_v19 }
 0x785   : > { %2145 = vmatpush1.msra.mxu1 %v2103_v21  ;;  %2240 = vmatpush1.msra.mxu0 %v2194_v24 }
 0x786   : > { %2146 = vmatprep.subr.mxu1 %v2102_v26  ;;  %2241 = vmatprep.subr.mxu0 %v2193_v27 }
 0x787   : > { %2147 = vmatpush1.msra.mxu1 %v2101_v28  ;;  %2242 = vmatpush1.msra.mxu0 %v2192_v29 }
 0x788   : > { %2148 = vmatprep.subr.mxu1 %v2100_v30  ;;  %2711 = vmatmul.mubr.msk.f32.vlgmr.msra.gmra.mxu0 %vm1172_vm3, %v2208_v31 }
 0x789   : > { %2149 = vmatpush1.msra.mxu1 %v2099_v47  ;;  %2182 = vmatprep.mubr.f32.mxu1 %v3214_v13 }
 0x78a   : > { %2710 = vmatmul.mubr.msk.f32.vlgmr.msra.gmra.mxu1 %vm1172_vm3, %v1916_v20  ;;  %2487 = vmatprep.mubr.bf16.mxu0 %v3205_v11  ;;  %vm3961_vm3 = vmmov %vm3959_vm8 }
 0x78b   : > { %2432 = vmatprep.mubr.bf16.mxu1 %v3205_v11  ;;  %v3110_v11 = vld [vmem:[%s3387_s13 + $0x8] sm:$0xff]  ;;  %vm3962_vm7 = vmmov %vm3961_vm3 }
 0x78c   : > { %v2445_v48 = vpack.c.bf16 %v3110_v11, %v3110_v11  ;;  %vm3963_vm6 = vmmov %vm3961_vm3 }
 0x78d   : > { %vm3964_vm4 = vmmov %vm3961_vm3 }
 0x78e   : > { %2739 = vmatprep.subr.msk.bf16.mxu0 %vm3963_vm6, %v2445_v48  ;;  %v2450_v50 = vsel %vm3964_vm4, %v2444_v49, 0  ;;  %vm3973_vm5 = vmmov %vm3961_vm3 }
 0x78f   : > { %2470 = vmatpush1.bf16.msra.mxu0 %v2450_v50  ;;  %vm2713_vm8 = vmpackc.low %vm2365_vm13, %vm3865_vm11 }
 0x792   : > { %2740 = vmatmul.mubr.msk.bf16.vlgmr.msra.gmra.mxu0 %vm943_vm12, %v2443_v51  ;;  %vm2354_vm12 = vcmask 924672  }
 0x838   : > { %v2093_v18 = vpop.f32.mrf.mxu0 }
 0x83a   : > { %v2020_v44 = vpop.f32.mrf.mxu1  ;;  %v2095_v32 = vpop.f32.mrf.mxu0 }
 0x83b   : > { %v2094_v34 = vadd.f32 %v2093_v18, %v2020_v44 }
 0x83c   : > { %v2022_v33 = vpop.f32.mrf.mxu1 }
 0x83d   : > { %v2096_v37 = vadd.f32 %v2095_v32, %v2022_v33 }
 0x848   : > { %v2277_v35 = vpop.f32.mrf.mxu0 }
 0x84a   : > { %v2184_v36 = vpop.f32.mrf.mxu1  ;;  %v2279_v41 = vpop.f32.mrf.mxu0 }
 0x84b   : > { %v2189_v38 = vadd.f32 %v2184_v36, %v2094_v34 }
 0x84c   : > { %v2186_v39 = vpop.f32.mrf.mxu1 }
 0x84d   : > { %v2282_v40 = vadd.f32 %v2277_v35, %v2189_v38  ;;  %v2190_v13 = vadd.f32 %v2186_v39, %v2096_v37 }
 0x84f   : > { %v2283_v42 = vadd.f32 %v2279_v41, %v2190_v13  ;;  %v3827_v45 = vsel %vm3961_vm3, %v2282_v40, %v3109_v43 }
 0x851   : > { %v3831_v25 = vsel %vm3962_vm7, %v2283_v42, %v3110_v11  ;;  %vm3976_vm7 = vmmov 1  }
 0x852   : > { %v3057_v46 = vpack.i.bf16 %v3827_v45, %v3831_v25  ;;  %v3052_v5 = vpack.i.bf16 %v3831_v25, %v3827_v45  ;;  %vm2716_vm6 = vmpackc.low %vm3976_vm7, %vm3874_vm15 }
 0x853   : > { %vm2719_vm4 = vmpackc.low %vm3853_vm2, %vm3976_vm7 }
 0x854   : > { %3058 = vrot.lane.b32.xlu0 %v3057_v46, %s3231_s20  ;;  %3053 = vrot.lane.b32.xlu1 %v3052_v5, %s3232_s30  ;;  %s3982_s20 = sshll.u32 %s3984_s24, 4 }
 0x855   : > { %s457_s22 = scalar_lea.vmem %s3939_s12, %s3982_s20 }
 0x858   : > { %3068 = vrot.lane.b32.xlu0 %v3057_v46, %s3206_s14  ;;  %3063 = vrot.lane.b32.xlu1 %v3052_v5, %s3228_s19  ;;  %s3965_s14 = smov 16   ;;  %s3966_s19 = smov 17   ;;  %v2286_v46 = vld [vmem:[%s3936_s9] sm:$0xf] }
 0x85c   : > { %3078 = vrot.lane.b32.xlu0 %v3052_v5, %s3208_s16  ;;  %3073 = vrot.lane.b32.xlu1 %v3052_v5, %s3218_s28 }
 0x860   : > { %3088 = vrot.lane.b32.xlu0 %v3052_v5, %s3965_s14  ;;  %3083 = vrot.lane.b32.xlu1 %v3052_v5, %s3966_s19  ;;  %v2489_v5 = vpop.f32.mrf.mxu0 }
 0x862   : > { %v2491_v48 = vpop.f32.mrf.mxu0 }
 0x864   : > { %v2493_v49 = vpop.f32.mrf.mxu0 }
 0x866   : > { %v2494_v50 = vpop.f32.mrf.mxu0 }
 0x8c6   : > { %v3059_v22 = vpop.permute.xlu0 %3058  ;;  %v3054_v55 = vpop.permute.xlu1 %3053 }
 0x8c7   : > { %v3056_v57 = vunpack.i.h.bf16 %v3054_v55  ;;  %v3055_v58 = vunpack.i.l.bf16 %v3054_v55  ;;  %v3060_v60 = vunpack.i.l.bf16 %v3059_v22  ;;  %v3061_v8 = vunpack.i.h.bf16 %v3059_v22 }
 0x8c9   : > { %v2378_v61 = vsel %vm2374_vm9, %v3056_v57, 0.0  ;;  %v2375_v62 = vsel %vm2374_vm9, %v3055_v58, %v3056_v57  ;;  %v2358_v9 = vsel %vm2354_vm12, %v3060_v60, 0.0  ;;  %v2355_v29 = vsel %vm2354_vm12, %v3061_v8, %v3060_v60  ;;  %vm2722_vm12 = vmpackc.low %vm3857_vm14, %vm3976_vm7 }
 0x8ca   : > { %v2380_v23 = vsel %vm3853_vm2, %v2378_v61, 0.0  ;;  %v3069_v63 = vpop.permute.xlu0 %3068  ;;  %v3064_v2 = vpop.permute.xlu1 %3063  ;;  %v2379_v17 = vsel %vm3857_vm14, %v2375_v62, 0.0  ;;  %vm3977_vm9 = vcmask 121856  }
 0x8cb   : > { %v2390_v4 = vpack.c.bf16 %v2380_v23, %v2380_v23  ;;  %v3070_v6 = vunpack.i.l.bf16 %v3069_v63  ;;  %v3066_v7 = vunpack.i.h.bf16 %v3064_v2  ;;  %v3065_v10 = vunpack.i.l.bf16 %v3064_v2 }
 0x8cc   : > { %v2389_v12 = vpack.c.bf16 %v2379_v17, %v2379_v17  ;;  %v3071_v15 = vunpack.i.h.bf16 %v3069_v63 }
 0x8cd   : > { %v2714_v0 = vpack.c.bf16 %v3066_v7, %v2358_v9  ;;  %2712 = vmatprep.subr.msk.bf16.mxu1 %vm3973_vm5, %v2390_v4  ;;  %v2347_v1 = vsel %vm2343_vm0, %v3070_v6, 0.0  ;;  %v2366_v21 = vsel %vm2365_vm13, %v3065_v10, %v3066_v7  ;;  %vm2725_vm13 = vmpackc.low %vm3865_vm11, %vm3853_vm2  ;;  %vm3979_vm5 = vcmask 138240  }
 0x8ce   : > { %v3079_v16 = vpop.permute.xlu0 %3078  ;;  %v3074_v19 = vpop.permute.xlu1 %3073  ;;  %v2395_v20 = vsel %vm3961_vm3, %v2389_v12, 0  ;;  %v2717_v30 = vpack.c.bf16 %v2366_v21, %v2355_v29  ;;  %v2344_v31 = vsel %vm2343_vm0, %v3071_v15, %v3070_v6  ;;  %v2720_v47 = vpack.c.bf16 %v2347_v1, %v3831_v25  ;;  %vm3978_vm0 = vmmov %vm3977_vm9 }
 0x8cf   : > { %v3081_v24 = vunpack.i.h.bf16 %v3079_v16  ;;  %v3080_v26 = vunpack.i.l.bf16 %v3079_v16  ;;  %v3076_v27 = vunpack.i.h.bf16 %v3074_v19  ;;  %v3075_v28 = vunpack.i.l.bf16 %v3074_v19  ;;  %2407 = vmatpush1.bf16.msra.mxu1 %v2395_v20  ;;  %vm2731_vm2 = vmpackc.low %vm3976_vm7, %vm3865_vm11 }
 0x8d0   : > { %2715 = vmatprep.subr.msk.bf16.mxu1 %vm2713_vm8, %v2714_v0  ;;  %v2723_v38 = vpack.c.bf16 %v2344_v31, %v3827_v45  ;;  %vm2728_vm8 = vmpackc.low %vm3874_vm15, %vm3857_vm14  ;;  %vm3981_vm14 = vcmask 588800  }
 0x8d1   : > { %v2333_v18 = vsel %vm966_vm10, %v3080_v26, %v3081_v24  ;;  %v2317_v44 = vsel %vm3977_vm9, %v3075_v28, %v3076_v27  ;;  %v2336_v39 = vsel %vm966_vm10, 0.0, %v3080_v26  ;;  %v2320_v40 = vsel %vm3978_vm0, 0.0, %v3075_v28  ;;  %vm2734_vm10 = vmneg %vm1028_vm1 }
 0x8d2   : > { %v3089_v32 = vpop.permute.xlu0 %3088  ;;  %v3084_v33 = vpop.permute.xlu1 %3083  ;;  %v2726_v13 = vpack.c.bf16 %v2333_v18, %v2317_v44  ;;  %v2729_v43 = vpack.c.bf16 %v2336_v39, %v2320_v40  ;;  %vm3980_vm3 = vmmov %vm3979_vm5 }
 0x8d3   : > { %v3091_v34 = vunpack.i.h.bf16 %v3089_v32  ;;  %v3090_v35 = vunpack.i.l.bf16 %v3089_v32  ;;  %v3086_v36 = vunpack.i.h.bf16 %v3084_v33  ;;  %v3085_v37 = vunpack.i.l.bf16 %v3084_v33  ;;  %2718 = vmatpush1.bf16.msk.msra.mxu1 %vm2716_vm6, %v2717_v30  ;;  %vm2735_vm6 = vmpackc.low %vm2734_vm10, %vm3874_vm15 }
 0x8d4   : > { %2721 = vmatprep.subr.msk.bf16.mxu1 %vm2719_vm4, %v2720_v47 }
 0x8d5   : > { %v2309_v41 = vsel %vm1028_vm1, %v3090_v35, %v3091_v34  ;;  %v2293_v42 = vsel %vm3979_vm5, %v3085_v37, %v3086_v36  ;;  %v2296_v45 = vsel %vm3980_vm3, 0.0, %v3085_v37 }
 0x8d6   : > { %v2732_v11 = vpack.c.bf16 %v2309_v41, %v2293_v42  ;;  %v2736_v25 = vpack.c.bf16 %v3090_v35, %v2296_v45 }
 0x8d7   : > { %2724 = vmatpush1.bf16.msk.msra.mxu1 %vm2722_vm12, %v2723_v38 }
 0x8d8   : > { %2727 = vmatprep.subr.msk.bf16.mxu1 %vm2725_vm13, %v2726_v13 }
 0x8db   : > { %2730 = vmatpush1.bf16.msk.msra.mxu1 %vm2728_vm8, %v2729_v43 }
 0x8dc   : > { %2733 = vmatprep.subr.msk.bf16.mxu1 %vm2731_vm2, %v2732_v11 }
 0x8df   : > { %2737 = vmatpush1.bf16.msk.msra.mxu1 %vm2735_vm6, %v2736_v25 }
 0x8e2   : > { %2738 = vmatmul.mubr.msk.bf16.vlgmr.msra.gmra.mxu1 %vm3981_vm14, %v2286_v46 }
 0x9a2   : > { %v2434_v51 = vpop.f32.mrf.mxu1 }
 0x9a3   : > { %v2441_v52 = vmax.f32 %v2434_v51, 0.0 }
 0x9a4   : > { %v2436_v53 = vpop.f32.mrf.mxu1 }
 0x9a5   : > { %v2496_v54 = vadd.f32 %v2489_v5, %v2441_v52  ;;  %v2442_v22 = vmax.f32 %v2436_v53, 0.0 }
 0x9a6   : > { %v2438_v55 = vpop.f32.mrf.mxu1 }
 0x9a7   : > { %2498 = vst [vmem:[%s457_s22] sm:$0xff] %v2496_v54  ;;  %v2497_v56 = vadd.f32 %v2491_v48, %v2442_v22 }
 0x9a8   : > { %v2439_v57 = vpop.f32.mrf.mxu1 }
 0x9a9   : > { %2499 = vst [vmem:[%s457_s22 + $0x8] sm:$0xff] %v2497_v56 }
 0x9aa PF: > { %s25_s21 = sadd.s32 1, %s3196_s21  }
 0x9ab   : > { %p22_p3 = scmp.ge.s32.totalorder %s25_s21, 4  }
 0x9ad   :  { %24 = sbr.rel (!%p22_p3) target bundleno = 3 (0x3), region = 118 }
 0x9b2   :  { %2521 = vsyncpa [#allocation3], 1 }
 0x9b3   :  { %2523 = vsyncpa [#allocation3 + $0x1], 1 }
 0x9b4   :  { %2524 = vsyncpa [#allocation6], 1 }
 0x9b5   :  { %2525 = vsyncpa [#allocation4], 1 }
 0x9b6   :  { %2527 = vsyncpa [#allocation4 + $0x1], 1 }

</bundles_post_ra>
